<compile_context>
chip_gen: v6e
topology: v6e:2x2x1
jax: 0.10.0
libtpu: 0.0.40
codegen_flags: <defaults>
</compile_context>

<pallas_src>
import functools

import jax
import jax.numpy as jnp
from jax.experimental import pallas as pl
from jax.experimental.pallas import tpu as pltpu


def _round_up(a, b):
    return -(-a // b) * b


# --------------------------------------------------------------------------
# Fused kernel: one image (block = (1, H, W, C)) per grid step
# --------------------------------------------------------------------------
def bottleneck_kernel(x_ref, w1_ref, s1_ref, b1_ref,
                      w2_ref, s2_ref, b2_ref,
                      w3_ref, s3_ref, b3_ref,
                      o_ref, y1p_ref, *, H, W, Wp):
    Cin = x_ref.shape[-1]
    P = w1_ref.shape[-1]             # planes
    Cout = w3_ref.shape[-1]          # 4 * planes
    M = H * W                        # rows, natural layout
    Mo = H * Wp                      # rows, width-padded layout

    # ---- conv1 (1x1) + bn1 + relu ---------------------------------------
    x2d = x_ref[...].reshape(M, Cin)                          # bf16 (M, Cin)
    y1 = jnp.dot(x2d, w1_ref[...], preferred_element_type=jnp.float32)
    y1 = jnp.maximum(y1 * s1_ref[...] + b1_ref[...], 0.0)     # f32 epilogue

    # ---- stage y1 into the zero-padded flat VMEM scratch ------------------
    # scratch row r*Wp + c  <->  zero-padded y1 at (padded row r, col c).
    # Three sublane-aligned bulk stores (Wp is a multiple of 16):
    #   rows [0, Wp)            : top halo band (zeros)
    #   rows [Wp, (H+1)*Wp)     : interior, left/right pad built in registers
    #   rows [(H+1)*Wp,(H+2)*Wp): bottom halo band (zeros)
    # Rows beyond (H+2)*Wp (slack) are only ever read for garbage columns.
    dt = y1p_ref.dtype
    y1r = y1.astype(dt).reshape(H, W, P)
    y1pad = jnp.concatenate(
        [jnp.zeros((H, 1, P), dt), y1r, jnp.zeros((H, Wp - W - 1, P), dt)],
        axis=1).reshape(Mo, P)
    zband = jnp.zeros((Wp, P), dt)
    y1p_ref[pl.ds(0, Wp), :] = zband
    y1p_ref[pl.ds(Wp, Mo), :] = y1pad
    y1p_ref[pl.ds((H + 1) * Wp, Wp), :] = zband

    # ---- conv2 (3x3, pad=1): single K-concatenated im2col matmul ----------
    # output row m = h*Wp + w' (w' in [0, Wp); w' >= W are garbage columns);
    # tap (dy, dx) is the scratch view shifted by dy*Wp + dx rows.
    patches = jnp.concatenate(
        [y1p_ref[pl.ds(dy * Wp + dx, Mo), :]
         for dy in range(3) for dx in range(3)],
        axis=-1)                                              # (Mo, 9P) bf16
    y2 = jnp.dot(patches, w2_ref[...], preferred_element_type=jnp.float32)
    y2 = jnp.maximum(y2 * s2_ref[...] + b2_ref[...], 0.0)
    # drop the garbage columns per row (compaction done on bf16)
    y2n = y2.astype(jnp.bfloat16).reshape(H, Wp, P)[:, :W, :].reshape(M, P)

    # ---- conv3 (1x1) + bn3 + residual + relu ------------------------------
    y3 = jnp.dot(y2n, w3_ref[...], preferred_element_type=jnp.float32)
    y3 = y3 * s3_ref[...] + b3_ref[...]
    y3 = y3 + x2d.astype(jnp.float32)                         # identity shortcut
    o_ref[...] = jnp.maximum(y3, 0.0).reshape(1, H, W, Cout).astype(o_ref.dtype)


# --------------------------------------------------------------------------
# One-time parameter preparation (hoisted out of the hot path)
# --------------------------------------------------------------------------
def _fold_bn(gamma, beta, mean, var, eps=1e-5):
    scale = gamma / jnp.sqrt(var + eps)
    bias = beta - mean * scale
    return (scale.reshape(1, -1).astype(jnp.float32),
            bias.reshape(1, -1).astype(jnp.float32))


def prepare_params(params):
    """PyTorch OIHW weights -> bf16 matmul layouts + folded BN scale/bias."""
    w1, bn1, w2, bn2, w3, bn3 = params
    planes = w1.shape[0]
    w1_mat = jnp.transpose(w1[:, :, 0, 0], (1, 0)).astype(jnp.bfloat16)   # (Cin, P)
    # (O, I, kh, kw) -> (kh, kw, I, O) -> (9*P, P); row t*P+cin, t = dy*3+dx
    w2_mat = jnp.transpose(w2, (2, 3, 1, 0)).reshape(9 * planes, planes)
    w2_mat = w2_mat.astype(jnp.bfloat16)
    w3_mat = jnp.transpose(w3[:, :, 0, 0], (1, 0)).astype(jnp.bfloat16)   # (P, Cout)
    s1, b1 = _fold_bn(*bn1)
    s2, b2 = _fold_bn(*bn2)
    s3, b3 = _fold_bn(*bn3)
    return (w1_mat, s1, b1, w2_mat, s2, b2, w3_mat, s3, b3)


# --------------------------------------------------------------------------
# Forward wrapper
# --------------------------------------------------------------------------
def bottleneck_forward(x_nchw, prepared):
    (w1_mat, s1, b1, w2_mat, s2, b2, w3_mat, s3, b3) = prepared
    N, Cin, H, W = x_nchw.shape
    planes = w1_mat.shape[1]
    Cout = w3_mat.shape[1]
    assert Cin == Cout, "identity shortcut requires inplanes == planes * 4"

    # NCHW -> NHWC once; bf16 activations halve HBM/VMEM traffic and feed MXU.
    x_nhwc = jnp.transpose(x_nchw, (0, 2, 3, 1)).astype(jnp.bfloat16)

    # Padded row stride rounded to bf16 sublane-packing granularity (16) so
    # dy tap shifts and staging stores are full-vreg; extra columns per row
    # are garbage and dropped before conv3.
    Wp = _round_up(W + 2, 16)
    # flat padded-y1 rows (+2 slack for the furthest garbage tap read)
    mscr = _round_up((H + 2) * Wp + 2, 16)

    out_nhwc = pl.pallas_call(
        functools.partial(bottleneck_kernel, H=H, W=W, Wp=Wp),
        out_shape=jax.ShapeDtypeStruct((N, H, W, Cout), jnp.bfloat16),
        grid=(N,),
        in_specs=[
            pl.BlockSpec((1, H, W, Cin), lambda n: (n, 0, 0, 0)),
            # weights / BN params: constant index_map -> resident in VMEM
            pl.BlockSpec((Cin, planes), lambda n: (0, 0)),
            pl.BlockSpec((1, planes), lambda n: (0, 0)),
            pl.BlockSpec((1, planes), lambda n: (0, 0)),
            pl.BlockSpec((9 * planes, planes), lambda n: (0, 0)),
            pl.BlockSpec((1, planes), lambda n: (0, 0)),
            pl.BlockSpec((1, planes), lambda n: (0, 0)),
            pl.BlockSpec((planes, Cout), lambda n: (0, 0)),
            pl.BlockSpec((1, Cout), lambda n: (0, 0)),
            pl.BlockSpec((1, Cout), lambda n: (0, 0)),
        ],
        out_specs=pl.BlockSpec((1, H, W, Cout), lambda n: (n, 0, 0, 0)),
        scratch_shapes=[pltpu.VMEM((mscr, planes), jnp.bfloat16)],
        compiler_params=pltpu.CompilerParams(
            dimension_semantics=("parallel",),
            # explicit limit: v5e's default scoped VMEM is only 16 MiB;
            # 48 MiB stays within v7x's 64 MiB physical VMEM.
            vmem_limit_bytes=48 * 1024 * 1024),
    )(x_nhwc, w1_mat, s1, b1, w2_mat, s2, b2, w3_mat, s3, b3)

    # NCHW output for PyTorch parity; kept bf16 (next block wants bf16 anyway).
    return jnp.transpose(out_nhwc, (0, 3, 1, 2))


# --------------------------------------------------------------------------
# Pure-JAX reference (mirrors PyTorch NCHW semantics, f32) for verification
# --------------------------------------------------------------------------
def bottleneck_reference(x, params, eps=1e-5):
    (w1, bn1, w2, bn2, w3, bn3) = params

    def conv(x, w, pad=0):
        return jax.lax.conv_general_dilated(
            x, w, (1, 1), [(pad, pad), (pad, pad)],
            dimension_numbers=("NCHW", "OIHW", "NCHW"))

    def bn(x, p):
        g, b, m, v = p
        g = g[None, :, None, None]
        b = b[None, :, None, None]
        m = m[None, :, None, None]
        v = v[None, :, None, None]
        return g * (x - m) / jnp.sqrt(v + eps) + b

    relu = lambda t: jnp.maximum(t, 0.0)
    out = relu(bn(conv(x, w1), bn1))
    out = relu(bn(conv(out, w2, pad=1), bn2))
    out = bn(conv(out, w3), bn3)
    return relu(out + x)


# --------------------------------------------------------------------------
# Main
# --------------------------------------------------------------------------
if __name__ == "__main__":
    # NOTE: small shapes for the functional test; perf tuning should use real
    # ResNet channel counts (planes >= 64, Cin/Cout >= 256) so the output is
    # lane-dense (>= 128) and matmuls are not MXU-starved.
    N, planes = 2, 4
    inplanes = planes * 4       # 16 -> identity shortcut works (downsample=None)
    H = W = 16

    key = jax.random.PRNGKey(0)
    ks = jax.random.split(key, 8)

    def bn_params(k, c):
        k1, k2, k3, k4 = jax.random.split(k, 4)
        gamma = jax.random.uniform(k1, (c,), minval=0.5, maxval=1.5)
        beta = 0.1 * jax.random.normal(k2, (c,))
        mean = 0.1 * jax.random.normal(k3, (c,))
        var = jax.random.uniform(k4, (c,), minval=0.5, maxval=1.5)
        return (gamma.astype(jnp.float32), beta.astype(jnp.float32),
                mean.astype(jnp.float32), var.astype(jnp.float32))

    # PyTorch OIHW weight layouts
    w1 = 0.1 * jax.random.normal(ks[0], (planes, inplanes, 1, 1), jnp.float32)
    w2 = 0.1 * jax.random.normal(ks[1], (planes, planes, 3, 3), jnp.float32)
    w3 = 0.1 * jax.random.normal(ks[2], (planes * 4, planes, 1, 1), jnp.float32)
    bn1 = bn_params(ks[3], planes)
    bn2 = bn_params(ks[4], planes)
    bn3 = bn_params(ks[5], planes * 4)
    params = (w1, bn1, w2, bn2, w3, bn3)

    x = jax.random.normal(ks[6], (N, inplanes, H, W), jnp.float32)

    prepared = prepare_params(params)
    run = jax.jit(bottleneck_forward)
    out = jax.block_until_ready(run(x, prepared))

    ref = jax.block_until_ready(bottleneck_reference(x, params))
    assert out.shape == ref.shape == (N, inplanes, H, W)
    out_f32 = out.astype(jnp.float32)
    max_err = float(jnp.max(jnp.abs(out_f32 - ref)))
    # bf16 MXU inputs + bf16 output -> relaxed tolerance vs the f32 reference
    assert jnp.allclose(out_f32, ref, atol=5e-2, rtol=5e-2), max_err

    print("KERNEL_OK")
</pallas_src>

<mosaic_0001>
module attributes {stable_mosaic.version = 11 : i64} {
  func.func @bottleneck_kernel(%arg0: i32, %arg1: memref<1x16x16x16xbf16, #tpu.memory_space<vmem>>, %arg2: memref<16x4xbf16, #tpu.memory_space<vmem>>, %arg3: memref<1x4xf32, #tpu.memory_space<vmem>>, %arg4: memref<1x4xf32, #tpu.memory_space<vmem>>, %arg5: memref<36x4xbf16, #tpu.memory_space<vmem>>, %arg6: memref<1x4xf32, #tpu.memory_space<vmem>>, %arg7: memref<1x4xf32, #tpu.memory_space<vmem>>, %arg8: memref<4x16xbf16, #tpu.memory_space<vmem>>, %arg9: memref<1x16xf32, #tpu.memory_space<vmem>>, %arg10: memref<1x16xf32, #tpu.memory_space<vmem>>, %arg11: memref<1x16x16x16xbf16, #tpu.memory_space<vmem>>, %arg12: memref<592x4xbf16, #tpu.memory_space<vmem>>) attributes {dimension_semantics = [#tpu.dimension_semantics<parallel>], iteration_bounds = array<i64: 2>, scalar_prefetch = 0 : i64, scratch_operands = 1 : i64, tpu.core_type = #tpu.core_type<tc>, window_params = [{transform_indices = @transform_0, window_bounds = array<i64: 1, 16, 16, 16>}, {pipeline_mode = #tpu.pipeline_mode<synchronous>, transform_indices = @transform_1, window_bounds = array<i64: 16, 4>}, {pipeline_mode = #tpu.pipeline_mode<synchronous>, transform_indices = @transform_2, window_bounds = array<i64: 1, 4>}, {pipeline_mode = #tpu.pipeline_mode<synchronous>, transform_indices = @transform_3, window_bounds = array<i64: 1, 4>}, {pipeline_mode = #tpu.pipeline_mode<synchronous>, transform_indices = @transform_4, window_bounds = array<i64: 36, 4>}, {pipeline_mode = #tpu.pipeline_mode<synchronous>, transform_indices = @transform_5, window_bounds = array<i64: 1, 4>}, {pipeline_mode = #tpu.pipeline_mode<synchronous>, transform_indices = @transform_6, window_bounds = array<i64: 1, 4>}, {pipeline_mode = #tpu.pipeline_mode<synchronous>, transform_indices = @transform_7, window_bounds = array<i64: 4, 16>}, {pipeline_mode = #tpu.pipeline_mode<synchronous>, transform_indices = @transform_8, window_bounds = array<i64: 1, 16>}, {pipeline_mode = #tpu.pipeline_mode<synchronous>, transform_indices = @transform_9, window_bounds = array<i64: 1, 16>}, {transform_indices = @transform_10, window_bounds = array<i64: 1, 16, 16, 16>}]} {
    %c0 = arith.constant 0 : index
    %c0_0 = arith.constant 0 : index
    %c0_1 = arith.constant 0 : index
    %c0_2 = arith.constant 0 : index
    %0 = vector.load %arg1[%c0, %c0_0, %c0_1, %c0_2] : memref<1x16x16x16xbf16, #tpu.memory_space<vmem>>, vector<1x16x16x16xbf16>
    %1 = vector.shape_cast %0 : vector<1x16x16x16xbf16> to vector<256x16xbf16>
    %c0_3 = arith.constant 0 : index
    %c0_4 = arith.constant 0 : index
    %2 = vector.load %arg2[%c0_3, %c0_4] : memref<16x4xbf16, #tpu.memory_space<vmem>>, vector<16x4xbf16>
    %cst = arith.constant dense<0.000000e+00> : vector<256x4xf32>
    %3 = tpu.matmul %1, %2, %cst {dimension_numbers = #tpu.dot_dimension_numbers<[1], [0], [0], [1], [0, 0, 1, 1], [], []>} : vector<256x16xbf16>, vector<16x4xbf16>, vector<256x4xf32> -> vector<256x4xf32>
    %c0_5 = arith.constant 0 : index
    %c0_6 = arith.constant 0 : index
    %4 = vector.load %arg3[%c0_5, %c0_6] : memref<1x4xf32, #tpu.memory_space<vmem>>, vector<1x4xf32>
    %5 = vector.broadcast %4 : vector<1x4xf32> to vector<256x4xf32>
    %6 = arith.mulf %3, %5 : vector<256x4xf32>
    %c0_7 = arith.constant 0 : index
    %c0_8 = arith.constant 0 : index
    %7 = vector.load %arg4[%c0_7, %c0_8] : memref<1x4xf32, #tpu.memory_space<vmem>>, vector<1x4xf32>
    %8 = vector.broadcast %7 : vector<1x4xf32> to vector<256x4xf32>
    %9 = arith.addf %6, %8 : vector<256x4xf32>
    %cst_9 = arith.constant 0.000000e+00 : f32
    %10 = vector.broadcast %cst_9 : f32 to vector<256x4xf32>
    %11 = arith.maximumf %9, %10 : vector<256x4xf32>
    %12 = arith.truncf %11 : vector<256x4xf32> to vector<256x4xbf16>
    %13 = vector.shape_cast %12 : vector<256x4xbf16> to vector<16x16x4xbf16>
    %cst_10 = arith.constant 0.000000e+00 : bf16
    %14 = vector.broadcast %cst_10 : bf16 to vector<16x1x4xbf16>
    %cst_11 = arith.constant 0.000000e+00 : bf16
    %15 = vector.broadcast %cst_11 : bf16 to vector<16x15x4xbf16>
    %16 = tpu.concatenate %14, %13, %15 in 1 : vector<16x1x4xbf16>, vector<16x16x4xbf16>, vector<16x15x4xbf16> -> vector<16x32x4xbf16>
    %17 = vector.shape_cast %16 : vector<16x32x4xbf16> to vector<512x4xbf16>
    %cst_12 = arith.constant 0.000000e+00 : bf16
    %18 = vector.broadcast %cst_12 : bf16 to vector<32x4xbf16>
    %c0_13 = arith.constant 0 : index
    %c0_14 = arith.constant 0 : index
    %19 = vector.load %arg12[%c0_13, %c0_14] : memref<592x4xbf16, #tpu.memory_space<vmem>>, vector<32x4xbf16>
    tpu.vector_store %arg12[%c0_13, %c0_14], %18 {strides = array<i32>} : memref<592x4xbf16, #tpu.memory_space<vmem>>, vector<32x4xbf16>,
    %c32 = arith.constant 32 : index
    %c0_15 = arith.constant 0 : index
    %20 = vector.load %arg12[%c32, %c0_15] : memref<592x4xbf16, #tpu.memory_space<vmem>>, vector<512x4xbf16>
    tpu.vector_store %arg12[%c32, %c0_15], %17 {strides = array<i32>} : memref<592x4xbf16, #tpu.memory_space<vmem>>, vector<512x4xbf16>,
    %c544 = arith.constant 544 : index
    %c0_16 = arith.constant 0 : index
    %21 = vector.load %arg12[%c544, %c0_16] : memref<592x4xbf16, #tpu.memory_space<vmem>>, vector<32x4xbf16>
    tpu.vector_store %arg12[%c544, %c0_16], %18 {strides = array<i32>} : memref<592x4xbf16, #tpu.memory_space<vmem>>, vector<32x4xbf16>,
    %c0_17 = arith.constant 0 : index
    %c0_18 = arith.constant 0 : index
    %22 = vector.load %arg12[%c0_17, %c0_18] : memref<592x4xbf16, #tpu.memory_space<vmem>>, vector<512x4xbf16>
    %c1 = arith.constant 1 : index
    %c0_19 = arith.constant 0 : index
    %23 = vector.load %arg12[%c1, %c0_19] : memref<592x4xbf16, #tpu.memory_space<vmem>>, vector<512x4xbf16>
    %c2 = arith.constant 2 : index
    %c0_20 = arith.constant 0 : index
    %24 = vector.load %arg12[%c2, %c0_20] : memref<592x4xbf16, #tpu.memory_space<vmem>>, vector<512x4xbf16>
    %c32_21 = arith.constant 32 : index
    %c0_22 = arith.constant 0 : index
    %25 = vector.load %arg12[%c32_21, %c0_22] : memref<592x4xbf16, #tpu.memory_space<vmem>>, vector<512x4xbf16>
    %c33 = arith.constant 33 : index
    %c0_23 = arith.constant 0 : index
    %26 = vector.load %arg12[%c33, %c0_23] : memref<592x4xbf16, #tpu.memory_space<vmem>>, vector<512x4xbf16>
    %c34 = arith.constant 34 : index
    %c0_24 = arith.constant 0 : index
    %27 = vector.load %arg12[%c34, %c0_24] : memref<592x4xbf16, #tpu.memory_space<vmem>>, vector<512x4xbf16>
    %c64 = arith.constant 64 : index
    %c0_25 = arith.constant 0 : index
    %28 = vector.load %arg12[%c64, %c0_25] : memref<592x4xbf16, #tpu.memory_space<vmem>>, vector<512x4xbf16>
    %c65 = arith.constant 65 : index
    %c0_26 = arith.constant 0 : index
    %29 = vector.load %arg12[%c65, %c0_26] : memref<592x4xbf16, #tpu.memory_space<vmem>>, vector<512x4xbf16>
    %c66 = arith.constant 66 : index
    %c0_27 = arith.constant 0 : index
    %30 = vector.load %arg12[%c66, %c0_27] : memref<592x4xbf16, #tpu.memory_space<vmem>>, vector<512x4xbf16>
    %31 = tpu.concatenate %22, %23, %24, %25, %26, %27, %28, %29, %30 in 1 : vector<512x4xbf16>, vector<512x4xbf16>, vector<512x4xbf16>, vector<512x4xbf16>, vector<512x4xbf16>, vector<512x4xbf16>, vector<512x4xbf16>, vector<512x4xbf16>, vector<512x4xbf16> -> vector<512x36xbf16>
    %c0_28 = arith.constant 0 : index
    %c0_29 = arith.constant 0 : index
    %32 = vector.load %arg5[%c0_28, %c0_29] : memref<36x4xbf16, #tpu.memory_space<vmem>>, vector<36x4xbf16>
    %cst_30 = arith.constant dense<0.000000e+00> : vector<512x4xf32>
    %33 = tpu.matmul %31, %32, %cst_30 {dimension_numbers = #tpu.dot_dimension_numbers<[1], [0], [0], [1], [0, 0, 1, 1], [], []>} : vector<512x36xbf16>, vector<36x4xbf16>, vector<512x4xf32> -> vector<512x4xf32>
    %c0_31 = arith.constant 0 : index
    %c0_32 = arith.constant 0 : index
    %34 = vector.load %arg6[%c0_31, %c0_32] : memref<1x4xf32, #tpu.memory_space<vmem>>, vector<1x4xf32>
    %35 = vector.broadcast %34 : vector<1x4xf32> to vector<512x4xf32>
    %36 = arith.mulf %33, %35 : vector<512x4xf32>
    %c0_33 = arith.constant 0 : index
    %c0_34 = arith.constant 0 : index
    %37 = vector.load %arg7[%c0_33, %c0_34] : memref<1x4xf32, #tpu.memory_space<vmem>>, vector<1x4xf32>
    %38 = vector.broadcast %37 : vector<1x4xf32> to vector<512x4xf32>
    %39 = arith.addf %36, %38 : vector<512x4xf32>
    %cst_35 = arith.constant 0.000000e+00 : f32
    %40 = vector.broadcast %cst_35 : f32 to vector<512x4xf32>
    %41 = arith.maximumf %39, %40 : vector<512x4xf32>
    %42 = arith.truncf %41 : vector<512x4xf32> to vector<512x4xbf16>
    %43 = vector.shape_cast %42 : vector<512x4xbf16> to vector<16x32x4xbf16>
    %44 = vector.extract_strided_slice %43 {offsets = [0, 0, 0], sizes = [16, 16, 4], strides = [1, 1, 1]} : vector<16x32x4xbf16> to vector<16x16x4xbf16>
    %45 = vector.shape_cast %44 : vector<16x16x4xbf16> to vector<256x4xbf16>
    %c0_36 = arith.constant 0 : index
    %c0_37 = arith.constant 0 : index
    %46 = vector.load %arg8[%c0_36, %c0_37] : memref<4x16xbf16, #tpu.memory_space<vmem>>, vector<4x16xbf16>
    %cst_38 = arith.constant dense<0.000000e+00> : vector<256x16xf32>
    %47 = tpu.matmul %45, %46, %cst_38 {dimension_numbers = #tpu.dot_dimension_numbers<[1], [0], [0], [1], [0, 0, 1, 1], [], []>} : vector<256x4xbf16>, vector<4x16xbf16>, vector<256x16xf32> -> vector<256x16xf32>
    %c0_39 = arith.constant 0 : index
    %c0_40 = arith.constant 0 : index
    %48 = vector.load %arg9[%c0_39, %c0_40] : memref<1x16xf32, #tpu.memory_space<vmem>>, vector<1x16xf32>
    %49 = vector.broadcast %48 : vector<1x16xf32> to vector<256x16xf32>
    %50 = arith.mulf %47, %49 : vector<256x16xf32>
    %c0_41 = arith.constant 0 : index
    %c0_42 = arith.constant 0 : index
    %51 = vector.load %arg10[%c0_41, %c0_42] : memref<1x16xf32, #tpu.memory_space<vmem>>, vector<1x16xf32>
    %52 = vector.broadcast %51 : vector<1x16xf32> to vector<256x16xf32>
    %53 = arith.addf %50, %52 : vector<256x16xf32>
    %54 = arith.extf %1 : vector<256x16xbf16> to vector<256x16xf32>
    %55 = arith.addf %53, %54 : vector<256x16xf32>
    %cst_43 = arith.constant 0.000000e+00 : f32
    %56 = vector.broadcast %cst_43 : f32 to vector<256x16xf32>
    %57 = arith.maximumf %55, %56 : vector<256x16xf32>
    %58 = vector.shape_cast %57 : vector<256x16xf32> to vector<1x16x16x16xf32>
    %59 = arith.truncf %58 : vector<1x16x16x16xf32> to vector<1x16x16x16xbf16>
    %c0_44 = arith.constant 0 : index
    %c0_45 = arith.constant 0 : index
    %c0_46 = arith.constant 0 : index
    %c0_47 = arith.constant 0 : index
    %60 = vector.load %arg11[%c0_44, %c0_45, %c0_46, %c0_47] : memref<1x16x16x16xbf16, #tpu.memory_space<vmem>>, vector<1x16x16x16xbf16>
    tpu.vector_store %arg11[%c0_44, %c0_45, %c0_46, %c0_47], %59 {strides = array<i32>} : memref<1x16x16x16xbf16, #tpu.memory_space<vmem>>, vector<1x16x16x16xbf16>,
    return
  }
  func.func @transform_0(%arg0: i32) -> (i32, i32, i32, i32) {
    %c0_i32 = arith.constant 0 : i32
    %c0_i32_0 = arith.constant 0 : i32
    %c0_i32_1 = arith.constant 0 : i32
    %c0_i32_2 = arith.constant 0 : i32
    return %arg0, %c0_i32, %c0_i32_0, %c0_i32_1 : i32, i32, i32, i32
  }
  func.func @transform_1(%arg0: i32) -> (i32, i32) {
    %c0_i32 = arith.constant 0 : i32
    %c0_i32_0 = arith.constant 0 : i32
    %c0_i32_1 = arith.constant 0 : i32
    return %c0_i32, %c0_i32_0 : i32, i32
  }
  func.func @transform_2(%arg0: i32) -> (i32, i32) {
    %c0_i32 = arith.constant 0 : i32
    %c0_i32_0 = arith.constant 0 : i32
    %c0_i32_1 = arith.constant 0 : i32
    return %c0_i32, %c0_i32_0 : i32, i32
  }
  func.func @transform_3(%arg0: i32) -> (i32, i32) {
    %c0_i32 = arith.constant 0 : i32
    %c0_i32_0 = arith.constant 0 : i32
    %c0_i32_1 = arith.constant 0 : i32
    return %c0_i32, %c0_i32_0 : i32, i32
  }
  func.func @transform_4(%arg0: i32) -> (i32, i32) {
    %c0_i32 = arith.constant 0 : i32
    %c0_i32_0 = arith.constant 0 : i32
    %c0_i32_1 = arith.constant 0 : i32
    return %c0_i32, %c0_i32_0 : i32, i32
  }
  func.func @transform_5(%arg0: i32) -> (i32, i32) {
    %c0_i32 = arith.constant 0 : i32
    %c0_i32_0 = arith.constant 0 : i32
    %c0_i32_1 = arith.constant 0 : i32
    return %c0_i32, %c0_i32_0 : i32, i32
  }
  func.func @transform_6(%arg0: i32) -> (i32, i32) {
    %c0_i32 = arith.constant 0 : i32
    %c0_i32_0 = arith.constant 0 : i32
    %c0_i32_1 = arith.constant 0 : i32
    return %c0_i32, %c0_i32_0 : i32, i32
  }
  func.func @transform_7(%arg0: i32) -> (i32, i32) {
    %c0_i32 = arith.constant 0 : i32
    %c0_i32_0 = arith.constant 0 : i32
    %c0_i32_1 = arith.constant 0 : i32
    return %c0_i32, %c0_i32_0 : i32, i32
  }
  func.func @transform_8(%arg0: i32) -> (i32, i32) {
    %c0_i32 = arith.constant 0 : i32
    %c0_i32_0 = arith.constant 0 : i32
    %c0_i32_1 = arith.constant 0 : i32
    return %c0_i32, %c0_i32_0 : i32, i32
  }
  func.func @transform_9(%arg0: i32) -> (i32, i32) {
    %c0_i32 = arith.constant 0 : i32
    %c0_i32_0 = arith.constant 0 : i32
    %c0_i32_1 = arith.constant 0 : i32
    return %c0_i32, %c0_i32_0 : i32, i32
  }
  func.func @transform_10(%arg0: i32) -> (i32, i32, i32, i32) {
    %c0_i32 = arith.constant 0 : i32
    %c0_i32_0 = arith.constant 0 : i32
    %c0_i32_1 = arith.constant 0 : i32
    %c0_i32_2 = arith.constant 0 : i32
    return %arg0, %c0_i32, %c0_i32_0, %c0_i32_1 : i32, i32, i32, i32
  }
}

</mosaic_0001>

<bundles_post_ra>
// kernel: bottleneck_forward.1
= control target key start
LH: loop header
LB: loop body
LE: loop exit
PB: predicated region body
PF: predicated region fallthrough
CT: control target
= control target key end

     0   :  { %s4746_s13 = smov 0   ;;  %s6789_s0 = inlined_call_operand.vmem [shape: bf16[2,16,16,16], index: 0, kind: input, shape index: {}]   ;;  %s6790_s1 = inlined_call_operand.vmem [shape: bf16[16,4], index: 1, kind: input, shape index: {}]   ;;  %s6791_s2 = inlined_call_operand.vmem [shape: f32[1,4], index: 2, kind: input, shape index: {}]   ;;  %s6792_s3 = inlined_call_operand.vmem [shape: f32[1,4], index: 3, kind: input, shape index: {}]   ;;  %s6793_s4 = inlined_call_operand.vmem [shape: bf16[36,4], index: 4, kind: input, shape index: {}]   ;;  %s6794_s5 = inlined_call_operand.vmem [shape: f32[1,4], index: 5, kind: input, shape index: {}]   ;;  %s6795_s6 = inlined_call_operand.vmem [shape: f32[1,4], index: 6, kind: input, shape index: {}]   ;;  %s6796_s7 = inlined_call_operand.vmem [shape: bf16[4,16], index: 7, kind: input, shape index: {}]   ;;  %s6797_s8 = inlined_call_operand.vmem [shape: f32[1,16], index: 8, kind: input, shape index: {}]   ;;  %s6798_s9 = inlined_call_operand.vmem [shape: f32[1,16], index: 9, kind: input, shape index: {}]   ;;  %s6799_s10 = inlined_call_operand.vmem [shape: bf16[2,16,16,16], index: 10, kind: output, shape index: {}]  }
   0x1 LB: > { %s4060_s14 = sadd.s32 4294967295, %s4680_s13   ;;  %p4064_p0 = scmp.ge.s32.totalorder %s4680_s13, 1  ;;  %s4680_s13 = sphi %s4746_s13, %s20_s13  }
   0x2   : > { %p312_p1 = scmp.lt.s32.totalorder %s4680_s13, 3 }
   0x4   : > { %p313_p2 = pnand %p4064_p0, %p312_p1 }
   0x5   : > { %p350_p3 = scmp.lt.s32.totalorder (!%p313_p2), %s4060_s14, 1  ;;  %s4683_s21 = smov (!%p313_p2), 8  }
   0x6   : > { %316 = sbr.rel (%p313_p2) target bundleno = 1280 (0x500), region = 60  ;;  %s4684_s22 = smov (!%p313_p2), 4  }
   0x7   : > { %s4685_s27 = smov (!%p313_p2), 24   ;;  %s4686_s28 = smov (!%p313_p2), 12  }
   0x8   : > { %s4687_s29 = smov (!%p313_p2), 20   ;;  %s4688_s30 = smov (!%p313_p2), 32  }
   0x9   : > { %s4689_s11 = smov (!%p313_p2), 16   ;;  %s4690_s12 = smov (!%p313_p2), 28  }
   0xb   : > { %v4559_v0 = vld [vmem:[%s6790_s1] sm:$0xff]   ;;  %s6803_s14 = smov (!%p350_p3, %s4060_s14), 1  ;;  %vm481_vm0 = vcmask 130048   ;;  %vm996_vm1 = vcmask 27648   ;;  %v4682_v11 = vmov 0   ;;  %vm1862_vm2 = vcmask 1046528  }
   0xc   : > { %4402 = vmatprep.subr.bf16.mxu0 %v4559_v0  ;;  %s4299_s17 = sshll.u32 %s6803_s14, 7  ;;  %997 = vst.msk [vmem:[#allocation2] sm:$0xf] %vm996_vm1, %v4682_v11  ;;  %998 = vst.msk [vmem:[#allocation2 + $0x4] sm:$0xf] %vm996_vm1, %v4682_v11  ;;  %vm961_vm4 = vcmask 1040384  }
   0xd   : > { %4403 = vmatpush3.bf16.msra.mxu0 %v4559_v0  ;;  %s4765_s20 = scalar_lea.vmem %s6789_s0, %s4299_s17  ;;  %999 = vst.msk [vmem:[#allocation2 + $0x8] sm:$0xf] %vm996_vm1, %v4682_v11  ;;  %1000 = vst.msk [vmem:[#allocation2 + $0xc] sm:$0xf] %vm996_vm1, %v4682_v11  ;;  %vm1534_vm3 = vsmask.f32 7424 }
   0xe   : > { %v361_v1 = vld [vmem:[%s4765_s20] sm:$0xff]   ;;  %v363_v2 = vld [vmem:[%s4765_s20 + $0x8] sm:$0xff]   ;;  %v365_v3 = vld [vmem:[%s4765_s20 + $0x10] sm:$0xff]   ;;  %1289 = vst.msk [vmem:[#allocation2 + $0x110] sm:$0xf] %vm996_vm1, %v4682_v11  ;;  %vm3070_vm7 = vcmask 1041408  }
   0xf   : > { %4404 = vmatprep.mubr.msk.bf16.mxu0 %vm481_vm0, %v361_v1  ;;  %v367_v4 = vld [vmem:[%s4765_s20 + $0x18] sm:$0xff]   ;;  %v369_v5 = vld [vmem:[%s4765_s20 + $0x20] sm:$0xff]   ;;  %v371_v6 = vld [vmem:[%s4765_s20 + $0x28] sm:$0xff]   ;;  %1290 = vst.msk [vmem:[#allocation2 + $0x114] sm:$0xf] %vm996_vm1, %v4682_v11  ;;  %vm2466_vm8 = vcmask 31744  }
  0x10   : > { %4405 = vmatmul.mubr.msk.bf16.vlgmr.msra.gmra.mxu0 %vm481_vm0, %v363_v2  ;;  %v373_v7 = vld [vmem:[%s4765_s20 + $0x30] sm:$0xff]   ;;  %v375_v8 = vld [vmem:[%s4765_s20 + $0x38] sm:$0xff]   ;;  %v377_v9 = vld [vmem:[%s4765_s20 + $0x40] sm:$0xff]   ;;  %1291 = vst.msk [vmem:[#allocation2 + $0x118] sm:$0xf] %vm996_vm1, %v4682_v11  ;;  %vm2531_vm9 = vcmask 64512  }
  0x11   : > { %4408 = vmatprep.mubr.msk.bf16.mxu0 %vm481_vm0, %v365_v3  ;;  %v379_v10 = vld [vmem:[%s4765_s20 + $0x48] sm:$0xff]   ;;  %1292 = vst.msk [vmem:[#allocation2 + $0x11c] sm:$0xf] %vm996_vm1, %v4682_v11  ;;  %v381_v27 = vld [vmem:[%s4765_s20 + $0x50] sm:$0xff]   ;;  %v383_v28 = vld [vmem:[%s4765_s20 + $0x58] sm:$0xff]   ;;  %vm2596_vm10 = vcmask 97280  }
  0x12   : > { %v385_v30 = vld [vmem:[%s4765_s20 + $0x60] sm:$0xff]   ;;  %v387_v31 = vld [vmem:[%s4765_s20 + $0x68] sm:$0xff]   ;;  %v389_v41 = vld [vmem:[%s4765_s20 + $0x70] sm:$0xff]   ;;  %vm962_vm5 = vsmask.f32 256  ;;  %vm2725_vm11 = vcmask 162816  }
  0x13   : > { %v1294_v12 = vld [vmem:[#allocation2 + $0x4] sm:$0xf]  ;;  %v1358_v13 = vld [vmem:[#allocation2] sm:$0xe]  ;;  %v4823_v32 = vld [vmem:[%s6791_s2] ss:$0 sm:$0xff] }
  0x14   : > { %v1293_v14 = vld [vmem:[#allocation2] sm:$0xf]  ;;  %v4795_v15 = vld [vmem:[#allocation2 + $0x8] sm:$0xff]   ;;  %v4201_v16 = vcombine.low %v1358_v13, %v1294_v12  ;;  %v391_v42 = vld [vmem:[%s4765_s20 + $0x78] sm:$0xff]   ;;  %vm2855_vm12 = vcmask 228352   ;;  %vm2790_vm13 = vcmask 195584  }
  0x15   : > { %v4797_v17 = vcombine.low %v1293_v14, %v1294_v12  ;;  %v1864_v19 = vrot.slane %v4795_v15, 1  ;;  %v1543_v22 = vshll.u32 %v4795_v15, 16  ;;  %v4829_v35 = vld [vmem:[%s6792_s3] ss:$0 sm:$0xff]  ;;  %vm4845_vm6 = vmand %vm961_vm4, %vm962_vm5  ;;  %vm2920_vm14 = vcmask 261120  }
  0x16   : > { %v1863_v18 = vrot.slane %v4201_v16, 1  ;;  %vm3005_vm15 = vcmask 293888  }
  0x17   : > { %v1538_v20 = vshll.u32 %v4797_v17, 16  ;;  %v1536_v21 = vshrl.u32 %v4797_v17, 16  ;;  %v4807_v25 = vrot.slane %v1543_v22, 1 }
  0x18   : > { %4409 = vmatmul.mubr.msk.bf16.gmra.mxu0 %vm481_vm0, %v367_v4  ;;  %v1865_v23 = vsel %vm1862_vm2, %v1863_v18, %v1864_v19 }
  0x19   : > { %4412 = vmatprep.mubr.msk.bf16.mxu0 %vm481_vm0, %v369_v5  ;;  %v1540_v24 = vrot.slane %v1538_v20, 1  ;;  %1928 = vrot.lane.b32.xlu1 %v1865_v23, %s4683_s21 }
  0x1b   : > { %v1541_v26 = vor.u32 %v1540_v24, %v1536_v21 }
  0x1d   : > { %v1546_v29 = vsel %vm1534_vm3, %v1541_v26, %v4807_v25 }
  0x1e   : > { %1795 = vrot.lane.b32.xlu0 %v1546_v29, %s4684_s22 }
  0x20   : > { %4413 = vmatmul.mubr.msk.bf16.gmra.mxu0 %vm481_vm0, %v371_v6 }
  0x21   : > { %4416 = vmatprep.mubr.msk.bf16.mxu0 %vm481_vm0, %v373_v7 }
  0x28   : > { %4417 = vmatmul.mubr.msk.bf16.gmra.mxu0 %vm481_vm0, %v375_v8 }
  0x29   : > { %4420 = vmatprep.mubr.msk.bf16.mxu0 %vm481_vm0, %v377_v9 }
  0x30   : > { %4421 = vmatmul.mubr.msk.bf16.gmra.mxu0 %vm481_vm0, %v379_v10 }
  0x31   : > { %4424 = vmatprep.mubr.msk.bf16.mxu0 %vm481_vm0, %v381_v27 }
  0x38   : > { %4425 = vmatmul.mubr.msk.bf16.gmra.mxu0 %vm481_vm0, %v383_v28 }
  0x39   : > { %4428 = vmatprep.mubr.msk.bf16.mxu0 %vm481_vm0, %v385_v30 }
  0x40   : > { %4429 = vmatmul.mubr.msk.bf16.gmra.mxu0 %vm481_vm0, %v387_v31 }
  0x41   : > { %4432 = vmatprep.mubr.msk.bf16.mxu0 %vm481_vm0, %v389_v41 }
  0x48   : > { %4433 = vmatmul.mubr.msk.bf16.gmra.mxu0 %vm481_vm0, %v391_v42 }
  0xd0   : > { %v4406_v33 = vpop.f32.mrf.mxu0 }
  0xd1   : > { %v700_v34 = vmul.f32 %v4406_v33, %v4823_v32 }
  0xd2   : > { %v564_v36 = vpop.f32.mrf.mxu0 }
  0xd3   : > { %v698_v37 = vmul.f32 %v4823_v32, %v564_v36  ;;  %v739_v39 = vadd.f32 %v4829_v35, %v700_v34 }
  0xd4   : > { %v4407_v38 = vpop.f32.mrf.mxu0 }
  0xd5   : > { %v701_v40 = vmul.f32 %v4407_v38, %v4823_v32  ;;  %v737_v44 = vadd.f32 %v4829_v35, %v698_v37  ;;  %v771_v48 = vmax.f32 %v739_v39, 0.0 }
  0xd6   : > { %v567_v43 = vpop.f32.mrf.mxu0 }
  0xd7   : > { %v740_v45 = vadd.f32 %v4829_v35, %v701_v40  ;;  %v699_v46 = vmul.f32 %v4823_v32, %v567_v43  ;;  %v769_v53 = vmax.f32 %v737_v44, 0.0 }
  0xd8   : > { %v4410_v47 = vpop.f32.mrf.mxu0 }
  0xd9   : > { %v772_v49 = vmax.f32 %v740_v45, 0.0  ;;  %v738_v50 = vadd.f32 %v4829_v35, %v699_v46  ;;  %v704_v51 = vmul.f32 %v4410_v47, %v4823_v32 }
  0xda   : > { %v580_v52 = vpop.f32.mrf.mxu0 }
  0xdb   : > { %v802_v54 = vpack.c.bf16 %v772_v49, %v771_v48  ;;  %v770_v55 = vmax.f32 %v738_v50, 0.0  ;;  %v702_v56 = vmul.f32 %v4823_v32, %v580_v52  ;;  %v743_v57 = vadd.f32 %v4829_v35, %v704_v51 }
  0xdc   : > { %v4411_v58 = vpop.f32.mrf.mxu0 }
  0xdd   : > { %v825_v59 = vshrl.u32 %v802_v54, 16  ;;  %v801_v60 = vpack.c.bf16 %v770_v55, %v769_v53  ;;  %v741_v62 = vadd.f32 %v4829_v35, %v702_v56  ;;  %v705_v63 = vmul.f32 %v4411_v58, %v4823_v32 }
  0xde   : > { %v583_v0 = vpop.f32.mrf.mxu0  ;;  %v828_v2 = vshll.u32 %v802_v54, 16  ;;  %v775_v6 = vmax.f32 %v743_v57, 0.0 }
  0xdf   : > { %v827_v1 = vrot.slane %v825_v59, 7  ;;  %v818_v3 = vshrl.u32 %v801_v60, 16  ;;  %v703_v4 = vmul.f32 %v4823_v32, %v583_v0  ;;  %v821_v5 = vshll.u32 %v801_v60, 16 }
  0xe0   : > { %v773_v7 = vmax.f32 %v741_v62, 0.0  ;;  %v744_v8 = vadd.f32 %v4829_v35, %v705_v63  ;;  %v4414_v9 = vpop.f32.mrf.mxu0 }
  0xe1   : > { %v830_v10 = vor.u32 %v828_v2, %v827_v1  ;;  %v981_v11 = vsel %vm4845_vm6, %v827_v1, 0  ;;  %v820_v12 = vrot.slane %v818_v3, 7  ;;  %v742_v13 = vadd.f32 %v4829_v35, %v703_v4 }
  0xe2   : > { %v4110_v14 = vcombine.low %v981_v11, %v981_v11  ;;  %v4111_v16 = vcombine.high %v981_v11, %v981_v11  ;;  %v776_v18 = vmax.f32 %v744_v8, 0.0  ;;  %v708_v20 = vmul.f32 %v4414_v9, %v4823_v32  ;;  %v596_v21 = vpop.f32.mrf.mxu0 }
  0xe3   : > { %v965_v22 = vsel %vm4845_vm6, 0, %v830_v10  ;;  %v823_v23 = vor.u32 %v821_v5, %v820_v12  ;;  %v980_v24 = vsel %vm4845_vm6, %v820_v12, 0  ;;  %v774_v26 = vmax.f32 %v742_v13, 0.0 }
  0xe4   : > { %v4108_v27 = vcombine.low %v965_v22, %v965_v22  ;;  %v4109_v28 = vcombine.high %v965_v22, %v965_v22  ;;  %1231 = vst.msk [vmem:[#allocation2 + $0x28] sm:$0xf] %vm996_vm1, %v4110_v14  ;;  %1232 = vst.msk [vmem:[#allocation2 + $0x2c] sm:$0xf] %vm996_vm1, %v4111_v16  ;;  %v4106_v29 = vcombine.low %v980_v24, %v980_v24  ;;  %v4415_v31 = vpop.f32.mrf.mxu0 }
  0xe5   : > { %v4107_v30 = vcombine.high %v980_v24, %v980_v24  ;;  %v964_v33 = vsel %vm4845_vm6, 0, %v823_v23  ;;  %v804_v34 = vpack.c.bf16 %v776_v18, %v775_v6  ;;  %v803_v36 = vpack.c.bf16 %v774_v26, %v773_v7 }
  0xe6   : > { %v747_v37 = vadd.f32 %v4829_v35, %v708_v20  ;;  %1229 = vst.msk [vmem:[#allocation2 + $0x20] sm:$0xf] %vm996_vm1, %v4108_v27  ;;  %1230 = vst.msk [vmem:[#allocation2 + $0x24] sm:$0xf] %vm996_vm1, %v4109_v28  ;;  %v4104_v38 = vcombine.low %v964_v33, %v964_v33  ;;  %v4105_v39 = vcombine.high %v964_v33, %v964_v33  ;;  %v599_v42 = vpop.f32.mrf.mxu0 }
  0xe7   : > { %1227 = vst.msk [vmem:[#allocation2 + $0x18] sm:$0xf] %vm996_vm1, %v4106_v29  ;;  %1228 = vst.msk [vmem:[#allocation2 + $0x1c] sm:$0xf] %vm996_vm1, %v4107_v30  ;;  %v706_v40 = vmul.f32 %v4823_v32, %v596_v21  ;;  %v709_v41 = vmul.f32 %v4415_v31, %v4823_v32  ;;  %v839_v43 = vshrl.u32 %v804_v34, 16  ;;  %v842_v44 = vshll.u32 %v804_v34, 16 }
  0xe8   : > { %v832_v45 = vshrl.u32 %v803_v36, 16  ;;  %v835_v46 = vshll.u32 %v803_v36, 16  ;;  %1225 = vst.msk [vmem:[#allocation2 + $0x10] sm:$0xf] %vm996_vm1, %v4104_v38  ;;  %1226 = vst.msk [vmem:[#allocation2 + $0x14] sm:$0xf] %vm996_vm1, %v4105_v39  ;;  %v707_v49 = vmul.f32 %v4823_v32, %v599_v42  ;;  %v4418_v2 = vpop.f32.mrf.mxu0 }
  0xe9   : > { %v745_v47 = vadd.f32 %v4829_v35, %v706_v40  ;;  %v748_v48 = vadd.f32 %v4829_v35, %v709_v41  ;;  %v841_v50 = vrot.slane %v839_v43, 7  ;;  %v779_v52 = vmax.f32 %v747_v37, 0.0 }
  0xea   : > { %v834_v51 = vrot.slane %v832_v45, 7  ;;  %v746_v55 = vadd.f32 %v4829_v35, %v707_v49  ;;  %v612_v21 = vpop.f32.mrf.mxu0  ;;  %v712_v43 = vmul.f32 %v4418_v2, %v4823_v32 }
  0xeb   : > { %v777_v53 = vmax.f32 %v745_v47, 0.0  ;;  %v780_v54 = vmax.f32 %v748_v48, 0.0  ;;  %v844_v56 = vor.u32 %v842_v44, %v841_v50  ;;  %v983_v57 = vsel %vm4845_vm6, %v841_v50, 0  ;;  %v4882_v1 = vld [vmem:[#allocation2 + $0x28] sm:$0xff]  }
  0xec   : > { %v837_v58 = vor.u32 %v835_v46, %v834_v51  ;;  %v982_v59 = vsel %vm4845_vm6, %v834_v51, 0  ;;  %v4118_v60 = vcombine.low %v983_v57, %v983_v57  ;;  %v4119_v62 = vcombine.high %v983_v57, %v983_v57  ;;  %2241 = vrot.lane.b32.xlu1 %v4882_v1, %s4685_s27  ;;  %v4419_v39 = vpop.f32.mrf.mxu0 }
  0xed   : > { %v4114_v63 = vcombine.low %v982_v59, %v982_v59  ;;  %v4115_v0 = vcombine.high %v982_v59, %v982_v59  ;;  %v967_v3 = vsel %vm4845_vm6, 0, %v844_v56  ;;  %v806_v5 = vpack.c.bf16 %v780_v54, %v779_v52  ;;  %v1301_v7 = vld [vmem:[#allocation2 + $0x20] sm:$0xf]  ;;  %v1302_v12 = vld [vmem:[#allocation2 + $0x24] sm:$0xf] }
  0xee   : > { %v966_v4 = vsel %vm4845_vm6, 0, %v837_v58  ;;  %v778_v6 = vmax.f32 %v746_v55, 0.0  ;;  %v4116_v8 = vcombine.low %v967_v3, %v967_v3  ;;  %v4117_v9 = vcombine.high %v967_v3, %v967_v3  ;;  %1239 = vst.msk [vmem:[#allocation2 + $0x48] sm:$0xf] %vm996_vm1, %v4118_v60  ;;  %1240 = vst.msk [vmem:[#allocation2 + $0x4c] sm:$0xf] %vm996_vm1, %v4119_v62 }
  0xef   : > { %v4112_v10 = vcombine.low %v966_v4, %v966_v4  ;;  %v4113_v11 = vcombine.high %v966_v4, %v966_v4  ;;  %1235 = vst.msk [vmem:[#allocation2 + $0x38] sm:$0xf] %vm996_vm1, %v4114_v63  ;;  %1236 = vst.msk [vmem:[#allocation2 + $0x3c] sm:$0xf] %vm996_vm1, %v4115_v0  ;;  %v853_v13 = vshrl.u32 %v806_v5, 16  ;;  %v856_v14 = vshll.u32 %v806_v5, 16 }
  0xf0   : > { %v805_v16 = vpack.c.bf16 %v778_v6, %v777_v53  ;;  %v4894_v18 = vcombine.low %v1301_v7, %v1302_v12  ;;  %v4896_v20 = vld [vmem:[#allocation2 + $0x18] sm:$0xff]   ;;  %1237 = vst.msk [vmem:[#allocation2 + $0x40] sm:$0xf] %vm996_vm1, %v4116_v8  ;;  %1238 = vst.msk [vmem:[#allocation2 + $0x44] sm:$0xf] %vm996_vm1, %v4117_v9  ;;  %2008 = vrot.lane.b32.xlu1 %v4882_v1, %s4686_s28  ;;  %v615_v53 = vpop.f32.mrf.mxu0  ;;  %v751_v55 = vadd.f32 %v4829_v35, %v712_v43 }
  0xf1   : > { %1233 = vst.msk [vmem:[#allocation2 + $0x30] sm:$0xf] %vm996_vm1, %v4112_v10  ;;  %1234 = vst.msk [vmem:[#allocation2 + $0x34] sm:$0xf] %vm996_vm1, %v4113_v11  ;;  %v855_v22 = vrot.slane %v853_v13, 7  ;;  %v4909_v30 = vrot.slane %v4896_v20, 1  ;;  %v710_v57 = vmul.f32 %v4823_v32, %v612_v21  ;;  %v713_v59 = vmul.f32 %v4419_v39, %v4823_v32 }
  0xf2   : > { %v846_v23 = vshrl.u32 %v805_v16, 16  ;;  %v849_v24 = vshll.u32 %v805_v16, 16  ;;  %2239 = vrot.lane.b32.xlu0 %v4894_v18, %s4685_s27  ;;  %v1370_v26 = vld [vmem:[#allocation2 + $0x20] sm:$0xe]  ;;  %v1297_v34 = vld [vmem:[#allocation2 + $0x10] sm:$0xf]  ;;  %v711_v60 = vmul.f32 %v4823_v32, %v615_v53  ;;  %v4422_v4 = vpop.f32.mrf.mxu0 }
  0xf3   : > { %v858_v27 = vor.u32 %v856_v14, %v855_v22  ;;  %v985_v28 = vsel %vm4845_vm6, %v855_v22, 0  ;;  %v1298_v36 = vld [vmem:[#allocation2 + $0x14] sm:$0xf]  ;;  %v1870_v37 = vrot.slane %v4894_v18, 1  ;;  %v4209_v38 = vcombine.low %v1370_v26, %v1302_v12  ;;  %v1364_v58 = vld [vmem:[#allocation2 + $0x10] sm:$0xe] }
  0xf4   : > { %v848_v29 = vrot.slane %v846_v23, 7  ;;  %v4126_v31 = vcombine.low %v985_v28, %v985_v28  ;;  %v4127_v33 = vcombine.high %v985_v28, %v985_v28  ;;  %2004 = vrot.lane.b32.xlu1 %v4896_v20, %s4686_s28  ;;  %v4925_v49 = vcombine.low %v1297_v34, %v1298_v36  ;;  %v628_v14 = vpop.f32.mrf.mxu0 }
  0xf5   : > { %v969_v40 = vsel %vm4845_vm6, 0, %v858_v27  ;;  %v2394_v52 = vrot.slane %v4209_v38, 1  ;;  %v1871_v54 = vsel %vm1862_vm2, %v4909_v30, %v1870_v37  ;;  %v4940_v56 = vrot.slane %v4882_v1, 1  ;;  %v4965_v26 = vld [vmem:[#allocation2 + $0x48] sm:$0xff]  }
  0xf6   : > { %v851_v41 = vor.u32 %v849_v24, %v848_v29  ;;  %v984_v42 = vsel %vm4845_vm6, %v848_v29, 0  ;;  %2006 = vrot.lane.b32.xlu0 %v4894_v18, %s4686_s28  ;;  %v4124_v44 = vcombine.low %v969_v40, %v969_v40  ;;  %v4125_v45 = vcombine.high %v969_v40, %v969_v40  ;;  %1247 = vst.msk [vmem:[#allocation2 + $0x68] sm:$0xf] %vm996_vm1, %v4126_v31  ;;  %v4423_v34 = vpop.f32.mrf.mxu0 }
  0xf7   : > { %1248 = vst.msk [vmem:[#allocation2 + $0x6c] sm:$0xf] %vm996_vm1, %v4127_v33  ;;  %v4122_v46 = vcombine.low %v984_v42, %v984_v42  ;;  %v4123_v47 = vcombine.high %v984_v42, %v984_v42  ;;  %v2395_v62 = vsel %vm1862_vm2, %v2394_v52, %v4940_v56  ;;  %v749_v63 = vadd.f32 %v4829_v35, %v710_v57 }
  0xf8   : > { %v968_v48 = vsel %vm4845_vm6, 0, %v851_v41  ;;  %1245 = vst.msk [vmem:[#allocation2 + $0x60] sm:$0xf] %vm996_vm1, %v4124_v44  ;;  %1246 = vst.msk [vmem:[#allocation2 + $0x64] sm:$0xf] %vm996_vm1, %v4125_v45  ;;  %2167 = vrot.lane.b32.xlu1 %v1871_v54, %s4687_s29  ;;  %v1866_v0 = vrot.slane %v4925_v49, 1  ;;  %v752_v3 = vadd.f32 %v4829_v35, %v713_v59  ;;  %v4205_v5 = vcombine.low %v1364_v58, %v1298_v36 }
  0xf9   : > { %v4120_v50 = vcombine.low %v968_v48, %v968_v48  ;;  %v4121_v51 = vcombine.high %v968_v48, %v968_v48  ;;  %1243 = vst.msk [vmem:[#allocation2 + $0x58] sm:$0xf] %vm996_vm1, %v4122_v46  ;;  %1244 = vst.msk [vmem:[#allocation2 + $0x5c] sm:$0xf] %vm996_vm1, %v4123_v47  ;;  %v783_v2 = vmax.f32 %v751_v55, 0.0  ;;  %v1559_v6 = vshll.u32 %v4896_v20, 16 }
  0xfa   : > { %2002 = vrot.lane.b32.xlu0 %v4925_v49, %s4686_s28  ;;  %v781_v7 = vmax.f32 %v749_v63, 0.0  ;;  %v750_v8 = vadd.f32 %v4829_v35, %v711_v60  ;;  %v784_v9 = vmax.f32 %v752_v3, 0.0  ;;  %v1873_v10 = vsel %vm1862_vm2, %v1870_v37, %v4940_v56 }
  0xfb   : > { %1241 = vst.msk [vmem:[#allocation2 + $0x50] sm:$0xf] %vm996_vm1, %v4120_v50  ;;  %1242 = vst.msk [vmem:[#allocation2 + $0x54] sm:$0xf] %vm996_vm1, %v4121_v51  ;;  %v1867_v12 = vsel %vm1862_vm2, %v1864_v19, %v1866_v0  ;;  %v2157_v16 = vrot.slane %v4205_v5, 1  ;;  %v4963_v21 = vrot.slane %v1559_v6, 1  ;;  %v716_v41 = vmul.f32 %v4422_v4, %v4823_v32  ;;  %v631_v51 = vpop.f32.mrf.mxu0 }
  0xfc   : > { %1934 = vrot.lane.b32.xlu1 %v1871_v54, %s4683_s21  ;;  %v782_v11 = vmax.f32 %v750_v8, 0.0  ;;  %v808_v13 = vpack.c.bf16 %v784_v9, %v783_v2  ;;  %v1563_v27 = vshrl.u32 %v4896_v20, 16  ;;  %v1567_v19 = vshll.u32 %v4894_v18, 16 }
  0xfd   : > { %v1547_v31 = vshrl.u32 %v4795_v15, 16  ;;  %v2158_v36 = vsel %vm1862_vm2, %v2157_v16, %v4909_v30  ;;  %v1551_v20 = vshll.u32 %v4925_v49, 16  ;;  %v714_v15 = vmul.f32 %v4823_v32, %v628_v14 }
  0xfe   : > { %2402 = vrot.lane.b32.xlu0 %v2395_v62, %s4688_s30  ;;  %v807_v22 = vpack.c.bf16 %v782_v11, %v781_v7  ;;  %v867_v23 = vshrl.u32 %v808_v13, 16  ;;  %v870_v24 = vshll.u32 %v808_v13, 16  ;;  %v1565_v37 = vor.u32 %v1563_v27, %v4963_v21 }
  0xff   : > { %v1569_v46 = vrot.slane %v1567_v19, 1  ;;  %v1549_v52 = vor.u32 %v1547_v31, %v4807_v25  ;;  %v755_v59 = vadd.f32 %v4829_v35, %v716_v41  ;;  %v753_v60 = vadd.f32 %v4829_v35, %v714_v15  ;;  %v5023_v19 = vld [vmem:[#allocation2 + $0x38] sm:$0xff]  }
 0x100   : > { %1930 = vrot.lane.b32.xlu1 %v1867_v12, %s4683_s21  ;;  %v860_v28 = vshrl.u32 %v807_v22, 16  ;;  %v863_v29 = vshll.u32 %v807_v22, 16  ;;  %v869_v33 = vrot.slane %v867_v23, 7  ;;  %v1869_v25 = vsel %vm1862_vm2, %v1866_v0, %v4909_v30 }
 0x101   : > { %v1553_v62 = vrot.slane %v1551_v20, 1  ;;  %v717_v63 = vmul.f32 %v4423_v34, %v4823_v32  ;;  %v715_v2 = vmul.f32 %v4823_v32, %v631_v51  ;;  %v1570_v3 = vsel %vm1534_vm3, %v1565_v37, %v1569_v46 }
 0x102   : > { %2169 = vrot.lane.b32.xlu0 %v1873_v10, %s4687_s29  ;;  %v862_v38 = vrot.slane %v860_v28, 7  ;;  %v872_v39 = vor.u32 %v870_v24, %v869_v33  ;;  %v987_v40 = vsel %vm4845_vm6, %v869_v33, 0  ;;  %v1571_v4 = vshrl.u32 %v4894_v18, 16 }
 0x103   : > { %v4134_v42 = vcombine.low %v987_v40, %v987_v40  ;;  %v4135_v43 = vcombine.high %v987_v40, %v987_v40  ;;  %v1575_v5 = vshll.u32 %v4882_v1, 16  ;;  %v787_v30 = vmax.f32 %v755_v59, 0.0  ;;  %v4426_v59 = vpop.f32.mrf.mxu0 }
 0x104   : > { %2249 = vrot.lane.b32.xlu1 %v4965_v26, %s4685_s27  ;;  %v865_v44 = vor.u32 %v863_v29, %v862_v38  ;;  %v986_v45 = vsel %vm4845_vm6, %v862_v38, 0  ;;  %v971_v47 = vsel %vm4845_vm6, 0, %v872_v39  ;;  %v785_v0 = vmax.f32 %v753_v60, 0.0 }
 0x105   : > { %v4130_v48 = vcombine.low %v986_v45, %v986_v45  ;;  %v4131_v50 = vcombine.high %v986_v45, %v986_v45  ;;  %v4132_v53 = vcombine.low %v971_v47, %v971_v47  ;;  %v4133_v54 = vcombine.high %v971_v47, %v971_v47  ;;  %1255 = vst.msk [vmem:[#allocation2 + $0x88] sm:$0xf] %vm996_vm1, %v4134_v42  ;;  %v5037_v42 = vld [vmem:[#allocation2 + $0x40] sm:$0xff]  }
 0x106   : > { %1936 = vrot.lane.b32.xlu0 %v1873_v10, %s4683_s21  ;;  %1256 = vst.msk [vmem:[#allocation2 + $0x8c] sm:$0xf] %vm996_vm1, %v4135_v43  ;;  %v970_v55 = vsel %vm4845_vm6, 0, %v865_v44  ;;  %v756_v6 = vadd.f32 %v4829_v35, %v717_v63  ;;  %v754_v7 = vadd.f32 %v4829_v35, %v715_v2  ;;  %v1573_v8 = vor.u32 %v1571_v4, %v1569_v46  ;;  %v644_v63 = vpop.f32.mrf.mxu0 }
 0x107   : > { %v4128_v57 = vcombine.low %v970_v55, %v970_v55  ;;  %v4129_v58 = vcombine.high %v970_v55, %v970_v55  ;;  %1251 = vst.msk [vmem:[#allocation2 + $0x78] sm:$0xf] %vm996_vm1, %v4130_v48  ;;  %1252 = vst.msk [vmem:[#allocation2 + $0x7c] sm:$0xf] %vm996_vm1, %v4131_v50  ;;  %v1554_v9 = vsel %vm1534_vm3, %v1549_v52, %v1553_v62  ;;  %v5016_v12 = vrot.slane %v1575_v5, 1 }
 0x108   : > { %2016 = vrot.lane.b32.xlu1 %v4965_v26, %s4686_s28  ;;  %1253 = vst.msk [vmem:[#allocation2 + $0x80] sm:$0xf] %vm996_vm1, %v4132_v53  ;;  %1254 = vst.msk [vmem:[#allocation2 + $0x84] sm:$0xf] %vm996_vm1, %v4133_v54  ;;  %v788_v10 = vmax.f32 %v756_v6, 0.0  ;;  %v786_v11 = vmax.f32 %v754_v7, 0.0  ;;  %v720_v60 = vmul.f32 %v4426_v59, %v4823_v32 }
 0x109   : > { %1249 = vst.msk [vmem:[#allocation2 + $0x70] sm:$0xf] %vm996_vm1, %v4128_v57  ;;  %1250 = vst.msk [vmem:[#allocation2 + $0x74] sm:$0xf] %vm996_vm1, %v4129_v58  ;;  %v1578_v16 = vsel %vm1534_vm3, %v1573_v8, %v5016_v12  ;;  %v1555_v40 = vshrl.u32 %v4925_v49, 16  ;;  %v1876_v50 = vrot.slane %v5023_v19, 1 }
 0x10a   : > { %2165 = vrot.lane.b32.xlu0 %v2158_v36, %s4687_s29  ;;  %v810_v13 = vpack.c.bf16 %v788_v10, %v787_v30  ;;  %v809_v14 = vpack.c.bf16 %v786_v11, %v785_v0  ;;  %v1878_v51 = vrot.slane %v5037_v42, 1  ;;  %v5062_v53 = vld [vmem:[#allocation2 + $0x30] sm:$0xff]   ;;  %v4598_v57 = vld [vmem:[%s6793_s4 + $0x8] sm:$0xff]   ;;  %v759_v2 = vadd.f32 %v4829_v35, %v720_v60 }
 0x10b   : > { %v1557_v47 = vor.u32 %v1555_v40, %v1553_v62  ;;  %v1874_v54 = vrot.slane %v5062_v53, 1  ;;  %v1880_v62 = vrot.slane %v4965_v26, 1  ;;  %v5098_v0 = vld [vmem:[#allocation2 + $0x68] sm:$0xff]   ;;  %v1583_v7 = vshll.u32 %v5062_v53, 16 }
 0x10c   : > { %2092 = vrot.lane.b32.xlu1 %v1570_v3, %s4689_s11  ;;  %v881_v22 = vshrl.u32 %v810_v13, 16  ;;  %v884_v23 = vshll.u32 %v810_v13, 16  ;;  %v874_v24 = vshrl.u32 %v809_v14, 16  ;;  %v877_v27 = vshll.u32 %v809_v14, 16 }
 0x10d   : > { %v1562_v48 = vsel %vm1534_vm3, %v1557_v47, %v4963_v21  ;;  %v1879_v52 = vsel %vm1862_vm2, %v1876_v50, %v1878_v51  ;;  %v4596_v21 = vld [vmem:[%s6793_s4 + $0x10] ss:$0 sps:$4 sm:$0x33]   ;;  %v1875_v58 = vsel %vm1862_vm2, %v4940_v56, %v1874_v54  ;;  %v718_v56 = vmul.f32 %v4823_v32, %v644_v63 }
 0x10e   : > { %1932 = vrot.lane.b32.xlu0 %v1869_v25, %s4683_s21  ;;  %v883_v28 = vrot.slane %v881_v22, 7  ;;  %v876_v29 = vrot.slane %v874_v24, 7  ;;  %4540 = vmatprep.subr.msk.bf16.mxu1 %vm3070_vm7, %v4596_v21  ;;  %v3072_v55 = vsel %vm3070_vm7, %v4596_v21, 0  ;;  %v4599_v25 = vld [vmem:[%s6793_s4] sm:$0xff]   ;;  %v1881_v30 = vsel %vm1862_vm2, %v1878_v51, %v1880_v62 }
 0x10f   : > { %4437 = vmatpush3.bf16.msra.mxu1 %v3072_v55  ;;  %v757_v4 = vadd.f32 %v4829_v35, %v718_v56  ;;  %v791_v8 = vmax.f32 %v759_v2, 0.0  ;;  %v1579_v22 = vshrl.u32 %v4882_v1, 16  ;;  %v5166_v56 = vld [vmem:[#allocation2 + $0x58] sm:$0xff]  }
 0x110   : > { %1801 = vrot.lane.b32.xlu1 %v1570_v3, %s4684_s22  ;;  %v886_v31 = vor.u32 %v884_v23, %v883_v28  ;;  %v989_v33 = vsel %vm4845_vm6, %v883_v28, 0  ;;  %v879_v34 = vor.u32 %v877_v27, %v876_v29  ;;  %v988_v36 = vsel %vm4845_vm6, %v876_v29, 0  ;;  %4438 = vmatprep.subr.bf16.mxu1 %v4598_v57  ;;  %v4427_v3 = vpop.f32.mrf.mxu0 }
 0x111   : > { %v4142_v37 = vcombine.low %v989_v33, %v989_v33  ;;  %v4143_v20 = vcombine.high %v989_v33, %v989_v33  ;;  %v4138_v38 = vcombine.low %v988_v36, %v988_v36  ;;  %v4139_v39 = vcombine.high %v988_v36, %v988_v36 }
 0x112   : > { %1797 = vrot.lane.b32.xlu0 %v1554_v9, %s4684_s22  ;;  %v973_v41 = vsel %vm4845_vm6, 0, %v886_v31  ;;  %v972_v15 = vsel %vm4845_vm6, 0, %v879_v34  ;;  %v721_v5 = vmul.f32 %v4427_v3, %v4823_v32  ;;  %v647_v6 = vpop.f32.mrf.mxu0  ;;  %v789_v11 = vmax.f32 %v757_v4, 0.0  ;;  %v5173_v4 = vpop.permute.xlu1 %1928 }
 0x113   : > { %v4140_v43 = vcombine.low %v973_v41, %v973_v41  ;;  %v4141_v44 = vcombine.high %v973_v41, %v973_v41  ;;  %1263 = vst.msk [vmem:[#allocation2 + $0xa8] sm:$0xf] %vm996_vm1, %v4142_v37  ;;  %1264 = vst.msk [vmem:[#allocation2 + $0xac] sm:$0xf] %vm996_vm1, %v4143_v20  ;;  %v4136_v45 = vcombine.low %v972_v15, %v972_v15  ;;  %4439 = vmatpush3.bf16.msra.mxu1 %v4598_v57 }
 0x114   : > { %1803 = vrot.lane.b32.xlu1 %v1578_v16, %s4684_s22  ;;  %v4137_v46 = vcombine.high %v972_v15, %v972_v15  ;;  %1259 = vst.msk [vmem:[#allocation2 + $0x98] sm:$0xf] %vm996_vm1, %v4138_v38  ;;  %1260 = vst.msk [vmem:[#allocation2 + $0x9c] sm:$0xf] %vm996_vm1, %v4139_v39  ;;  %4440 = vmatprep.subr.bf16.mxu1 %v4599_v25  ;;  %v760_v9 = vadd.f32 %v4829_v35, %v721_v5  ;;  %v5110_v23 = vrot.slane %v1583_v7, 1  ;;  %v4430_v5 = vpop.f32.mrf.mxu0 }
 0x115   : > { %1261 = vst.msk [vmem:[#allocation2 + $0xa0] sm:$0xf] %vm996_vm1, %v4140_v43  ;;  %1262 = vst.msk [vmem:[#allocation2 + $0xa4] sm:$0xf] %vm996_vm1, %v4141_v44  ;;  %v719_v10 = vmul.f32 %v4823_v32, %v647_v6  ;;  %v1581_v28 = vor.u32 %v1579_v22, %v5016_v12  ;;  %v1595_v36 = vshrl.u32 %v5023_v19, 16  ;;  %v1599_v39 = vshll.u32 %v5037_v42, 16 }
 0x116   : > { %2327 = vrot.lane.b32.xlu0 %v1578_v16, %s4690_s12  ;;  %1257 = vst.msk [vmem:[#allocation2 + $0x90] sm:$0xf] %vm996_vm1, %v4136_v45  ;;  %1258 = vst.msk [vmem:[#allocation2 + $0x94] sm:$0xf] %vm996_vm1, %v4137_v46  ;;  %v792_v13 = vmax.f32 %v760_v9, 0.0  ;;  %v1587_v3 = vshrl.u32 %v5062_v53, 16  ;;  %v660_v7 = vpop.f32.mrf.mxu0 }
 0x117   : > { %4441 = vmatpush3.bf16.msra.mxu1 %v4599_v25  ;;  %v758_v14 = vadd.f32 %v4829_v35, %v719_v10  ;;  %v1586_v1 = vsel %vm1534_vm3, %v1581_v28, %v5110_v23  ;;  %v1601_v55 = vrot.slane %v1599_v39, 1  ;;  %v722_v9 = vmul.f32 %v4823_v32, %v660_v7 }
 0x118   : > { %2245 = vrot.lane.b32.xlu1 %v5023_v19, %s4685_s27  ;;  %v812_v24 = vpack.c.bf16 %v792_v13, %v791_v8  ;;  %v1589_v6 = vor.u32 %v1587_v3, %v5110_v23  ;;  %v5179_v8 = vpop.permute.xlu0 %1795  ;;  %v4431_v10 = vpop.f32.mrf.mxu0  ;;  %v1884_v22 = vrot.slane %v5166_v56, 1 }
 0x119   : > { %v790_v27 = vmax.f32 %v758_v14, 0.0  ;;  %v725_v13 = vmul.f32 %v4431_v10, %v4823_v32  ;;  %v5263_v10 = vld [vmem:[#allocation2 + $0x88] sm:$0xff]  }
 0x11a   : > { %2094 = vrot.lane.b32.xlu0 %v1578_v16, %s4689_s11  ;;  %v1591_v16 = vshll.u32 %v5023_v19, 16  ;;  %v895_v29 = vshrl.u32 %v812_v24, 16  ;;  %v898_v31 = vshll.u32 %v812_v24, 16  ;;  %v663_v23 = vpop.f32.mrf.mxu0 }
 0x11b   : > { %v811_v33 = vpack.c.bf16 %v790_v27, %v789_v11  ;;  %v761_v11 = vadd.f32 %v4829_v35, %v722_v9  ;;  %v764_v28 = vadd.f32 %v4829_v35, %v725_v13 }
 0x11c   : > { %2012 = vrot.lane.b32.xlu1 %v5023_v19, %s4686_s28  ;;  %v5115_v34 = vrot.slane %v1591_v16, 1  ;;  %v897_v37 = vrot.slane %v895_v29, 7  ;;  %v1603_v19 = vshrl.u32 %v5037_v42, 16  ;;  %v723_v29 = vmul.f32 %v4823_v32, %v663_v23 }
 0x11d   : > { %v888_v20 = vshrl.u32 %v811_v33, 16  ;;  %v891_v38 = vshll.u32 %v811_v33, 16  ;;  %v793_v33 = vmax.f32 %v761_v11, 0.0  ;;  %v1611_v11 = vshrl.u32 %v4965_v26, 16 }
 0x11e   : > { %2247 = vrot.lane.b32.xlu0 %v5037_v42, %s4685_s27  ;;  %v900_v12 = vor.u32 %v898_v31, %v897_v37  ;;  %v991_v40 = vsel %vm4845_vm6, %v897_v37, 0  ;;  %v1597_v44 = vor.u32 %v1595_v36, %v5115_v34  ;;  %v1594_v16 = vsel %vm1534_vm3, %v1589_v6, %v5115_v34 }
 0x11f   : > { %v890_v41 = vrot.slane %v888_v20, 7  ;;  %v4150_v15 = vcombine.low %v991_v40, %v991_v40  ;;  %v4151_v43 = vcombine.high %v991_v40, %v991_v40  ;;  %v796_v36 = vmax.f32 %v764_v28, 0.0  ;;  %v5208_v20 = vld [vmem:[#allocation2 + $0x50] sm:$0xff]  }
 0x120   : > { %1799 = vrot.lane.b32.xlu1 %v1562_v48, %s4684_s22  ;;  %v975_v45 = vsel %vm4845_vm6, 0, %v900_v12  ;;  %v1602_v25 = vsel %vm1534_vm3, %v1597_v44, %v1601_v55  ;;  %v762_v34 = vadd.f32 %v4829_v35, %v723_v29  ;;  %v1615_v13 = vshll.u32 %v5208_v20, 16 }
 0x121   : > { %v893_v46 = vor.u32 %v891_v38, %v890_v41  ;;  %v990_v47 = vsel %vm4845_vm6, %v890_v41, 0  ;;  %v4149_v51 = vcombine.high %v975_v45, %v975_v45  ;;  %1271 = vst.msk [vmem:[#allocation2 + $0xc8] sm:$0xf] %vm996_vm1, %v4150_v15  ;;  %1272 = vst.msk [vmem:[#allocation2 + $0xcc] sm:$0xf] %vm996_vm1, %v4151_v43  ;;  %v1882_v15 = vrot.slane %v5208_v20, 1 }
 0x122   : > { %2014 = vrot.lane.b32.xlu0 %v5037_v42, %s4686_s28  ;;  %v4147_v21 = vcombine.high %v990_v47, %v990_v47  ;;  %v5164_v42 = vld [vmem:[#allocation2 + $0x60] sm:$0xff]   ;;  %v794_v38 = vmax.f32 %v762_v34, 0.0  ;;  %v1623_v28 = vshll.u32 %v5166_v56, 16  ;;  %v1627_v34 = vshrl.u32 %v5166_v56, 16 }
 0x123   : > { %v974_v57 = vsel %vm4845_vm6, 0, %v893_v46  ;;  %1270 = vst.msk [vmem:[#allocation2 + $0xc4] sm:$0xf] %vm996_vm1, %v4149_v51  ;;  %v1886_v24 = vrot.slane %v5164_v42, 1 }
 0x124   : > { %2175 = vrot.lane.b32.xlu1 %v1879_v52, %s4687_s29  ;;  %v4144_v59 = vcombine.low %v974_v57, %v974_v57  ;;  %v4145_v60 = vcombine.high %v974_v57, %v974_v57  ;;  %1268 = vst.msk [vmem:[#allocation2 + $0xbc] sm:$0xf] %vm996_vm1, %v4147_v21  ;;  %v813_v40 = vpack.c.bf16 %v794_v38, %v793_v33 }
 0x125   : > { %v1887_v37 = vsel %vm1862_vm2, %v1884_v22, %v1886_v24  ;;  %v1883_v57 = vsel %vm1862_vm2, %v1880_v62, %v1882_v15 }
 0x126   : > { %2090 = vrot.lane.b32.xlu0 %v1562_v48, %s4689_s11  ;;  %v4148_v48 = vcombine.low %v975_v45, %v975_v45  ;;  %1265 = vst.msk [vmem:[#allocation2 + $0xb0] sm:$0xf] %vm996_vm1, %v4144_v59  ;;  %1266 = vst.msk [vmem:[#allocation2 + $0xb4] sm:$0xf] %vm996_vm1, %v4145_v60  ;;  %v902_v44 = vshrl.u32 %v813_v40, 16  ;;  %v905_v45 = vshll.u32 %v813_v40, 16 }
 0x128   : > { %1942 = vrot.lane.b32.xlu1 %v1879_v52, %s4683_s21  ;;  %1269 = vst.msk [vmem:[#allocation2 + $0xc0] sm:$0xf] %vm996_vm1, %v4148_v48  ;;  %v904_v51 = vrot.slane %v902_v44, 7 }
 0x12a   : > { %2243 = vrot.lane.b32.xlu0 %v5062_v53, %s4685_s27  ;;  %v907_v59 = vor.u32 %v905_v45, %v904_v51  ;;  %v992_v60 = vsel %vm4845_vm6, %v904_v51, 0 }
 0x12c   : > { %2171 = vrot.lane.b32.xlu1 %v1875_v58, %s4687_s29  ;;  %v976_v62 = vsel %vm4845_vm6, 0, %v907_v59 }
 0x12d   : > { %v4153_v6 = vcombine.high %v976_v62, %v976_v62 }
 0x12e   : > { %2010 = vrot.lane.b32.xlu0 %v5062_v53, %s4686_s28 }
 0x12f   : > { %1274 = vst.msk [vmem:[#allocation2 + $0xd4] sm:$0xf] %vm996_vm1, %v4153_v6  ;;  %v4434_v6 = vpop.f32.mrf.mxu0 }
 0x130   : > { %1938 = vrot.lane.b32.xlu1 %v1875_v58, %s4683_s21 }
 0x132   : > { %2408 = vrot.lane.b32.xlu0 %v1879_v52, %s4688_s30  ;;  %v4146_v52 = vcombine.low %v990_v47, %v990_v47 }
 0x134   : > { %2257 = vrot.lane.b32.xlu1 %v5098_v0, %s4685_s27  ;;  %1267 = vst.msk [vmem:[#allocation2 + $0xb8] sm:$0xf] %vm996_vm1, %v4146_v52 }
 0x136   : > { %2410 = vrot.lane.b32.xlu0 %v1881_v30, %s4688_s30 }
 0x138   : > { %2024 = vrot.lane.b32.xlu1 %v5098_v0, %s4686_s28 }
 0x13a   : > { %2177 = vrot.lane.b32.xlu0 %v1881_v30, %s4687_s29 }
 0x13c   : > { %2329 = vrot.lane.b32.xlu1 %v1586_v1, %s4690_s12 }
 0x13e   : > { %1944 = vrot.lane.b32.xlu0 %v1881_v30, %s4683_s21  ;;  %v724_v30 = vmul.f32 %v4430_v5, %v4823_v32  ;;  %v1888_v5 = vrot.slane %v5098_v0, 1 }
 0x140   : > { %2096 = vrot.lane.b32.xlu1 %v1586_v1, %s4689_s11  ;;  %v763_v53 = vadd.f32 %v4829_v35, %v724_v30  ;;  %v4152_v30 = vcombine.low %v976_v62, %v976_v62  ;;  %v1889_v9 = vsel %vm1862_vm2, %v1886_v24, %v1888_v5  ;;  %v5276_v24 = vrot.slane %v1615_v13, 1  ;;  %v5350_v62 = vld [vmem:[#allocation2 + $0x78] sm:$0xff]  }
 0x141   : > { %v1655_v61 = vshll.u32 %v5350_v62, 16 }
 0x142   : > { %2404 = vrot.lane.b32.xlu0 %v1875_v58, %s4688_s30  ;;  %v1877_v58 = vsel %vm1862_vm2, %v1874_v54, %v1876_v50  ;;  %v1607_v50 = vshll.u32 %v4965_v26, 16  ;;  %v1605_v54 = vor.u32 %v1603_v19, %v1601_v55  ;;  %v795_v27 = vmax.f32 %v763_v53, 0.0  ;;  %1273 = vst.msk [vmem:[#allocation2 + $0xd0] sm:$0xf] %vm996_vm1, %v4152_v30 }
 0x143   : > { %v1619_v30 = vshrl.u32 %v5208_v20, 16 }
 0x144   : > { %2333 = vrot.lane.b32.xlu1 %v1602_v25, %s4690_s12  ;;  %v5156_v63 = vrot.slane %v1607_v50, 1  ;;  %v814_v32 = vpack.c.bf16 %v796_v36, %v795_v27  ;;  %v4154_v50 = vcombine.low %v992_v60, %v992_v60  ;;  %v5286_v36 = vrot.slane %v1623_v28, 1 }
 0x146   : > { %2406 = vrot.lane.b32.xlu0 %v1877_v58, %s4688_s30  ;;  %v1610_v2 = vsel %vm1534_vm3, %v1605_v54, %v5156_v63  ;;  %v909_v12 = vshrl.u32 %v814_v32, 16  ;;  %v912_v35 = vshll.u32 %v814_v32, 16  ;;  %v4155_v54 = vcombine.high %v992_v60, %v992_v60  ;;  %1275 = vst.msk [vmem:[#allocation2 + $0xd8] sm:$0xf] %vm996_vm1, %v4154_v50 }
 0x147   : > { %v1613_v27 = vor.u32 %v1611_v11, %v5156_v63  ;;  %v1629_v38 = vor.u32 %v1627_v34, %v5286_v36 }
 0x148   : > { %1805 = vrot.lane.b32.xlu1 %v1586_v1, %s4684_s22  ;;  %v911_v43 = vrot.slane %v909_v12, 7  ;;  %1276 = vst.msk [vmem:[#allocation2 + $0xdc] sm:$0xf] %vm996_vm1, %v4155_v54  ;;  %v5345_v54 = vld [vmem:[#allocation2 + $0x80] sm:$0xff]  }
 0x149   : > { %v1618_v33 = vsel %vm1534_vm3, %v1613_v27, %v5276_v24 }
 0x14a   : > { %2173 = vrot.lane.b32.xlu0 %v1877_v58, %s4687_s29  ;;  %v914_v47 = vor.u32 %v912_v35, %v911_v43  ;;  %v993_v48 = vsel %vm4845_vm6, %v911_v43, 0  ;;  %v1885_v43 = vsel %vm1862_vm2, %v1882_v15, %v1884_v22 }
 0x14b   : > { %v4158_v21 = vcombine.low %v993_v48, %v993_v48  ;;  %v4159_v55 = vcombine.high %v993_v48, %v993_v48  ;;  %v1635_v48 = vshrl.u32 %v5164_v42, 16 }
 0x14c   : > { %2100 = vrot.lane.b32.xlu1 %v1602_v25, %s4689_s11 }
 0x14d   : > { %1279 = vst.msk [vmem:[#allocation2 + $0xe8] sm:$0xf] %vm996_vm1, %v4158_v21  ;;  %1280 = vst.msk [vmem:[#allocation2 + $0xec] sm:$0xf] %vm996_vm1, %v4159_v55 }
 0x14e   : > { %1940 = vrot.lane.b32.xlu0 %v1877_v58, %s4683_s21  ;;  %v977_v58 = vsel %vm4845_vm6, 0, %v914_v47 }
 0x14f   : > { %v4157_v19 = vcombine.high %v977_v58, %v977_v58 }
 0x150   : > { %1809 = vrot.lane.b32.xlu1 %v1602_v25, %s4684_s22  ;;  %v4156_v25 = vcombine.low %v977_v58, %v977_v58  ;;  %v2468_v58 = vsel %vm2466_vm8, %v4797_v17, %v5179_v8 }
 0x151   : > { %1278 = vst.msk [vmem:[#allocation2 + $0xe4] sm:$0xf] %vm996_vm1, %v4157_v19 }
 0x152   : > { %2335 = vrot.lane.b32.xlu0 %v1610_v2, %s4690_s12  ;;  %1277 = vst.msk [vmem:[#allocation2 + $0xe0] sm:$0xf] %vm996_vm1, %v4156_v25  ;;  %v2533_v25 = vsel %vm2531_vm9, %v2468_v58, %v5173_v4 }
 0x154   : > { %1811 = vrot.lane.b32.xlu1 %v1610_v2, %s4684_s22 }
 0x156   : > { %2102 = vrot.lane.b32.xlu0 %v1610_v2, %s4689_s11 }
 0x158   : > { %2253 = vrot.lane.b32.xlu1 %v5166_v56, %s4685_s27 }
 0x15a   : > { %2255 = vrot.lane.b32.xlu0 %v5164_v42, %s4685_s27 }
 0x15c   : > { %2020 = vrot.lane.b32.xlu1 %v5166_v56, %s4686_s28  ;;  %v1639_v56 = vshll.u32 %v5098_v0, 16 }
 0x15e   : > { %2022 = vrot.lane.b32.xlu0 %v5164_v42, %s4686_s28  ;;  %v5187_v14 = vpop.permute.xlu1 %2241  ;;  %v5322_v21 = vrot.slane %v1639_v56, 1  ;;  %v1894_v56 = vrot.slane %v5345_v54, 1 }
 0x160   : > { %1807 = vrot.lane.b32.xlu1 %v1594_v16, %s4684_s22 }
 0x162   : > { %2331 = vrot.lane.b32.xlu0 %v1594_v16, %s4690_s12  ;;  %v5200_v1 = vpop.permute.xlu1 %2008 }
 0x164   : > { %v5197_v31 = vpop.permute.xlu0 %2239  ;;  %2183 = vrot.lane.b32.xlu1 %v1887_v37, %s4687_s29 }
 0x166   : > { %2098 = vrot.lane.b32.xlu0 %v1594_v16, %s4689_s11  ;;  %v5213_v41 = vpop.permute.xlu1 %2004 }
 0x168   : > { %v5211_v39 = vpop.permute.xlu0 %2006  ;;  %1950 = vrot.lane.b32.xlu1 %v1887_v37, %s4683_s21 }
 0x16a   : > { %2251 = vrot.lane.b32.xlu0 %v5208_v20, %s4685_s27  ;;  %v5223_v52 = vpop.permute.xlu1 %2167 }
 0x16c   : > { %v5219_v46 = vpop.permute.xlu0 %2002  ;;  %2179 = vrot.lane.b32.xlu1 %v1883_v57, %s4687_s29 }
 0x16d   : > { %v2598_v19 = vsel %vm2596_vm10, %v2533_v25, %v5219_v46  ;;  %v4639_v25 = vld [vmem:[#allocation2 + $0x8] sm:$0xff]  }
 0x16e   : > { %2018 = vrot.lane.b32.xlu0 %v5208_v20, %s4686_s28  ;;  %v5243_v3 = vpop.permute.xlu1 %1934  ;;  %v4637_v20 = vld [vmem:[%s6791_s2] ss:$0 sm:$0xff] }
 0x16f   : > { %v728_v13 = vmul.f32 %v4637_v20, %v4434_v6 }
 0x170   : > { %v5239_v2 = vpop.permute.xlu0 %2402  ;;  %1946 = vrot.lane.b32.xlu1 %v1883_v57, %s4683_s21 }
 0x172   : > { %2416 = vrot.lane.b32.xlu0 %v1887_v37, %s4688_s30  ;;  %v5256_v53 = vpop.permute.xlu1 %1930  ;;  %v1631_v37 = vshll.u32 %v5164_v42, 16 }
 0x174   : > { %v5254_v7 = vpop.permute.xlu0 %2169  ;;  %2265 = vrot.lane.b32.xlu1 %v5263_v10, %s4685_s27  ;;  %v1633_v35 = vrot.slane %v1631_v37, 1 }
 0x176   : > { %2418 = vrot.lane.b32.xlu0 %v1889_v9, %s4688_s30  ;;  %v5272_v23 = vpop.permute.xlu1 %2249  ;;  %v1634_v44 = vsel %vm1534_vm3, %v1629_v38, %v1633_v35  ;;  %v1637_v15 = vor.u32 %v1635_v48, %v1633_v35 }
 0x178   : > { %v5270_v16 = vpop.permute.xlu0 %1936  ;;  %2032 = vrot.lane.b32.xlu1 %v5263_v10, %s4686_s28 }
 0x17a   : > { %2185 = vrot.lane.b32.xlu0 %v1889_v9, %s4687_s29  ;;  %v5281_v29 = vpop.permute.xlu1 %2016 }
 0x17c   : > { %v2166_v26 = vpop.permute.xlu0 %2165  ;;  %2337 = vrot.lane.b32.xlu1 %v1618_v33, %s4690_s12 }
 0x17e   : > { %1952 = vrot.lane.b32.xlu0 %v1889_v9, %s4683_s21  ;;  %v5293_v32 = vpop.permute.xlu1 %2092 }
 0x180   : > { %v5290_v63 = vpop.permute.xlu0 %1932  ;;  %2104 = vrot.lane.b32.xlu1 %v1618_v33, %s4689_s11 }
 0x182   : > { %2412 = vrot.lane.b32.xlu0 %v1883_v57, %s4688_s30  ;;  %v5300_v40 = vpop.permute.xlu1 %1801  ;;  %v1642_v57 = vsel %vm1534_vm3, %v1637_v15, %v5322_v21 }
 0x184   : > { %v5298_v12 = vpop.permute.xlu0 %1797  ;;  %2341 = vrot.lane.b32.xlu1 %v1634_v44, %s4690_s12 }
 0x186   : > { %2414 = vrot.lane.b32.xlu0 %v1885_v43, %s4688_s30  ;;  %v5310_v47 = vpop.permute.xlu1 %1803 }
 0x188   : > { %v2328_v45 = vpop.permute.xlu0 %2327  ;;  %1813 = vrot.lane.b32.xlu1 %v1618_v33, %s4684_s22  ;;  %v676_v33 = vpop.f32.mrf.mxu0 }
 0x189   : > { %v726_v37 = vmul.f32 %v4637_v20, %v676_v33 }
 0x18a   : > { %2181 = vrot.lane.b32.xlu0 %v1885_v43, %s4687_s29  ;;  %v5318_v22 = vpop.permute.xlu1 %2245 }
 0x18c   : > { %v5316_v51 = vpop.permute.xlu0 %2094  ;;  %2108 = vrot.lane.b32.xlu1 %v1634_v44, %s4689_s11 }
 0x18e   : > { %1948 = vrot.lane.b32.xlu0 %v1885_v43, %s4683_s21  ;;  %v5326_v42 = vpop.permute.xlu1 %2012 }
 0x190   : > { %v5324_v55 = vpop.permute.xlu0 %2247  ;;  %1817 = vrot.lane.b32.xlu1 %v1634_v44, %s4684_s22 }
 0x192   : > { %2343 = vrot.lane.b32.xlu0 %v1642_v57, %s4690_s12  ;;  %v5337_v60 = vpop.permute.xlu1 %1799 }
 0x194   : > { %v5335_v59 = vpop.permute.xlu0 %2014  ;;  %1819 = vrot.lane.b32.xlu1 %v1642_v57, %s4684_s22 }
 0x196   : > { %2110 = vrot.lane.b32.xlu0 %v1642_v57, %s4689_s11  ;;  %v5348_v8 = vpop.permute.xlu1 %2175 }
 0x198   : > { %v2091_v50 = vpop.permute.xlu0 %2090  ;;  %2261 = vrot.lane.b32.xlu1 %v5350_v62, %s4685_s27 }
 0x199   : > { %v2662_v17 = vsel %vm481_vm0, %v2598_v19, %v2091_v50  ;;  %v2470_v19 = vsel %vm2466_vm8, %v4639_v25, %v5298_v12 }
 0x19a   : > { %v2727_v4 = vsel %vm2725_vm11, %v2662_v17, %v2166_v26  ;;  %2263 = vrot.lane.b32.xlu0 %v5345_v54, %s4685_s27  ;;  %v5368_v28 = vpop.permute.xlu1 %1942  ;;  %v1621_v26 = vor.u32 %v1619_v30, %v5276_v24  ;;  %v2535_v12 = vsel %vm2531_vm9, %v2470_v19, %v5256_v53 }
 0x19b   : > { %v2792_v46 = vsel %vm2790_vm13, %v2727_v4, %v5197_v31  ;;  %v4638_v31 = vld [vmem:[%s6792_s3] ss:$0 sm:$0xff] }
 0x19c   : > { %v5360_v9 = vpop.permute.xlu0 %2243  ;;  %v2857_v11 = vsel %vm2855_vm12, %v2792_v46, %v2328_v45  ;;  %v767_v34 = vadd.f32 %v4638_v31, %v728_v13  ;;  %2028 = vrot.lane.b32.xlu1 %v5350_v62, %s4686_s28  ;;  %v765_v35 = vadd.f32 %v4638_v31, %v726_v37  ;;  %v1626_v44 = vsel %vm1534_vm3, %v1621_v26, %v5286_v36  ;;  %v5395_v46 = vld [vmem:[#allocation2 + $0x70] sm:$0xff]  }
 0x19d   : > { %v2922_v27 = vsel %vm2920_vm14, %v2857_v11, %v5239_v2  ;;  %v4435_v2 = vpop.f32.mrf.mxu0  ;;  %v1892_v45 = vrot.slane %v5350_v62, 1  ;;  %v2600_v37 = vsel %vm2596_vm10, %v2535_v12, %v5213_v41  ;;  %v1647_v25 = vshll.u32 %v5395_v46, 16 }
 0x19e   : > { %4442 = vmatprep.mubr.msk.bf16.mxu1 %vm3005_vm15, %v2922_v27  ;;  %2030 = vrot.lane.b32.xlu0 %v5345_v54, %s4686_s28  ;;  %v729_v24 = vmul.f32 %v4637_v20, %v4435_v2  ;;  %v5381_v43 = vpop.permute.xlu1 %2171  ;;  %v799_v15 = vmax.f32 %v767_v34, 0.0  ;;  %v797_v17 = vmax.f32 %v765_v35, 0.0  ;;  %v1890_v34 = vrot.slane %v5395_v46, 1 }
 0x19f   : > { %v679_v48 = vpop.f32.mrf.mxu0  ;;  %v1895_v6 = vsel %vm1862_vm2, %v1892_v45, %v1894_v56  ;;  %v2664_v41 = vsel %vm481_vm0, %v2600_v37, %v5293_v32 }
 0x1a0   : > { %v5379_v38 = vpop.permute.xlu0 %2010  ;;  %v768_v57 = vadd.f32 %v4638_v31, %v729_v24  ;;  %v727_v58 = vmul.f32 %v4637_v20, %v679_v48  ;;  %1815 = vrot.lane.b32.xlu1 %v1626_v44, %s4684_s22 }
 0x1a2   : > { %2339 = vrot.lane.b32.xlu0 %v1626_v44, %s4690_s12  ;;  %v800_v36 = vmax.f32 %v768_v57, 0.0  ;;  %v766_v30 = vadd.f32 %v4638_v31, %v727_v58  ;;  %v5393_v4 = vpop.permute.xlu1 %1938 }
 0x1a4   : > { %v5391_v50 = vpop.permute.xlu0 %2408  ;;  %v816_v11 = vpack.c.bf16 %v800_v36, %v799_v15  ;;  %v798_v20 = vmax.f32 %v766_v30, 0.0  ;;  %2191 = vrot.lane.b32.xlu1 %v1895_v6, %s4687_s29  ;;  %v1891_v36 = vsel %vm1862_vm2, %v1888_v5, %v1890_v34  ;;  %v2729_v5 = vsel %vm2725_vm11, %v2664_v41, %v5223_v52 }
 0x1a6   : > { %2106 = vrot.lane.b32.xlu0 %v1626_v44, %s4689_s11  ;;  %v923_v27 = vshrl.u32 %v816_v11, 16  ;;  %v926_v26 = vshll.u32 %v816_v11, 16  ;;  %v815_v33 = vpack.c.bf16 %v798_v20, %v797_v17  ;;  %v5408_v31 = vpop.permute.xlu1 %2257  ;;  %v1643_v44 = vshrl.u32 %v5098_v0, 16 }
 0x1a8   : > { %v5406_v13 = vpop.permute.xlu0 %2410  ;;  %v925_v2 = vrot.slane %v923_v27, 7  ;;  %v916_v35 = vshrl.u32 %v815_v33, 16  ;;  %v919_v53 = vshll.u32 %v815_v33, 16  ;;  %1958 = vrot.lane.b32.xlu1 %v1895_v6, %s4683_s21  ;;  %v1645_v52 = vor.u32 %v1643_v44, %v5322_v21 }
 0x1a9   : > { %v5472_v44 = vrot.slane %v1655_v61, 1 }
 0x1aa   : > { %2259 = vrot.lane.b32.xlu0 %v5395_v46, %s4685_s27  ;;  %v928_v48 = vor.u32 %v926_v26, %v925_v2  ;;  %v995_v15 = vsel %vm4845_vm6, %v925_v2, 0  ;;  %v918_v57 = vrot.slane %v916_v35, 7  ;;  %v5421_v58 = vpop.permute.xlu1 %2024  ;;  %v1896_v2 = vrot.slane %v5263_v10, 1 }
 0x1ab   : > { %v4166_v19 = vcombine.low %v995_v15, %v995_v15  ;;  %v4167_v17 = vcombine.high %v995_v15, %v995_v15  ;;  %v2794_v15 = vsel %vm2790_vm13, %v2729_v5, %v5187_v14 }
 0x1ac   : > { %v5416_v24 = vpop.permute.xlu0 %2177  ;;  %v979_v30 = vsel %vm4845_vm6, 0, %v928_v48  ;;  %v921_v11 = vor.u32 %v919_v53, %v918_v57  ;;  %v994_v32 = vsel %vm4845_vm6, %v918_v57, 0  ;;  %2187 = vrot.lane.b32.xlu1 %v1891_v36, %s4687_s29  ;;  %v5453_v48 = vrot.slane %v1647_v25, 1 }
 0x1ad   : > { %v4164_v20 = vcombine.low %v979_v30, %v979_v30  ;;  %v4165_v12 = vcombine.high %v979_v30, %v979_v30  ;;  %1287 = vst.msk [vmem:[#allocation2 + $0x108] sm:$0xf] %vm996_vm1, %v4166_v19  ;;  %1288 = vst.msk [vmem:[#allocation2 + $0x10c] sm:$0xf] %vm996_vm1, %v4167_v17  ;;  %v4162_v27 = vcombine.low %v994_v32, %v994_v32  ;;  %v1659_v25 = vshrl.u32 %v5350_v62, 16 }
 0x1ae   : > { %2026 = vrot.lane.b32.xlu0 %v5395_v46, %s4686_s28  ;;  %v4163_v26 = vcombine.high %v994_v32, %v994_v32  ;;  %v978_v33 = vsel %vm4845_vm6, 0, %v921_v11  ;;  %v2330_v37 = vpop.permute.xlu1 %2329  ;;  %v1897_v21 = vsel %vm1862_vm2, %v1894_v56, %v1896_v2  ;;  %v1650_v14 = vsel %vm1534_vm3, %v1645_v52, %v5453_v48 }
 0x1af   : > { %1285 = vst.msk [vmem:[#allocation2 + $0x100] sm:$0xf] %vm996_vm1, %v4164_v20  ;;  %1286 = vst.msk [vmem:[#allocation2 + $0x104] sm:$0xf] %vm996_vm1, %v4165_v12  ;;  %v4160_v35 = vcombine.low %v978_v33, %v978_v33  ;;  %v4161_v53 = vcombine.high %v978_v33, %v978_v33  ;;  %v2859_v57 = vsel %vm2855_vm12, %v2794_v15, %v2330_v37  ;;  %v1663_v17 = vshll.u32 %v5345_v54, 16  ;;  %v4640_v33 = vld [vmem:[#allocation2 + $0x18] sm:$0xff]  }
 0x1b0   : > { %v5440_v0 = vpop.permute.xlu0 %1944  ;;  %1283 = vst.msk [vmem:[#allocation2 + $0xf8] sm:$0xf] %vm996_vm1, %v4162_v27  ;;  %1284 = vst.msk [vmem:[#allocation2 + $0xfc] sm:$0xf] %vm996_vm1, %v4163_v26  ;;  %1954 = vrot.lane.b32.xlu1 %v1891_v36, %s4683_s21  ;;  %v1661_v56 = vor.u32 %v1659_v25, %v5472_v44  ;;  %v2474_v37 = vsel %vm2466_vm8, %v4640_v33, %v5300_v40  ;;  %v1893_v52 = vsel %vm1862_vm2, %v1890_v34, %v1892_v45 }
 0x1b1   : > { %1281 = vst.msk [vmem:[#allocation2 + $0xf0] sm:$0xf] %vm996_vm1, %v4160_v35  ;;  %1282 = vst.msk [vmem:[#allocation2 + $0xf4] sm:$0xf] %vm996_vm1, %v4161_v53  ;;  %v1665_v20 = vrot.slane %v1663_v17, 1  ;;  %v2539_v61 = vsel %vm2531_vm9, %v2474_v37, %v5243_v3  ;;  %v2472_v40 = vsel %vm2466_vm8, %v4925_v49, %v5337_v60  ;;  %v5546_v17 = vld [vmem:[#allocation2 + $0x98] sm:$0xff]  }
 0x1b2   : > { %2424 = vrot.lane.b32.xlu0 %v1895_v6, %s4688_s30  ;;  %v2097_v19 = vpop.permute.xlu1 %2096  ;;  %v2537_v45 = vsel %vm2531_vm9, %v2472_v40, %v5290_v63  ;;  %v5588_v40 = vld [vmem:[#allocation2 + $0x90] sm:$0xff]  }
 0x1b3   : > { %v1666_v27 = vsel %vm1534_vm3, %v1661_v56, %v1665_v20 }
 0x1b4   : > { %v2405_v41 = vpop.permute.xlu0 %2404  ;;  %2345 = vrot.lane.b32.xlu1 %v1650_v14, %s4690_s12 }
 0x1b5   : > { %v2924_v6 = vsel %vm2920_vm14, %v2859_v57, %v2405_v41  ;;  %v1671_v57 = vshll.u32 %v5263_v10, 16 }
 0x1b6   : > { %4443 = vmatmul.mubr.msk.bf16.vlgmr.msra.gmra.mxu1 %vm3005_vm15, %v2924_v6  ;;  %2426 = vrot.lane.b32.xlu0 %v1897_v21, %s4688_s30  ;;  %v2334_v11 = vpop.permute.xlu1 %2333  ;;  %v2602_v6 = vsel %vm2596_vm10, %v2537_v45, %v5211_v39 }
 0x1b7   : > { %v5526_v60 = vrot.slane %v1671_v57, 1 }
 0x1b8   : > { %v2407_v30 = vpop.permute.xlu0 %2406  ;;  %2112 = vrot.lane.b32.xlu1 %v1650_v14, %s4689_s11 }
 0x1ba   : > { %2193 = vrot.lane.b32.xlu0 %v1897_v21, %s4687_s29  ;;  %v5482_v12 = vpop.permute.xlu1 %1805 }
 0x1bc   : > { %v5480_v32 = vpop.permute.xlu0 %2173  ;;  %2349 = vrot.lane.b32.xlu1 %v1666_v27, %s4690_s12 }
 0x1be   : > { %1960 = vrot.lane.b32.xlu0 %v1897_v21, %s4683_s21  ;;  %v5489_v5 = vpop.permute.xlu1 %2100 }
 0x1c0   : > { %v5487_v26 = vpop.permute.xlu0 %1940  ;;  %1821 = vrot.lane.b32.xlu1 %v1650_v14, %s4684_s22 }
 0x1c2   : > { %2420 = vrot.lane.b32.xlu0 %v1891_v36, %s4688_s30  ;;  %v5497_v53 = vpop.permute.xlu1 %1809  ;;  %v1667_v36 = vshrl.u32 %v5345_v54, 16  ;;  %v2604_v54 = vsel %vm2596_vm10, %v2539_v61, %v5200_v1  ;;  %v1900_v61 = vrot.slane %v5546_v17, 1 }
 0x1c3   : > { %v2668_v34 = vsel %vm481_vm0, %v2604_v54, %v2097_v19  ;;  %v2666_v19 = vsel %vm481_vm0, %v2602_v6, %v5316_v51  ;;  %v2476_v51 = vsel %vm2466_vm8, %v4894_v18, %v5310_v47  ;;  %v1675_v6 = vshrl.u32 %v5263_v10, 16 }
 0x1c4   : > { %v5495_v35 = vpop.permute.xlu0 %2335  ;;  %2116 = vrot.lane.b32.xlu1 %v1666_v27, %s4689_s11  ;;  %v1669_v3 = vor.u32 %v1667_v36, %v1665_v20  ;;  %v2733_v63 = vsel %vm2725_vm11, %v2668_v34, %v5381_v43  ;;  %v1651_v43 = vshrl.u32 %v5395_v46, 16  ;;  %v2731_v56 = vsel %vm2725_vm11, %v2666_v19, %v5254_v7 }
 0x1c5   : > { %v2798_v39 = vsel %vm2790_vm13, %v2733_v63, %v5318_v22  ;;  %v2796_v22 = vsel %vm2790_vm13, %v2731_v56, %v5360_v9  ;;  %v2541_v36 = vsel %vm2531_vm9, %v2476_v51, %v5270_v16  ;;  %v1679_v63 = vshll.u32 %v5588_v40, 16 }
 0x1c6   : > { %2422 = vrot.lane.b32.xlu0 %v1893_v52, %s4688_s30  ;;  %v5515_v41 = vpop.permute.xlu1 %1811  ;;  %v1674_v1 = vsel %vm1534_vm3, %v1669_v3, %v5526_v60  ;;  %v2863_v20 = vsel %vm2855_vm12, %v2798_v39, %v2334_v11  ;;  %v2606_v47 = vsel %vm2596_vm10, %v2541_v36, %v5379_v38  ;;  %v1898_v3 = vrot.slane %v5588_v40, 1 }
 0x1c7   : > { %v2928_v18 = vsel %vm2920_vm14, %v2863_v20, %v5391_v50  ;;  %v1677_v56 = vor.u32 %v1675_v6, %v5526_v60  ;;  %v1687_v10 = vshll.u32 %v5546_v17, 16  ;;  %v5677_v6 = vld [vmem:[#allocation2 + $0xb0] sm:$0xff]  }
 0x1c8   : > { %v5512_v15 = vpop.permute.xlu0 %2102  ;;  %1825 = vrot.lane.b32.xlu1 %v1666_v27, %s4684_s22 }
 0x1ca   : > { %2189 = vrot.lane.b32.xlu0 %v1893_v52, %s4687_s29  ;;  %v5530_v21 = vpop.permute.xlu1 %2253 }
 0x1cc   : > { %v5524_v49 = vpop.permute.xlu0 %2255  ;;  %1827 = vrot.lane.b32.xlu1 %v1674_v1, %s4684_s22 }
 0x1ce   : > { %1956 = vrot.lane.b32.xlu0 %v1893_v52, %s4683_s21  ;;  %v5544_v25 = vpop.permute.xlu1 %2020  ;;  %v1653_v52 = vor.u32 %v1651_v43, %v5453_v48  ;;  %v5576_v48 = vld [vmem:[#allocation2 + $0xa0] sm:$0xff]  }
 0x1cf   : > { %v1902_v38 = vrot.slane %v5576_v48, 1 }
 0x1d0   : > { %v5540_v14 = vpop.permute.xlu0 %2022  ;;  %2269 = vrot.lane.b32.xlu1 %v5546_v17, %s4685_s27  ;;  %v1658_v16 = vsel %vm1534_vm3, %v1653_v52, %v5472_v44  ;;  %v1695_v52 = vshll.u32 %v5576_v48, 16 }
 0x1d2   : > { %2351 = vrot.lane.b32.xlu0 %v1674_v1, %s4690_s12  ;;  %v5561_v37 = vpop.permute.xlu1 %1807 }
 0x1d4   : > { %v2332_v27 = vpop.permute.xlu0 %2331  ;;  %2036 = vrot.lane.b32.xlu1 %v5546_v17, %s4686_s28 }
 0x1d5   : > { %v2861_v33 = vsel %vm2855_vm12, %v2796_v22, %v2332_v27  ;;  %v1689_v27 = vrot.slane %v1687_v10, 1  ;;  %v1711_v10 = vshll.u32 %v5677_v6, 16 }
 0x1d6   : > { %2118 = vrot.lane.b32.xlu0 %v1674_v1, %s4689_s11  ;;  %v2926_v7 = vsel %vm2920_vm14, %v2861_v33, %v2407_v30  ;;  %v5579_v11 = vpop.permute.xlu1 %2183  ;;  %v4641_v1 = vld [vmem:[#allocation2 + $0x28] sm:$0xff]   ;;  %v1691_v33 = vshrl.u32 %v5546_v17, 16 }
 0x1d7   : > { %4446 = vmatprep.mubr.msk.bf16.mxu1 %vm3005_vm15, %v2926_v7  ;;  %v2478_v19 = vsel %vm2466_vm8, %v4641_v1, %v5482_v12 }
 0x1d8   : > { %4447 = vmatmul.mubr.msk.bf16.gmra.mxu1 %vm3005_vm15, %v2928_v18  ;;  %v2099_v9 = vpop.permute.xlu0 %2098  ;;  %1823 = vrot.lane.b32.xlu1 %v1658_v16, %s4684_s22  ;;  %v2543_v51 = vsel %vm2531_vm9, %v2478_v19, %v5393_v4 }
 0x1d9   : > { %v2670_v30 = vsel %vm481_vm0, %v2606_v47, %v2099_v9  ;;  %v2608_v20 = vsel %vm2596_vm10, %v2543_v51, %v5326_v42  ;;  %v1693_v42 = vor.u32 %v1691_v33, %v1689_v27  ;;  %v1697_v9 = vrot.slane %v1695_v52, 1 }
 0x1da   : > { %v2735_v50 = vsel %vm2725_vm11, %v2670_v30, %v5480_v32  ;;  %2347 = vrot.lane.b32.xlu0 %v1658_v16, %s4690_s12  ;;  %v5599_v54 = vpop.permute.xlu1 %1950  ;;  %v2672_v7 = vsel %vm481_vm0, %v2608_v20, %v5489_v5  ;;  %v5694_v52 = vrot.slane %v1711_v10, 1  ;;  %v1906_v10 = vrot.slane %v5677_v6, 1 }
 0x1db   : > { %v2800_v57 = vsel %vm2790_vm13, %v2735_v50, %v5324_v55  ;;  %v5606_v55 = vsel %vm1862_vm2, %v1900_v61, %v1902_v38  ;;  %v2737_v18 = vsel %vm2725_vm11, %v2672_v7, %v5348_v8  ;;  %v1683_v50 = vshrl.u32 %v5588_v40, 16 }
 0x1dc   : > { %v5593_v45 = vpop.permute.xlu0 %2251  ;;  %v2865_v44 = vsel %vm2855_vm12, %v2800_v57, %v5495_v35  ;;  %2199 = vrot.lane.b32.xlu1 %v5606_v55, %s4687_s29  ;;  %v1698_v5 = vsel %vm1534_vm3, %v1693_v42, %v1697_v9  ;;  %v5667_v57 = vld [vmem:[#allocation2 + $0xa8] sm:$0xff]  }
 0x1dd   : > { %v2930_v32 = vsel %vm2920_vm14, %v2865_v44, %v5406_v13  ;;  %v1899_v13 = vsel %vm1862_vm2, %v1896_v2, %v1898_v3  ;;  %v1681_v2 = vrot.slane %v1679_v63, 1  ;;  %v2802_v44 = vsel %vm2790_vm13, %v2737_v18, %v5272_v23 }
 0x1de   : > { %4450 = vmatprep.mubr.msk.bf16.mxu1 %vm3005_vm15, %v2930_v32  ;;  %2114 = vrot.lane.b32.xlu0 %v1658_v16, %s4689_s11  ;;  %v5613_v34 = vpop.permute.xlu1 %2179  ;;  %v5661_v16 = vsel %vm1862_vm2, %v1898_v3, %v1900_v61  ;;  %v1703_v63 = vshll.u32 %v5667_v57, 16 }
 0x1df   : > { %v1682_v60 = vsel %vm1534_vm3, %v1677_v56, %v1681_v2 }
 0x1e0   : > { %v5611_v35 = vpop.permute.xlu0 %2018  ;;  %2195 = vrot.lane.b32.xlu1 %v1899_v13, %s4687_s29  ;;  %v1705_v56 = vrot.slane %v1703_v63, 1 }
 0x1e2   : > { %2267 = vrot.lane.b32.xlu0 %v5588_v40, %s4685_s27  ;;  %v5627_v43 = vpop.permute.xlu1 %1946 }
 0x1e4   : > { %v5625_v39 = vpop.permute.xlu0 %2416  ;;  %1962 = vrot.lane.b32.xlu1 %v1899_v13, %s4683_s21 }
 0x1e6   : > { %2034 = vrot.lane.b32.xlu0 %v5588_v40, %s4686_s28  ;;  %v5638_v12 = vpop.permute.xlu1 %2265 }
 0x1e8   : > { %v5636_v22 = vpop.permute.xlu0 %2418  ;;  %2353 = vrot.lane.b32.xlu1 %v1682_v60, %s4690_s12 }
 0x1ea   : > { %2432 = vrot.lane.b32.xlu0 %v5606_v55, %s4688_s30  ;;  %v5652_v36 = vpop.permute.xlu1 %2032 }
 0x1ec   : > { %v5647_v4 = vpop.permute.xlu0 %2185  ;;  %2120 = vrot.lane.b32.xlu1 %v1682_v60, %s4689_s11 }
 0x1ee   : > { %2428 = vrot.lane.b32.xlu0 %v1899_v13, %s4688_s30  ;;  %v2338_v30 = vpop.permute.xlu1 %2337  ;;  %v1685_v13 = vor.u32 %v1683_v50, %v1681_v2  ;;  %v1707_v2 = vshrl.u32 %v5667_v57, 16 }
 0x1ef   : > { %v2867_v8 = vsel %vm2855_vm12, %v2802_v44, %v2338_v30  ;;  %v4642_v30 = vld [vmem:[#allocation2 + $0x38] sm:$0xff]  }
 0x1f0   : > { %v5658_v47 = vpop.permute.xlu0 %1952  ;;  %2357 = vrot.lane.b32.xlu1 %v1698_v5, %s4690_s12  ;;  %v1690_v19 = vsel %vm1534_vm3, %v1685_v13, %v1689_v27  ;;  %v1709_v33 = vor.u32 %v1707_v2, %v1705_v56  ;;  %v2482_v50 = vsel %vm2466_vm8, %v4642_v30, %v5497_v53  ;;  %v4643_v13 = vld [vmem:[#allocation2 + $0x30] sm:$0xff]  }
 0x1f1   : > { %v2480_v63 = vsel %vm2466_vm8, %v4643_v13, %v5561_v37 }
 0x1f2   : > { %2430 = vrot.lane.b32.xlu0 %v5661_v16, %s4688_s30  ;;  %v2105_v3 = vpop.permute.xlu1 %2104  ;;  %v5706_v18 = vsel %vm1534_vm3, %v1709_v33, %v5694_v52 }
 0x1f4   : > { %v2413_v32 = vpop.permute.xlu0 %2412  ;;  %1829 = vrot.lane.b32.xlu1 %v1682_v60, %s4684_s22  ;;  %v1699_v60 = vshrl.u32 %v5576_v48, 16 }
 0x1f5   : > { %v2932_v61 = vsel %vm2920_vm14, %v2867_v8, %v2413_v32 }
 0x1f6   : > { %4451 = vmatmul.mubr.msk.bf16.gmra.mxu1 %vm3005_vm15, %v2932_v61  ;;  %2197 = vrot.lane.b32.xlu0 %v5661_v16, %s4687_s29  ;;  %v2342_v1 = vpop.permute.xlu1 %2341  ;;  %v1701_v42 = vor.u32 %v1699_v60, %v1697_v9  ;;  %v1904_v9 = vrot.slane %v5667_v57, 1  ;;  %v2547_v61 = vsel %vm2531_vm9, %v2482_v50, %v5368_v28  ;;  %v2545_v28 = vsel %vm2531_vm9, %v2480_v63, %v5487_v26 }
 0x1f7   : > { %v2612_v60 = vsel %vm2596_vm10, %v2547_v61, %v5281_v29 }
 0x1f8   : > { %v5681_v23 = vpop.permute.xlu0 %2414  ;;  %2124 = vrot.lane.b32.xlu1 %v1698_v5, %s4689_s11  ;;  %v5715_v32 = vsel %vm1534_vm3, %v1701_v42, %v1705_v56  ;;  %v5732_v56 = vsel %vm1862_vm2, %v1902_v38, %v1904_v9  ;;  %v2676_v37 = vsel %vm481_vm0, %v2612_v60, %v2105_v3  ;;  %v2610_v38 = vsel %vm2596_vm10, %v2545_v28, %v5335_v59 }
 0x1f9   : > { %v5752_v26 = vsel %vm1862_vm2, %v1904_v9, %v1906_v10  ;;  %v2741_v29 = vsel %vm2725_vm11, %v2676_v37, %v5613_v34  ;;  %v5770_v34 = vld [vmem:[#allocation2 + $0xb8] sm:$0xff]  }
 0x1fa   : > { %2355 = vrot.lane.b32.xlu0 %v1690_v19, %s4690_s12  ;;  %v5690_v20 = vpop.permute.xlu1 %1813  ;;  %v2806_v3 = vsel %vm2790_vm13, %v2741_v29, %v5530_v21  ;;  %v1719_v13 = vshll.u32 %v5770_v34, 16  ;;  %v1723_v60 = vshrl.u32 %v5770_v34, 16 }
 0x1fb   : > { %v2871_v50 = vsel %vm2855_vm12, %v2806_v3, %v2342_v1  ;;  %v1715_v3 = vshrl.u32 %v5677_v6, 16 }
 0x1fc   : > { %v5688_v51 = vpop.permute.xlu0 %2181  ;;  %2273 = vrot.lane.b32.xlu1 %v5667_v57, %s4685_s27 }
 0x1fe   : > { %2122 = vrot.lane.b32.xlu0 %v1690_v19, %s4689_s11  ;;  %v5700_v7 = vpop.permute.xlu1 %2108 }
 0x200   : > { %v5698_v27 = vpop.permute.xlu0 %1948  ;;  %2361 = vrot.lane.b32.xlu1 %v5706_v18, %s4690_s12 }
 0x202   : > { %2271 = vrot.lane.b32.xlu0 %v5576_v48, %s4685_s27  ;;  %v5712_v8 = vpop.permute.xlu1 %1817 }
 0x204   : > { %v2344_v44 = vpop.permute.xlu0 %2343  ;;  %1831 = vrot.lane.b32.xlu1 %v1690_v19, %s4684_s22 }
 0x206   : > { %2359 = vrot.lane.b32.xlu0 %v5715_v32, %s4690_s12  ;;  %v5727_v2 = vpop.permute.xlu1 %1819 }
 0x208   : > { %v5725_v53 = vpop.permute.xlu0 %2110  ;;  %1833 = vrot.lane.b32.xlu1 %v1698_v5, %s4684_s22  ;;  %v2674_v5 = vsel %vm481_vm0, %v2610_v38, %v5512_v15 }
 0x209   : > { %v2739_v30 = vsel %vm2725_vm11, %v2674_v5, %v5416_v24 }
 0x20a   : > { %2434 = vrot.lane.b32.xlu0 %v5732_v56, %s4688_s30  ;;  %v5747_v33 = vpop.permute.xlu1 %2261  ;;  %v2804_v21 = vsel %vm2790_vm13, %v2739_v30, %v5593_v45  ;;  %v2936_v45 = vsel %vm2920_vm14, %v2871_v50, %v5625_v39  ;;  %v1721_v39 = vrot.slane %v1719_v13, 1  ;;  %v3457_v13 = vld [vmem:[%s6796_s7] sm:$0x3] }
 0x20b   : > { %4541 = vmatprep.subr.msk.bf16.mxu0 %vm3070_vm7, %v3457_v13 }
 0x20c   : > { %v5743_v19 = vpop.permute.xlu0 %2263  ;;  %1966 = vrot.lane.b32.xlu1 %v5606_v55, %s4683_s21  ;;  %v4644_v55 = vld [vmem:[#allocation2 + $0x40] sm:$0xff]  }
 0x20d   : > { %v2484_v15 = vsel %vm2466_vm8, %v4644_v55, %v5515_v41 }
 0x20e   : > { %2436 = vrot.lane.b32.xlu0 %v5752_v26, %s4688_s30  ;;  %v5766_v42 = vpop.permute.xlu1 %2028  ;;  %v2549_v41 = vsel %vm2531_vm9, %v2484_v15, %v5440_v0 }
 0x20f   : > { %v2614_v1 = vsel %vm2596_vm10, %v2549_v41, %v5611_v35 }
 0x210   : > { %v5762_v59 = vpop.permute.xlu0 %2030  ;;  %2040 = vrot.lane.b32.xlu1 %v5667_v57, %s4686_s28 }
 0x212   : > { %1964 = vrot.lane.b32.xlu0 %v5661_v16, %s4683_s21  ;;  %v5782_v61 = vpop.permute.xlu1 %1815 }
 0x214   : > { %v2340_v9 = vpop.permute.xlu0 %2339  ;;  %2128 = vrot.lane.b32.xlu1 %v5706_v18, %s4689_s11 }
 0x215   : > { %v2869_v16 = vsel %vm2855_vm12, %v2804_v21, %v2340_v9  ;;  %v4645_v21 = vld [vmem:[#allocation2 + $0x48] sm:$0xff]  }
 0x216   : > { %2038 = vrot.lane.b32.xlu0 %v5576_v48, %s4686_s28  ;;  %v2934_v24 = vsel %vm2920_vm14, %v2869_v16, %v5681_v23  ;;  %v5799_v23 = vld [vmem:[#allocation2 + $0xc0] sm:$0xff]   ;;  %v5802_v28 = vpop.permute.xlu1 %2191  ;;  %v2486_v50 = vsel %vm2466_vm8, %v4645_v21, %v5690_v20  ;;  %v3507_v20 = vsel %vm3070_vm7, %v3457_v13, 0 }
 0x217   : > { %4454 = vmatprep.mubr.msk.bf16.mxu1 %vm3005_vm15, %v2934_v24  ;;  %v1727_v29 = vshll.u32 %v5799_v23, 16  ;;  %v1908_v24 = vrot.slane %v5770_v34, 1  ;;  %v2551_v41 = vsel %vm2531_vm9, %v2486_v50, %v5627_v43  ;;  %4507 = vmatpush3.bf16.msra.mxu0 %v3507_v20  ;;  %v1731_v20 = vshrl.u32 %v5799_v23, 16 }
 0x218   : > { %4455 = vmatmul.mubr.msk.bf16.gmra.mxu1 %vm3005_vm15, %v2936_v45  ;;  %v2107_v48 = vpop.permute.xlu0 %2106  ;;  %2203 = vrot.lane.b32.xlu1 %v5752_v26, %s4687_s29 }
 0x219   : > { %v2678_v63 = vsel %vm481_vm0, %v2614_v1, %v2107_v48  ;;  %v5868_v48 = vsel %vm1862_vm2, %v1906_v10, %v1908_v24 }
 0x21a   : > { %v2743_v0 = vsel %vm2725_vm11, %v2678_v63, %v5688_v51  ;;  %2126 = vrot.lane.b32.xlu0 %v5715_v32, %s4689_s11  ;;  %v5819_v5 = vpop.permute.xlu1 %1958  ;;  %v1910_v63 = vrot.slane %v5799_v23, 1 }
 0x21b   : > { %v2808_v35 = vsel %vm2790_vm13, %v2743_v0, %v5524_v49  ;;  %v1725_v49 = vor.u32 %v1723_v60, %v1721_v39  ;;  %v2616_v0 = vsel %vm2596_vm10, %v2551_v41, %v5544_v25 }
 0x21c   : > { %v5813_v37 = vpop.permute.xlu0 %2259  ;;  %v2873_v38 = vsel %vm2855_vm12, %v2808_v35, %v2344_v44  ;;  %2277 = vrot.lane.b32.xlu1 %v5770_v34, %s4685_s27  ;;  %v5829_v44 = vrot.slane %v1727_v29, 1  ;;  %v5884_v10 = vsel %vm1862_vm2, %v1908_v24, %v1910_v63 }
 0x21d   : > { %v2938_v51 = vsel %vm2920_vm14, %v2873_v38, %v5636_v22  ;;  %v1717_v22 = vor.u32 %v1715_v3, %v5694_v52 }
 0x21e   : > { %4458 = vmatprep.mubr.msk.bf16.mxu1 %vm3005_vm15, %v2938_v51  ;;  %2201 = vrot.lane.b32.xlu0 %v5732_v56, %s4687_s29  ;;  %v5831_v55 = vpop.permute.xlu1 %2187  ;;  %v5838_v15 = vsel %vm1534_vm3, %v1725_v49, %v5829_v44 }
 0x21f   : > { %v5849_v52 = vsel %vm1534_vm3, %v1717_v22, %v1721_v39 }
 0x220   : > { %v5827_v30 = vpop.permute.xlu0 %2026  ;;  %2365 = vrot.lane.b32.xlu1 %v5838_v15, %s4690_s12 }
 0x222   : > { %2275 = vrot.lane.b32.xlu0 %v5677_v6, %s4685_s27  ;;  %v5846_v16 = vpop.permute.xlu1 %1954 }
 0x224   : > { %v5844_v9 = vpop.permute.xlu0 %2424  ;;  %1835 = vrot.lane.b32.xlu1 %v5715_v32, %s4684_s22  ;;  %v2680_v32 = vsel %vm481_vm0, %v2616_v0, %v5700_v7  ;;  %v5898_v7 = vld [vmem:[#allocation2 + $0xc8] sm:$0xff]  }
 0x225   : > { %v2745_v25 = vsel %vm2725_vm11, %v2680_v32, %v5579_v11  ;;  %v1735_v51 = vshll.u32 %v5898_v7, 16  ;;  %v1739_v22 = vshrl.u32 %v5898_v7, 16  ;;  %v4647_v32 = vld [vmem:[#allocation2 + $0x50] sm:$0xff]  }
 0x226   : > { %2363 = vrot.lane.b32.xlu0 %v5849_v52, %s4690_s12  ;;  %v2346_v1 = vpop.permute.xlu1 %2345  ;;  %v2810_v35 = vsel %vm2790_vm13, %v2745_v25, %v5408_v31  ;;  %v2488_v25 = vsel %vm2466_vm8, %v4647_v32, %v5782_v61 }
 0x227   : > { %v1737_v49 = vrot.slane %v1735_v51, 1 }
 0x228   : > { %v5863_v45 = vpop.permute.xlu0 %2426  ;;  %1837 = vrot.lane.b32.xlu1 %v5706_v18, %s4684_s22 }
 0x229   : > { %v1741_v41 = vor.u32 %v1739_v22, %v1737_v49  ;;  %v1912_v22 = vrot.slane %v5898_v7, 1 }
 0x22a   : > { %2438 = vrot.lane.b32.xlu0 %v5868_v48, %s4688_s30  ;;  %v2113_v39 = vpop.permute.xlu1 %2112 }
 0x22c   : > { %v5877_v43 = vpop.permute.xlu0 %2193  ;;  %1970 = vrot.lane.b32.xlu1 %v5752_v26, %s4683_s21  ;;  %v2875_v26 = vsel %vm2855_vm12, %v2810_v35, %v2346_v1 }
 0x22e   : > { %2440 = vrot.lane.b32.xlu0 %v5884_v10, %s4688_s30  ;;  %v5894_v60 = vpop.permute.xlu1 %2349 }
 0x230   : > { %v5892_v18 = vpop.permute.xlu0 %1960  ;;  %2044 = vrot.lane.b32.xlu1 %v5770_v34, %s4686_s28 }
 0x232   : > { %1968 = vrot.lane.b32.xlu0 %v5732_v56, %s4683_s21  ;;  %v5906_v29 = vpop.permute.xlu1 %1821  ;;  %v5911_v56 = vld [vmem:[#allocation2 + $0xd0] sm:$0xff]  }
 0x233   : > { %v1743_v21 = vshll.u32 %v5911_v56, 16 }
 0x234   : > { %v2421_v38 = vpop.permute.xlu0 %2420  ;;  %2132 = vrot.lane.b32.xlu1 %v5838_v15, %s4689_s11 }
 0x235   : > { %v2940_v11 = vsel %vm2920_vm14, %v2875_v26, %v2421_v38  ;;  %v5931_v1 = vrot.slane %v1743_v21, 1  ;;  %v1733_v26 = vor.u32 %v1731_v20, %v5829_v44  ;;  %v2553_v38 = vsel %vm2531_vm9, %v2488_v25, %v5698_v27  ;;  %v4649_v25 = vld [vmem:[#allocation2 + $0x68] sm:$0xff]  }
 0x236   : > { %4459 = vmatmul.mubr.msk.bf16.gmra.mxu1 %vm3005_vm15, %v2940_v11  ;;  %2042 = vrot.lane.b32.xlu0 %v5677_v6, %s4686_s28  ;;  %v5916_v3 = vpop.permute.xlu1 %2116  ;;  %v4646_v6 = vld [vmem:[#allocation2 + $0x58] sm:$0xff]   ;;  %v2618_v44 = vsel %vm2596_vm10, %v2553_v38, %v5540_v14 }
 0x237   : > { %v2490_v50 = vsel %vm2466_vm8, %v4646_v6, %v5712_v8 }
 0x238   : > { %v2423_v31 = vpop.permute.xlu0 %2422  ;;  %2207 = vrot.lane.b32.xlu1 %v5884_v10, %s4687_s29  ;;  %v2555_v0 = vsel %vm2531_vm9, %v2490_v50, %v5599_v54  ;;  %v5952_v54 = vsel %vm1534_vm3, %v1741_v41, %v5931_v1  ;;  %v1914_v50 = vrot.slane %v5911_v56, 1 }
 0x239   : > { %v2620_v11 = vsel %vm2596_vm10, %v2555_v0, %v5421_v58  ;;  %v5962_v58 = vsel %vm1534_vm3, %v1733_v26, %v1737_v49  ;;  %v2494_v26 = vsel %vm2466_vm8, %v4649_v25, %v5906_v29 }
 0x23a   : > { %2130 = vrot.lane.b32.xlu0 %v5849_v52, %s4689_s11  ;;  %v5926_v13 = vpop.permute.xlu1 %1825  ;;  %v2684_v61 = vsel %vm481_vm0, %v2620_v11, %v2113_v39  ;;  %v2682_v39 = vsel %vm481_vm0, %v2618_v44, %v5725_v53 }
 0x23b   : > { %v2749_v21 = vsel %vm2725_vm11, %v2684_v61, %v5831_v55  ;;  %v5982_v55 = vsel %vm1862_vm2, %v1910_v63, %v1912_v22  ;;  %v2747_v53 = vsel %vm2725_vm11, %v2682_v39, %v5647_v4  ;;  %v6001_v4 = vsel %vm1862_vm2, %v1912_v22, %v1914_v50 }
 0x23c   : > { %v2190_v24 = vpop.permute.xlu0 %2189  ;;  %2281 = vrot.lane.b32.xlu1 %v5898_v7, %s4685_s27  ;;  %v2814_v49 = vsel %vm2790_vm13, %v2749_v21, %v5747_v33  ;;  %v2812_v20 = vsel %vm2790_vm13, %v2747_v53, %v5813_v37  ;;  %v2498_v39 = vsel %vm2466_vm8, %v5350_v62, %v5926_v13 }
 0x23d   : > { %v2879_v63 = vsel %vm2855_vm12, %v2814_v49, %v5894_v60 }
 0x23e   : > { %2205 = vrot.lane.b32.xlu0 %v5868_v48, %s4687_s29  ;;  %v5941_v35 = vpop.permute.xlu1 %1827 }
 0x240   : > { %v5939_v8 = vpop.permute.xlu0 %1956  ;;  %2369 = vrot.lane.b32.xlu1 %v5952_v54, %s4690_s12 }
 0x242   : > { %2279 = vrot.lane.b32.xlu0 %v5799_v23, %s4685_s27  ;;  %v5959_v27 = vpop.permute.xlu1 %2269 }
 0x244   : > { %v2352_v51 = vpop.permute.xlu0 %2351  ;;  %1839 = vrot.lane.b32.xlu1 %v5849_v52, %s4684_s22  ;;  %v4648_v52 = vld [vmem:[#allocation2 + $0x60] sm:$0xff]  }
 0x245   : > { %v2492_v33 = vsel %vm2466_vm8, %v4648_v52, %v5727_v2  ;;  %v1747_v52 = vshrl.u32 %v5911_v56, 16 }
 0x246   : > { %2367 = vrot.lane.b32.xlu0 %v5962_v58, %s4690_s12  ;;  %v5977_v6 = vpop.permute.xlu1 %2036  ;;  %v2557_v37 = vsel %vm2531_vm9, %v2492_v33, %v5658_v47 }
 0x247   : > { %v2622_v60 = vsel %vm2596_vm10, %v2557_v37, %v5827_v30  ;;  %v2559_v30 = vsel %vm2531_vm9, %v2494_v26, %v5846_v16  ;;  %v1749_v37 = vor.u32 %v1747_v52, %v5931_v1 }
 0x248   : > { %v5973_v14 = vpop.permute.xlu0 %2118  ;;  %1841 = vrot.lane.b32.xlu1 %v5838_v15, %s4684_s22  ;;  %v2944_v15 = vsel %vm2920_vm14, %v2879_v63, %v5844_v9  ;;  %v6024_v9 = vld [vmem:[#allocation2 + $0xd8] sm:$0xff]  }
 0x24a   : > { %2442 = vrot.lane.b32.xlu0 %v5982_v55, %s4688_s30  ;;  %v1824_v32 = vpop.permute.xlu1 %1823 }
 0x24c   : > { %v2348_v41 = vpop.permute.xlu0 %2347  ;;  %1974 = vrot.lane.b32.xlu1 %v5884_v10, %s4683_s21 }
 0x24d   : > { %v2877_v0 = vsel %vm2855_vm12, %v2812_v20, %v2348_v41  ;;  %v2563_v20 = vsel %vm2531_vm9, %v2498_v39, %v5819_v5 }
 0x24e   : > { %2444 = vrot.lane.b32.xlu0 %v6001_v4, %s4688_s30  ;;  %v2942_v2 = vsel %vm2920_vm14, %v2877_v0, %v2423_v31  ;;  %v6019_v31 = vpop.permute.xlu1 %2199 }
 0x24f   : > { %4462 = vmatprep.mubr.msk.bf16.mxu1 %vm3005_vm15, %v2942_v2 }
 0x250   : > { %v2115_v38 = vpop.permute.xlu0 %2114  ;;  %4463 = vmatmul.mubr.msk.bf16.gmra.mxu1 %vm3005_vm15, %v2944_v15  ;;  %2048 = vrot.lane.b32.xlu1 %v5898_v7, %s4686_s28 }
 0x251   : > { %v2686_v47 = vsel %vm481_vm0, %v2622_v60, %v2115_v38 }
 0x252   : > { %v2751_v11 = vsel %vm2725_vm11, %v2686_v47, %v2190_v24  ;;  %1972 = vrot.lane.b32.xlu0 %v5868_v48, %s4683_s21  ;;  %v2196_v44 = vpop.permute.xlu1 %2195  ;;  %v2624_v48 = vsel %vm2596_vm10, %v2559_v30, %v5766_v42 }
 0x253   : > { %v2816_v10 = vsel %vm2790_vm13, %v2751_v11, %v5743_v19  ;;  %v1751_v19 = vshll.u32 %v6024_v9, 16 }
 0x254   : > { %v2268_v29 = vpop.permute.xlu0 %2267  ;;  %v2881_v61 = vsel %vm2855_vm12, %v2816_v10, %v2352_v51  ;;  %2136 = vrot.lane.b32.xlu1 %v5952_v54, %s4689_s11  ;;  %v6045_v51 = vld [vmem:[#allocation2 + $0xe0] sm:$0xff]  }
 0x255   : > { %v2946_v24 = vsel %vm2920_vm14, %v2881_v61, %v5863_v45  ;;  %v2688_v45 = vsel %vm481_vm0, %v2624_v48, %v5916_v3  ;;  %v1753_v42 = vrot.slane %v1751_v19, 1  ;;  %v1759_v3 = vshll.u32 %v6045_v51, 16  ;;  %v4650_v48 = vld [vmem:[#allocation2 + $0x80] sm:$0xff]  }
 0x256   : > { %4466 = vmatprep.mubr.msk.bf16.mxu1 %vm3005_vm15, %v2946_v24  ;;  %2046 = vrot.lane.b32.xlu0 %v5799_v23, %s4686_s28  ;;  %v6049_v22 = vpop.permute.xlu1 %1962  ;;  %v1755_v23 = vshrl.u32 %v6024_v9, 16  ;;  %v2753_v21 = vsel %vm2725_vm11, %v2688_v45, %v5802_v28  ;;  %v2496_v28 = vsel %vm2466_vm8, %v5395_v46, %v1824_v32  ;;  %v2628_v46 = vsel %vm2596_vm10, %v2563_v20, %v5652_v36  ;;  %v4651_v45 = vld [vmem:[#allocation2 + $0x88] sm:$0xff]  }
 0x257   : > { %v2818_v63 = vsel %vm2790_vm13, %v2753_v21, %v5638_v12  ;;  %v6074_v41 = vrot.slane %v1759_v3, 1  ;;  %v2561_v5 = vsel %vm2531_vm9, %v2496_v28, %v5939_v8  ;;  %v6095_v60 = vsel %vm1534_vm3, %v1749_v37, %v1753_v42 }
 0x258   : > { %v6043_v16 = vpop.permute.xlu0 %2034  ;;  %2211 = vrot.lane.b32.xlu1 %v6001_v4, %s4687_s29  ;;  %v1757_v33 = vor.u32 %v1755_v23, %v1753_v42  ;;  %v2626_v8 = vsel %vm2596_vm10, %v2561_v5, %v5762_v59  ;;  %v1916_v36 = vrot.slane %v6024_v9, 1  ;;  %v1918_v30 = vrot.slane %v6045_v51, 1  ;;  %v6140_v23 = vld [vmem:[#allocation2 + $0xe8] sm:$0xff]  }
 0x259   : > { %v2690_v26 = vsel %vm481_vm0, %v2626_v8, %v5973_v14  ;;  %v2500_v19 = vsel %vm2466_vm8, %v4650_v48, %v5941_v35 }
 0x25a   : > { %2134 = vrot.lane.b32.xlu0 %v5962_v58, %s4689_s11  ;;  %v2354_v53 = vpop.permute.xlu1 %2353  ;;  %v6087_v12 = vsel %vm1534_vm3, %v1757_v33, %v6074_v41  ;;  %v6110_v11 = vsel %vm1862_vm2, %v1914_v50, %v1916_v36  ;;  %v6125_v24 = vsel %vm1862_vm2, %v1916_v36, %v1918_v30  ;;  %v2565_v21 = vsel %vm2531_vm9, %v2500_v19, %v5892_v18 }
 0x25b   : > { %v2883_v62 = vsel %vm2855_vm12, %v2818_v63, %v2354_v53  ;;  %v2630_v35 = vsel %vm2596_vm10, %v2565_v21, %v6043_v16  ;;  %v6157_v53 = vld [vmem:[#allocation2 + $0xf0] sm:$0xff]   ;;  %v1767_v18 = vshll.u32 %v6140_v23, 16  ;;  %v6172_v63 = vld [vmem:[%s6795_s6] ss:$0 sm:$0xff] }
 0x25c   : > { %v2433_v49 = vpop.permute.xlu0 %2432  ;;  %2285 = vrot.lane.b32.xlu1 %v6024_v9, %s4685_s27  ;;  %v1922_v21 = vrot.slane %v6157_v53, 1 }
 0x25e   : > { %2209 = vrot.lane.b32.xlu0 %v5982_v55, %s4687_s29  ;;  %v2121_v2 = vpop.permute.xlu1 %2120 }
 0x25f   : > { %v2692_v32 = vsel %vm481_vm0, %v2628_v46, %v2121_v2 }
 0x260   : > { %v2429_v13 = vpop.permute.xlu0 %2428  ;;  %2373 = vrot.lane.b32.xlu1 %v6087_v12, %s4690_s12  ;;  %v2757_v25 = vsel %vm2725_vm11, %v2692_v32, %v2196_v44 }
 0x261   : > { %v2948_v0 = vsel %vm2920_vm14, %v2883_v62, %v2429_v13  ;;  %v2822_v59 = vsel %vm2790_vm13, %v2757_v25, %v5959_v27  ;;  %v1769_v13 = vrot.slane %v1767_v18, 1  ;;  %v1763_v25 = vshrl.u32 %v6045_v51, 16 }
 0x262   : > { %4467 = vmatmul.mubr.msk.bf16.gmra.mxu1 %vm3005_vm15, %v2948_v0  ;;  %2283 = vrot.lane.b32.xlu0 %v5911_v56, %s4685_s27  ;;  %v2358_v15 = vpop.permute.xlu1 %2357  ;;  %v1775_v0 = vshll.u32 %v6157_v53, 16 }
 0x263   : > { %v2887_v27 = vsel %vm2855_vm12, %v2822_v59, %v2358_v15 }
 0x264   : > { %v2431_v1 = vpop.permute.xlu0 %2430  ;;  %1843 = vrot.lane.b32.xlu1 %v5962_v58, %s4684_s22  ;;  %v2755_v58 = vsel %vm2725_vm11, %v2690_v26, %v5877_v43  ;;  %v6192_v59 = vrot.slane %v1775_v0, 1 }
 0x265   : > { %v2820_v14 = vsel %vm2790_vm13, %v2755_v58, %v2268_v29 }
 0x266   : > { %2371 = vrot.lane.b32.xlu0 %v6095_v60, %s4690_s12  ;;  %v1830_v47 = vpop.permute.xlu1 %1829 }
 0x267   : > { %v2502_v42 = vsel %vm2466_vm8, %v4651_v45, %v1830_v47 }
 0x268   : > { %v2198_v38 = vpop.permute.xlu0 %2197  ;;  %1845 = vrot.lane.b32.xlu1 %v5952_v54, %s4684_s22  ;;  %v2952_v54 = vsel %vm2920_vm14, %v2887_v27, %v2433_v49  ;;  %v2567_v39 = vsel %vm2531_vm9, %v2502_v42, %v6049_v22 }
 0x269   : > { %v2632_v16 = vsel %vm2596_vm10, %v2567_v39, %v5977_v6  ;;  %v1771_v6 = vshrl.u32 %v6140_v23, 16 }
 0x26a   : > { %2446 = vrot.lane.b32.xlu0 %v6110_v11, %s4688_s30  ;;  %v2125_v50 = vpop.permute.xlu1 %2124 }
 0x26b   : > { %v2696_v2 = vsel %vm481_vm0, %v2632_v16, %v2125_v50 }
 0x26c   : > { %v2356_v10 = vpop.permute.xlu0 %2355  ;;  %1978 = vrot.lane.b32.xlu1 %v6001_v4, %s4683_s21  ;;  %v2761_v26 = vsel %vm2725_vm11, %v2696_v2, %v6019_v31 }
 0x26d   : > { %v2885_v61 = vsel %vm2855_vm12, %v2820_v14, %v2356_v10 }
 0x26e   : > { %2448 = vrot.lane.b32.xlu0 %v6125_v24, %s4688_s30  ;;  %v2950_v43 = vsel %vm2920_vm14, %v2885_v61, %v2431_v1  ;;  %v2274_v44 = vpop.permute.xlu1 %2273 }
 0x26f   : > { %4470 = vmatprep.mubr.msk.bf16.mxu1 %vm3005_vm15, %v2950_v43  ;;  %v2826_v47 = vsel %vm2790_vm13, %v2761_v26, %v2274_v44  ;;  %v1765_v43 = vor.u32 %v1763_v25, %v6074_v41  ;;  %v1920_v41 = vrot.slane %v6140_v23, 1  ;;  %v1779_v26 = vshrl.u32 %v6157_v53, 16 }
 0x270   : > { %v2123_v29 = vpop.permute.xlu0 %2122  ;;  %4471 = vmatmul.mubr.msk.bf16.gmra.mxu1 %vm3005_vm15, %v2952_v54  ;;  %2052 = vrot.lane.b32.xlu1 %v6024_v9, %s4686_s28 }
 0x271   : > { %v2694_v52 = vsel %vm481_vm0, %v2630_v35, %v2123_v29  ;;  %v6212_v19 = vsel %vm1534_vm3, %v1765_v43, %v1769_v13 }
 0x272   : > { %1976 = vrot.lane.b32.xlu0 %v5982_v55, %s4683_s21  ;;  %v2362_v49 = vpop.permute.xlu1 %2361  ;;  %v6155_v55 = vld [vmem:[%s6794_s5] ss:$0 sm:$0xff]  ;;  %v2759_v28 = vsel %vm2725_vm11, %v2694_v52, %v2198_v38  ;;  %v1773_v38 = vor.u32 %v1771_v6, %v1769_v13 }
 0x273   : > { %v2891_v14 = vsel %vm2855_vm12, %v2826_v47, %v2362_v49 }
 0x274   : > { %v2272_v4 = vpop.permute.xlu0 %2271  ;;  %2140 = vrot.lane.b32.xlu1 %v6087_v12, %s4689_s11  ;;  %v6206_v54 = vsel %vm1534_vm3, %v1773_v38, %v6192_v59 }
 0x275   : > { %v2824_v37 = vsel %vm2790_vm13, %v2759_v28, %v2272_v4  ;;  %v6222_v4 = vsel %vm1862_vm2, %v1918_v30, %v1920_v41 }
 0x276   : > { %v4444_v3 = vpop.f32.mrf.mxu1  ;;  %2050 = vrot.lane.b32.xlu0 %v5911_v56, %s4686_s28  ;;  %v6166_v20 = vpop.permute.xlu1 %1831 }
 0x277   : > { %v6240_v3 = vld [vmem:[#allocation2 + $0xf8] sm:$0xff]   ;;  %v2504_v52 = vsel %vm2466_vm8, %v5588_v40, %v6166_v20 }
 0x278   : > { %v3108_v22 = vpop.f32.mrf.mxu1  ;;  %v2360_v33 = vpop.permute.xlu0 %2359  ;;  %2215 = vrot.lane.b32.xlu1 %v6125_v24, %s4687_s29  ;;  %v1787_v0 = vshrl.u32 %v6240_v3, 16 }
 0x279   : > { %v3338_v56 = vmul.f32 %v6155_v55, %v3108_v22  ;;  %v2889_v5 = vsel %vm2855_vm12, %v2824_v37, %v2360_v33 }
 0x27a   : > { %v4445_v62 = vpop.f32.mrf.mxu1  ;;  %2138 = vrot.lane.b32.xlu0 %v6095_v60, %s4689_s11  ;;  %v1834_v36 = vpop.permute.xlu1 %1833 }
 0x27b   : > { %v3377_v1 = vadd.f32 %v6172_v63, %v3338_v56  ;;  %v6254_v56 = vld [vmem:[#allocation2 + $0x100] sm:$0xff]   ;;  %v2506_v40 = vsel %vm2466_vm8, %v5546_v17, %v1834_v36 }
 0x27c   : > { %v3111_v46 = vpop.f32.mrf.mxu1  ;;  %v2435_v32 = vpop.permute.xlu0 %2434  ;;  %2289 = vrot.lane.b32.xlu1 %v6140_v23, %s4685_s27 }
 0x27d   : > { %v3339_v8 = vmul.f32 %v6155_v55, %v3111_v46  ;;  %v2954_v15 = vsel %vm2920_vm14, %v2889_v5, %v2435_v32  ;;  %v3409_v10 = vmax.f32 %v3377_v1, 0.0 }
 0x27e   : > { %4474 = vmatprep.mubr.msk.bf16.mxu1 %vm3005_vm15, %v2954_v15  ;;  %2213 = vrot.lane.b32.xlu0 %v6110_v11, %s4687_s29  ;;  %v1967_v50 = vpop.permute.xlu1 %1966 }
 0x27f   : > { %v3378_v58 = vadd.f32 %v6172_v63, %v3339_v8  ;;  %v2571_v2 = vsel %vm2531_vm9, %v2506_v40, %v1967_v50  ;;  %v2070_v8 = vshll.u32 %v6254_v56, 16 }
 0x280   : > { %v2437_v27 = vpop.permute.xlu0 %2436  ;;  %2377 = vrot.lane.b32.xlu1 %v6206_v54, %s4690_s12 }
 0x281   : > { %v3410_v31 = vmax.f32 %v3378_v58, 0.0  ;;  %v2956_v61 = vsel %vm2920_vm14, %v2891_v14, %v2437_v27  ;;  %v6290_v50 = vrot.slane %v2070_v8, 1 }
 0x282   : > { %4475 = vmatmul.mubr.msk.bf16.gmra.mxu1 %vm3005_vm15, %v2956_v61  ;;  %2287 = vrot.lane.b32.xlu0 %v6045_v51, %s4685_s27  ;;  %v2041_v48 = vpop.permute.xlu1 %2040 }
 0x283   : > { %v3441_v29 = vpack.c.bf16 %v3410_v31, %v3409_v10  ;;  %v2636_v17 = vsel %vm2596_vm10, %v2571_v2, %v2041_v48  ;;  %v1781_v48 = vor.u32 %v1779_v26, %v6192_v59  ;;  %v6306_v59 = vrot.slane %v6240_v3, 1 }
 0x284   : > { %v1965_v44 = vpop.permute.xlu0 %1964  ;;  %1847 = vrot.lane.b32.xlu1 %v6095_v60, %s4684_s22  ;;  %v6232_v60 = vsel %vm1862_vm2, %v1920_v41, %v1922_v21 }
 0x285   : > { %4508 = vmatprep.mubr.msk.bf16.mxu0 %vm2466_vm8, %v3441_v29  ;;  %v2569_v16 = vsel %vm2531_vm9, %v2504_v52, %v1965_v44  ;;  %v6317_v52 = vsel %vm1862_vm2, %v1922_v21, %v6306_v59 }
 0x286   : > { %2375 = vrot.lane.b32.xlu0 %v6212_v19, %s4690_s12  ;;  %v2129_v42 = vpop.permute.xlu1 %2128 }
 0x287   : > { %v2700_v15 = vsel %vm481_vm0, %v2636_v17, %v2129_v42 }
 0x288   : > { %v2039_v45 = vpop.permute.xlu0 %2038  ;;  %1849 = vrot.lane.b32.xlu1 %v6087_v12, %s4684_s22 }
 0x28a   : > { %2450 = vrot.lane.b32.xlu0 %v6222_v4, %s4688_s30  ;;  %v2204_v49 = vpop.permute.xlu1 %2203 }
 0x28b   : > { %v2765_v38 = vsel %vm2725_vm11, %v2700_v15, %v2204_v49 }
 0x28c   : > { %v2127_v39 = vpop.permute.xlu0 %2126  ;;  %1982 = vrot.lane.b32.xlu1 %v6125_v24, %s4683_s21  ;;  %v1783_v24 = vshll.u32 %v6240_v3, 16 }
 0x28e   : > { %2452 = vrot.lane.b32.xlu0 %v6232_v60, %s4688_s30  ;;  %v2278_v35 = vpop.permute.xlu1 %2277  ;;  %v1785_v6 = vrot.slane %v1783_v24, 1  ;;  %v2159_v24 = vrot.slane %v6254_v56, 1 }
 0x28f   : > { %v2830_v14 = vsel %vm2790_vm13, %v2765_v38, %v2278_v35 }
 0x290   : > { %v2202_v30 = vpop.permute.xlu0 %2201  ;;  %2056 = vrot.lane.b32.xlu1 %v6140_v23, %s4686_s28  ;;  %v6282_v58 = vor.u32 %v1787_v0, %v1785_v6  ;;  %v6303_v35 = vsel %vm1534_vm3, %v1781_v48, %v1785_v6 }
 0x292   : > { %1980 = vrot.lane.b32.xlu0 %v6110_v11, %s4683_s21  ;;  %v2366_v18 = vpop.permute.xlu1 %2365  ;;  %v2634_v11 = vsel %vm2596_vm10, %v2569_v16, %v2039_v45  ;;  %v2073_v41 = vsel %vm1534_vm3, %v6282_v58, %v6290_v50 }
 0x293   : > { %v2698_v28 = vsel %vm481_vm0, %v2634_v11, %v2127_v39  ;;  %v2895_v31 = vsel %vm2855_vm12, %v2830_v14, %v2366_v18 }
 0x294   : > { %v2276_v12 = vpop.permute.xlu0 %2275  ;;  %2144 = vrot.lane.b32.xlu1 %v6206_v54, %s4689_s11  ;;  %v2763_v20 = vsel %vm2725_vm11, %v2698_v28, %v2202_v30 }
 0x295   : > { %v2828_v37 = vsel %vm2790_vm13, %v2763_v20, %v2276_v12  ;;  %v4652_v20 = vld [vmem:[#allocation2 + $0xa0] sm:$0xff]  }
 0x296   : > { %2054 = vrot.lane.b32.xlu0 %v6045_v51, %s4686_s28  ;;  %v6257_v62 = vpop.permute.xlu1 %1835 }
 0x298   : > { %v4448_v22 = vpop.f32.mrf.mxu1  ;;  %v2364_v33 = vpop.permute.xlu0 %2363  ;;  %2219 = vrot.lane.b32.xlu1 %v6232_v60, %s4687_s29 }
 0x299   : > { %v2893_v46 = vsel %vm2855_vm12, %v2828_v37, %v2364_v33  ;;  %v6331_v33 = vld [vmem:[#allocation2 + $0x108] sm:$0xff]  }
 0x29a   : > { %v3122_v13 = vpop.f32.mrf.mxu1  ;;  %2142 = vrot.lane.b32.xlu0 %v6212_v19, %s4689_s11  ;;  %v6275_v25 = vpop.permute.xlu1 %1837  ;;  %v2078_v40 = vshll.u32 %v6331_v33, 16  ;;  %v2082_v15 = vshrl.u32 %v6331_v33, 16 }
 0x29b   : > { %v3340_v5 = vmul.f32 %v6155_v55, %v3122_v13  ;;  %v2508_v13 = vsel %vm2466_vm8, %v4652_v20, %v6257_v62 }
 0x29c   : > { %v4449_v32 = vpop.f32.mrf.mxu1  ;;  %v2439_v1 = vpop.permute.xlu0 %2438  ;;  %2293 = vrot.lane.b32.xlu1 %v6240_v3, %s4685_s27  ;;  %v2080_v62 = vrot.slane %v2078_v40, 1 }
 0x29d   : > { %v2958_v36 = vsel %vm2920_vm14, %v2893_v46, %v2439_v1  ;;  %v3379_v27 = vadd.f32 %v6172_v63, %v3340_v5  ;;  %v2510_v32 = vsel %vm2466_vm8, %v5667_v57, %v6275_v25 }
 0x29e   : > { %v3125_v47 = vpop.f32.mrf.mxu1  ;;  %4478 = vmatprep.mubr.msk.bf16.mxu1 %vm3005_vm15, %v2958_v36  ;;  %2217 = vrot.lane.b32.xlu0 %v6222_v4, %s4687_s29  ;;  %v1971_v44 = vpop.permute.xlu1 %1970  ;;  %v2084_v48 = vor.u32 %v2082_v15, %v2080_v62 }
 0x29f   : > { %v3341_v10 = vmul.f32 %v6155_v55, %v3125_v47  ;;  %v3411_v45 = vmax.f32 %v3379_v27, 0.0  ;;  %v2575_v26 = vsel %vm2531_vm9, %v2510_v32, %v1971_v44  ;;  %v2074_v27 = vshrl.u32 %v6254_v56, 16 }
 0x2a0   : > { %v2441_v61 = vpop.permute.xlu0 %2440  ;;  %2381 = vrot.lane.b32.xlu1 %v2073_v41, %s4690_s12 }
 0x2a1   : > { %v3380_v43 = vadd.f32 %v6172_v63, %v3341_v10  ;;  %v2960_v29 = vsel %vm2920_vm14, %v2895_v31, %v2441_v61 }
 0x2a2   : > { %4479 = vmatmul.mubr.msk.bf16.gmra.mxu1 %vm3005_vm15, %v2960_v29  ;;  %2291 = vrot.lane.b32.xlu0 %v6157_v53, %s4685_s27  ;;  %v2045_v30 = vpop.permute.xlu1 %2044 }
 0x2a3   : > { %v3412_v42 = vmax.f32 %v3380_v43, 0.0  ;;  %v2640_v47 = vsel %vm2596_vm10, %v2575_v26, %v2045_v30 }
 0x2a4   : > { %v1969_v39 = vpop.permute.xlu0 %1968  ;;  %1851 = vrot.lane.b32.xlu1 %v6212_v19, %s4684_s22  ;;  %v2160_v19 = vsel %vm1862_vm2, %v6306_v59, %v2159_v24 }
 0x2a5   : > { %v3442_v49 = vpack.c.bf16 %v3412_v42, %v3411_v45  ;;  %v2573_v0 = vsel %vm2531_vm9, %v2508_v13, %v1969_v39  ;;  %v4617_v45 = vld [vmem:[#allocation2 + $0x100] ss:$0 sps:$4 sm:$0x11]  }
 0x2a6   : > { %2379 = vrot.lane.b32.xlu0 %v6303_v35, %s4690_s12  ;;  %v2133_v18 = vpop.permute.xlu1 %2132 }
 0x2a7   : > { %4509 = vmatmul.mubr.msk.bf16.vlgmr.msra.gmra.mxu0 %vm2466_vm8, %v3442_v49  ;;  %v2704_v10 = vsel %vm481_vm0, %v2640_v47, %v2133_v18 }
 0x2a8   : > { %v2043_v12 = vpop.permute.xlu0 %2042  ;;  %1853 = vrot.lane.b32.xlu1 %v6206_v54, %s4684_s22 }
 0x2aa   : > { %2454 = vrot.lane.b32.xlu0 %v6317_v52, %s4688_s30  ;;  %v2208_v11 = vpop.permute.xlu1 %2207 }
 0x2ab   : > { %v2769_v44 = vsel %vm2725_vm11, %v2704_v10, %v2208_v11 }
 0x2ac   : > { %v2131_v16 = vpop.permute.xlu0 %2130  ;;  %1986 = vrot.lane.b32.xlu1 %v6232_v60, %s4683_s21  ;;  %v6342_v60 = vld [vmem:[#allocation2 + $0x110] sm:$0xff]  }
 0x2ad   : > { %v2307_v36 = vshll.u32 %v6342_v60, 16 }
 0x2ae   : > { %2456 = vrot.lane.b32.xlu0 %v2160_v19, %s4688_s30  ;;  %v2282_v22 = vpop.permute.xlu1 %2281 }
 0x2af   : > { %v2834_v42 = vsel %vm2790_vm13, %v2769_v44, %v2282_v22  ;;  %v1791_v22 = vshll.u32 %v4617_v45, 16 }
 0x2b0   : > { %v2206_v21 = vpop.permute.xlu0 %2205  ;;  %2060 = vrot.lane.b32.xlu1 %v6240_v3, %s4686_s28 }
 0x2b1   : > { %v1793_v13 = vrot.slane %v1791_v22, 1 }
 0x2b2   : > { %1984 = vrot.lane.b32.xlu0 %v6222_v4, %s4683_s21  ;;  %v2370_v28 = vpop.permute.xlu1 %2369  ;;  %v2638_v4 = vsel %vm2596_vm10, %v2573_v0, %v2043_v12 }
 0x2b3   : > { %v2702_v5 = vsel %vm481_vm0, %v2638_v4, %v2131_v16  ;;  %v2899_v49 = vsel %vm2855_vm12, %v2834_v42, %v2370_v28 }
 0x2b4   : > { %v2280_v54 = vpop.permute.xlu0 %2279  ;;  %2148 = vrot.lane.b32.xlu1 %v2073_v41, %s4689_s11  ;;  %v2767_v1 = vsel %vm2725_vm11, %v2702_v5, %v2206_v21  ;;  %v6375_v41 = vrot.slane %v2307_v36, 1  ;;  %v1926_v5 = vrot.slane %v4617_v45, 1 }
 0x2b5   : > { %v2832_v38 = vsel %vm2790_vm13, %v2767_v1, %v2280_v54 }
 0x2b6   : > { %v4452_v6 = vpop.f32.mrf.mxu1  ;;  %2058 = vrot.lane.b32.xlu0 %v6157_v53, %s4686_s28  ;;  %v6349_v46 = vpop.permute.xlu1 %1839  ;;  %v2310_v21 = vsel %vm1534_vm3, %v2084_v48, %v6375_v41 }
 0x2b8   : > { %v3136_v2 = vpop.f32.mrf.mxu1  ;;  %v2368_v37 = vpop.permute.xlu0 %2367  ;;  %2223 = vrot.lane.b32.xlu1 %v2160_v19, %s4687_s29  ;;  %v2076_v19 = vor.u32 %v2074_v27, %v6290_v50  ;;  %v2161_v50 = vrot.slane %v6331_v33, 1 }
 0x2b9   : > { %v3342_v17 = vmul.f32 %v6155_v55, %v3136_v2  ;;  %v2897_v57 = vsel %vm2855_vm12, %v2832_v38, %v2368_v37  ;;  %v2396_v2 = vrot.slane %v6342_v60, 1  ;;  %v1794_v37 = vsel %vm1534_vm3, %v6282_v58, %v1793_v13  ;;  %v6413_v58 = vld [vmem:[#allocation2 + $0x118] sm:$0xff]   ;;  %v6419_v38 = vld [vmem:[#allocation2 + $0x120] ss:$0 sps:$4 sm:$0x11]  }
 0x2ba   : > { %v4453_v8 = vpop.f32.mrf.mxu1  ;;  %2146 = vrot.lane.b32.xlu0 %v6303_v35, %s4689_s11  ;;  %v6369_v29 = vpop.permute.xlu1 %1841  ;;  %v2081_v20 = vsel %vm1534_vm3, %v2076_v19, %v2080_v62  ;;  %v2162_v4 = vsel %vm1862_vm2, %v2159_v24, %v2161_v50  ;;  %v1927_v24 = vsel %vm1862_vm2, %v6306_v59, %v1926_v5  ;;  %v2315_v47 = vshll.u32 %v6413_v58, 16 }
 0x2bb   : > { %v3381_v31 = vadd.f32 %v6172_v63, %v3342_v17  ;;  %v4618_v17 = vld [vmem:[#allocation2 + $0x110] ss:$0 sps:$4 sm:$0x11]   ;;  %v2323_v44 = vshll.u32 %v6419_v38, 16 }
 0x2bc   : > { %v3139_v25 = vpop.f32.mrf.mxu1  ;;  %v2443_v14 = vpop.permute.xlu0 %2442  ;;  %2297 = vrot.lane.b32.xlu1 %v6331_v33, %s4685_s27  ;;  %v2086_v1 = vshll.u32 %v4618_v17, 16 }
 0x2bd   : > { %v3343_v61 = vmul.f32 %v6155_v55, %v3139_v25  ;;  %v2962_v43 = vsel %vm2920_vm14, %v2897_v57, %v2443_v14  ;;  %v3413_v12 = vmax.f32 %v3381_v31, 0.0  ;;  %v4653_v57 = vld [vmem:[#allocation2 + $0xb0] sm:$0xff]   ;;  %v2325_v22 = vrot.slane %v2323_v44, 1 }
 0x2be   : > { %4482 = vmatprep.mubr.msk.bf16.mxu1 %vm3005_vm15, %v2962_v43  ;;  %2221 = vrot.lane.b32.xlu0 %v6317_v52, %s4687_s29  ;;  %v6383_v11 = vpop.permute.xlu1 %1974  ;;  %v2088_v36 = vrot.slane %v2086_v1, 1  ;;  %v2512_v25 = vsel %vm2466_vm8, %v4653_v57, %v6349_v46  ;;  %v2319_v43 = vshrl.u32 %v6413_v58, 16 }
 0x2bf   : > { %v3382_v39 = vadd.f32 %v6172_v63, %v3343_v61  ;;  %v2317_v61 = vrot.slane %v2315_v47, 1 }
 0x2c0   : > { %v2445_v30 = vpop.permute.xlu0 %2444  ;;  %2385 = vrot.lane.b32.xlu1 %v2310_v21, %s4690_s12  ;;  %v2089_v14 = vsel %vm1534_vm3, %v2084_v48, %v2088_v36 }
 0x2c1   : > { %v3414_v18 = vmax.f32 %v3382_v39, 0.0  ;;  %v2964_v16 = vsel %vm2920_vm14, %v2899_v49, %v2445_v30  ;;  %v2321_v21 = vor.u32 %v2319_v43, %v2317_v61 }
 0x2c2   : > { %4483 = vmatmul.mubr.msk.bf16.gmra.mxu1 %vm3005_vm15, %v2964_v16  ;;  %2295 = vrot.lane.b32.xlu0 %v6254_v56, %s4685_s27  ;;  %v2049_v40 = vpop.permute.xlu1 %2048 }
 0x2c3   : > { %v3443_v54 = vpack.c.bf16 %v3414_v18, %v3413_v12  ;;  %v2311_v18 = vshrl.u32 %v6342_v60, 16 }
 0x2c4   : > { %v1973_v28 = vpop.permute.xlu0 %1972  ;;  %1855 = vrot.lane.b32.xlu1 %v6303_v35, %s4684_s22  ;;  %v2397_v35 = vsel %vm1862_vm2, %v2161_v50, %v2396_v2 }
 0x2c5   : > { %4512 = vmatprep.mubr.msk.bf16.mxu0 %vm2466_vm8, %v3443_v54  ;;  %v2577_v27 = vsel %vm2531_vm9, %v2512_v25, %v1973_v28 }
 0x2c6   : > { %2383 = vrot.lane.b32.xlu0 %v2081_v20, %s4690_s12  ;;  %v2137_v0 = vpop.permute.xlu1 %2136 }
 0x2c8   : > { %v2047_v6 = vpop.permute.xlu0 %2046  ;;  %1857 = vrot.lane.b32.xlu1 %v1794_v37, %s4684_s22 }
 0x2ca   : > { %2458 = vrot.lane.b32.xlu0 %v2162_v4, %s4688_s30  ;;  %v2212_v32 = vpop.permute.xlu1 %2211 }
 0x2cc   : > { %v2135_v62 = vpop.permute.xlu0 %2134  ;;  %1990 = vrot.lane.b32.xlu1 %v1927_v24, %s4683_s21 }
 0x2ce   : > { %2460 = vrot.lane.b32.xlu0 %v2397_v35, %s4688_s30  ;;  %v2286_v15 = vpop.permute.xlu1 %2285 }
 0x2d0   : > { %v2210_v8 = vpop.permute.xlu0 %2209  ;;  %2064 = vrot.lane.b32.xlu1 %v6331_v33, %s4686_s28  ;;  %v2642_v33 = vsel %vm2596_vm10, %v2577_v27, %v2047_v6 }
 0x2d1   : > { %v2706_v46 = vsel %vm481_vm0, %v2642_v33, %v2135_v62  ;;  %v2398_v62 = vrot.slane %v6413_v58, 1 }
 0x2d2   : > { %1988 = vrot.lane.b32.xlu0 %v6317_v52, %s4683_s21  ;;  %v2374_v59 = vpop.permute.xlu1 %2373  ;;  %v2163_v52 = vrot.slane %v4618_v17, 1  ;;  %v2771_v48 = vsel %vm2725_vm11, %v2706_v46, %v2210_v8  ;;  %v2326_v17 = vsel %vm1534_vm3, %v2321_v21, %v2325_v22 }
 0x2d4   : > { %v2284_v26 = vpop.permute.xlu0 %2283  ;;  %2152 = vrot.lane.b32.xlu1 %v2089_v14, %s4689_s11  ;;  %v2164_v39 = vsel %vm1862_vm2, %v2161_v50, %v2163_v52 }
 0x2d5   : > { %v2836_v30 = vsel %vm2790_vm13, %v2771_v48, %v2284_v26 }
 0x2d6   : > { %2062 = vrot.lane.b32.xlu0 %v6254_v56, %s4686_s28  ;;  %v1844_v45 = vpop.permute.xlu1 %1843  ;;  %v2514_v56 = vsel %vm2466_vm8, %v5770_v34, %v6369_v29 }
 0x2d7   : > { %v2579_v49 = vsel %vm2531_vm9, %v2514_v56, %v6383_v11 }
 0x2d8   : > { %v4456_v10 = vpop.f32.mrf.mxu1  ;;  %v2372_v31 = vpop.permute.xlu0 %2371  ;;  %2227 = vrot.lane.b32.xlu1 %v2164_v39, %s4687_s29  ;;  %v2644_v34 = vsel %vm2596_vm10, %v2579_v49, %v2049_v40 }
 0x2d9   : > { %v2901_v29 = vsel %vm2855_vm12, %v2836_v30, %v2372_v31  ;;  %v2708_v54 = vsel %vm481_vm0, %v2644_v34, %v2137_v0  ;;  %v2313_v0 = vor.u32 %v2311_v18, %v6375_v41  ;;  %v4654_v10 = vld [vmem:[#allocation2 + $0xc0] sm:$0xff]  }
 0x2da   : > { %v3150_v42 = vpop.f32.mrf.mxu1  ;;  %2150 = vrot.lane.b32.xlu0 %v2081_v20, %s4689_s11  ;;  %v1846_v28 = vpop.permute.xlu1 %1845  ;;  %v2773_v20 = vsel %vm2725_vm11, %v2708_v54, %v2212_v32  ;;  %v2516_v31 = vsel %vm2466_vm8, %v4654_v10, %v1844_v45  ;;  %s6608_s11 = scalar_lea.vmem %s6799_s10, %s4299_s17 }
 0x2db   : > { %v3344_v12 = vmul.f32 %v6155_v55, %v3150_v42  ;;  %v2838_v40 = vsel %vm2790_vm13, %v2773_v20, %v2286_v15  ;;  %v2318_v8 = vsel %vm1534_vm3, %v2313_v0, %v2317_v61  ;;  %v2518_v42 = vsel %vm2466_vm8, %v5898_v7, %v1846_v28 }
 0x2dc   : > { %v4457_v16 = vpop.f32.mrf.mxu1  ;;  %v2447_v19 = vpop.permute.xlu0 %2446  ;;  %2301 = vrot.lane.b32.xlu1 %v6413_v58, %s4685_s27  ;;  %v2903_v37 = vsel %vm2855_vm12, %v2838_v40, %v2374_v59 }
 0x2dd   : > { %v2966_v11 = vsel %vm2920_vm14, %v2901_v29, %v2447_v19  ;;  %v3383_v13 = vadd.f32 %v6172_v63, %v3344_v12 }
 0x2de   : > { %v3153_v50 = vpop.f32.mrf.mxu1  ;;  %4486 = vmatprep.mubr.msk.bf16.mxu1 %vm3005_vm15, %v2966_v11  ;;  %2225 = vrot.lane.b32.xlu0 %v2162_v4, %s4687_s29  ;;  %v2400_v4 = vrot.slane %v6419_v38, 1  ;;  %v1979_v24 = vpop.permute.xlu1 %1978  ;;  %v2399_v38 = vsel %vm1862_vm2, %v2396_v2, %v2398_v62 }
 0x2df   : > { %v3345_v6 = vmul.f32 %v6155_v55, %v3153_v50  ;;  %v3415_v41 = vmax.f32 %v3383_v13, 0.0  ;;  %v2583_v45 = vsel %vm2531_vm9, %v2518_v42, %v1979_v24 }
 0x2e0   : > { %v2449_v5 = vpop.permute.xlu0 %2448  ;;  %2389 = vrot.lane.b32.xlu1 %v2326_v17, %s4690_s12  ;;  %v2401_v58 = vsel %vm1862_vm2, %v2398_v62, %v2400_v4 }
 0x2e1   : > { %v3384_v32 = vadd.f32 %v6172_v63, %v3345_v6  ;;  %v2968_v35 = vsel %vm2920_vm14, %v2903_v37, %v2449_v5 }
 0x2e2   : > { %4487 = vmatmul.mubr.msk.bf16.gmra.mxu1 %vm3005_vm15, %v2968_v35  ;;  %2299 = vrot.lane.b32.xlu0 %v6342_v60, %s4685_s27  ;;  %v2053_v26 = vpop.permute.xlu1 %2052 }
 0x2e3   : > { %v3416_v1 = vmax.f32 %v3384_v32, 0.0  ;;  %v2648_v12 = vsel %vm2596_vm10, %v2583_v45, %v2053_v26 }
 0x2e4   : > { %v1977_v15 = vpop.permute.xlu0 %1976  ;;  %2464 = vrot.lane.b32.xlu1 %v2401_v58, %s4688_s30 }
 0x2e5   : > { %v3444_v36 = vpack.c.bf16 %v3416_v1, %v3415_v41  ;;  %v2581_v43 = vsel %vm2531_vm9, %v2516_v31, %v1977_v15 }
 0x2e6   : > { %2387 = vrot.lane.b32.xlu0 %v2318_v8, %s4690_s12  ;;  %v2141_v59 = vpop.permute.xlu1 %2140 }
 0x2e7   : > { %4513 = vmatmul.mubr.msk.bf16.gmra.mxu0 %vm2466_vm8, %v3444_v36  ;;  %v2712_v16 = vsel %vm481_vm0, %v2648_v12, %v2141_v59 }
 0x2e8   : > { %v2051_v47 = vpop.permute.xlu0 %2050 }
 0x2e9   : > { %v2646_v60 = vsel %vm2596_vm10, %v2581_v43, %v2051_v47 }
 0x2ea   : > { %2462 = vrot.lane.b32.xlu0 %v2399_v38, %s4688_s30  ;;  %v2216_v25 = vpop.permute.xlu1 %2215  ;;  %v4655_v38 = vld [vmem:[#allocation2 + $0xd0] sm:$0xff]  }
 0x2eb   : > { %v2777_v54 = vsel %vm2725_vm11, %v2712_v16, %v2216_v25 }
 0x2ec   : > { %v2139_v57 = vpop.permute.xlu0 %2138 }
 0x2ed   : > { %v2710_v46 = vsel %vm481_vm0, %v2646_v60, %v2139_v57 }
 0x2ee   : > { %v2290_v52 = vpop.permute.xlu1 %2289 }
 0x2ef   : > { %v2842_v11 = vsel %vm2790_vm13, %v2777_v54, %v2290_v52 }
 0x2f0   : > { %v2214_v14 = vpop.permute.xlu0 %2213 }
 0x2f1   : > { %v2775_v39 = vsel %vm2725_vm11, %v2710_v46, %v2214_v14 }
 0x2f2   : > { %v2378_v33 = vpop.permute.xlu1 %2377 }
 0x2f3   : > { %v2907_v20 = vsel %vm2855_vm12, %v2842_v11, %v2378_v33 }
 0x2f4   : > { %v2288_v27 = vpop.permute.xlu0 %2287 }
 0x2f5   : > { %v2840_v30 = vsel %vm2790_vm13, %v2775_v39, %v2288_v27 }
 0x2f6   : > { %v4460_v61 = vpop.f32.mrf.mxu1  ;;  %v1848_v48 = vpop.permute.xlu1 %1847 }
 0x2f7   : > { %v2520_v47 = vsel %vm2466_vm8, %v4655_v38, %v1848_v48 }
 0x2f8   : > { %v3164_v44 = vpop.f32.mrf.mxu1  ;;  %v2376_v2 = vpop.permute.xlu0 %2375 }
 0x2f9   : > { %v3346_v56 = vmul.f32 %v6155_v55, %v3164_v44  ;;  %v2905_v18 = vsel %vm2855_vm12, %v2840_v30, %v2376_v2 }
 0x2fa   : > { %v4461_v49 = vpop.f32.mrf.mxu1  ;;  %v1850_v22 = vpop.permute.xlu1 %1849 }
 0x2fb   : > { %v3385_v19 = vadd.f32 %v6172_v63, %v3346_v56  ;;  %v2522_v61 = vsel %vm2466_vm8, %v6024_v9, %v1850_v22 }
 0x2fc   : > { %v3167_v34 = vpop.f32.mrf.mxu1  ;;  %v2451_v29 = vpop.permute.xlu0 %2450 }
 0x2fd   : > { %v3347_v21 = vmul.f32 %v6155_v55, %v3167_v34  ;;  %v2970_v7 = vsel %vm2920_vm14, %v2905_v18, %v2451_v29  ;;  %v3417_v40 = vmax.f32 %v3385_v19, 0.0 }
 0x2fe   : > { %4490 = vmatprep.mubr.msk.bf16.mxu1 %vm3005_vm15, %v2970_v7  ;;  %v1983_v0 = vpop.permute.xlu1 %1982 }
 0x2ff   : > { %v3386_v28 = vadd.f32 %v6172_v63, %v3347_v21  ;;  %v2587_v60 = vsel %vm2531_vm9, %v2522_v61, %v1983_v0 }
 0x300   : > { %v2453_v50 = vpop.permute.xlu0 %2452 }
 0x301   : > { %v3418_v13 = vmax.f32 %v3386_v28, 0.0  ;;  %v2972_v6 = vsel %vm2920_vm14, %v2907_v20, %v2453_v50 }
 0x302   : > { %4491 = vmatmul.mubr.msk.bf16.gmra.mxu1 %vm3005_vm15, %v2972_v6  ;;  %v2057_v17 = vpop.permute.xlu1 %2056 }
 0x303   : > { %v3445_v37 = vpack.c.bf16 %v3418_v13, %v3417_v40  ;;  %v2652_v56 = vsel %vm2596_vm10, %v2587_v60, %v2057_v17 }
 0x304   : > { %v1981_v5 = vpop.permute.xlu0 %1980 }
 0x305   : > { %4516 = vmatprep.mubr.msk.bf16.mxu0 %vm2466_vm8, %v3445_v37  ;;  %v2585_v57 = vsel %vm2531_vm9, %v2520_v47, %v1981_v5 }
 0x306   : > { %v2145_v4 = vpop.permute.xlu1 %2144 }
 0x307   : > { %v2716_v39 = vsel %vm481_vm0, %v2652_v56, %v2145_v4 }
 0x308   : > { %v2055_v62 = vpop.permute.xlu0 %2054 }
 0x309   : > { %v2650_v52 = vsel %vm2596_vm10, %v2585_v57, %v2055_v62 }
 0x30a   : > { %v2220_v35 = vpop.permute.xlu1 %2219 }
 0x30b   : > { %v2781_v9 = vsel %vm2725_vm11, %v2716_v39, %v2220_v35 }
 0x30c   : > { %v2143_v32 = vpop.permute.xlu0 %2142 }
 0x30d   : > { %v2714_v33 = vsel %vm481_vm0, %v2650_v52, %v2143_v32 }
 0x30e   : > { %v2294_v1 = vpop.permute.xlu1 %2293 }
 0x30f   : > { %v2846_v12 = vsel %vm2790_vm13, %v2781_v9, %v2294_v1 }
 0x310   : > { %v4464_v24 = vpop.f32.mrf.mxu1  ;;  %v2218_v41 = vpop.permute.xlu0 %2217 }
 0x311   : > { %v2779_v43 = vsel %vm2725_vm11, %v2714_v33, %v2218_v41 }
 0x312   : > { %v3178_v8 = vpop.f32.mrf.mxu1  ;;  %v2382_v26 = vpop.permute.xlu1 %2381 }
 0x313   : > { %v3348_v15 = vmul.f32 %v6155_v55, %v3178_v8  ;;  %v2911_v18 = vsel %vm2855_vm12, %v2846_v12, %v2382_v26 }
 0x314   : > { %v4465_v58 = vpop.f32.mrf.mxu1  ;;  %v2292_v36 = vpop.permute.xlu0 %2291 }
 0x315   : > { %v3387_v25 = vadd.f32 %v6172_v63, %v3348_v15  ;;  %v2844_v2 = vsel %vm2790_vm13, %v2779_v43, %v2292_v36 }
 0x316   : > { %v3181_v59 = vpop.f32.mrf.mxu1  ;;  %v1852_v31 = vpop.permute.xlu1 %1851 }
 0x317   : > { %v3349_v14 = vmul.f32 %v6155_v55, %v3181_v59  ;;  %v3419_v44 = vmax.f32 %v3387_v25, 0.0  ;;  %v2524_v58 = vsel %vm2466_vm8, %v6045_v51, %v1852_v31 }
 0x318   : > { %v2380_v27 = vpop.permute.xlu0 %2379 }
 0x319   : > { %v3388_v10 = vadd.f32 %v6172_v63, %v3349_v14  ;;  %v2909_v48 = vsel %vm2855_vm12, %v2844_v2, %v2380_v27 }
 0x31a   : > { %v1854_v30 = vpop.permute.xlu1 %1853 }
 0x31b   : > { %v3420_v46 = vmax.f32 %v3388_v10, 0.0  ;;  %v2526_v27 = vsel %vm2466_vm8, %v6140_v23, %v1854_v30 }
 0x31c   : > { %v2455_v42 = vpop.permute.xlu0 %2454 }
 0x31d   : > { %v3446_v49 = vpack.c.bf16 %v3420_v46, %v3419_v44  ;;  %v2974_v45 = vsel %vm2920_vm14, %v2909_v48, %v2455_v42 }
 0x31e   : > { %4494 = vmatprep.mubr.msk.bf16.mxu1 %vm3005_vm15, %v2974_v45  ;;  %v1987_v16 = vpop.permute.xlu1 %1986 }
 0x31f   : > { %4517 = vmatmul.mubr.msk.bf16.gmra.mxu0 %vm2466_vm8, %v3446_v49  ;;  %v2591_v33 = vsel %vm2531_vm9, %v2526_v27, %v1987_v16  ;;  %v6584_v27 = vld [vmem:[%s6797_s8] ss:$0 sm:$0xff] }
 0x320   : > { %v2457_v34 = vpop.permute.xlu0 %2456 }
 0x321   : > { %v2976_v29 = vsel %vm2920_vm14, %v2911_v18, %v2457_v34 }
 0x322   : > { %v4468_v19 = vpop.f32.mrf.mxu1  ;;  %4495 = vmatmul.mubr.msk.bf16.gmra.mxu1 %vm3005_vm15, %v2976_v29  ;;  %v2061_v54 = vpop.permute.xlu1 %2060 }
 0x323   : > { %v2656_v43 = vsel %vm2596_vm10, %v2591_v33, %v2061_v54 }
 0x324   : > { %v3192_v21 = vpop.f32.mrf.mxu1  ;;  %v1985_v7 = vpop.permute.xlu0 %1984 }
 0x325   : > { %v3350_v22 = vmul.f32 %v6155_v55, %v3192_v21  ;;  %v2589_v26 = vsel %vm2531_vm9, %v2524_v58, %v1985_v7 }
 0x326   : > { %v4469_v11 = vpop.f32.mrf.mxu1  ;;  %v2149_v13 = vpop.permute.xlu1 %2148 }
 0x327   : > { %v3389_v50 = vadd.f32 %v6172_v63, %v3350_v22  ;;  %v2720_v2 = vsel %vm481_vm0, %v2656_v43, %v2149_v13 }
 0x328   : > { %v3195_v28 = vpop.f32.mrf.mxu1  ;;  %v2059_v20 = vpop.permute.xlu0 %2058 }
 0x329   : > { %v3351_v40 = vmul.f32 %v6155_v55, %v3195_v28  ;;  %v3421_v37 = vmax.f32 %v3389_v50, 0.0  ;;  %v2654_v59 = vsel %vm2596_vm10, %v2589_v26, %v2059_v20 }
 0x32a   : > { %v2224_v17 = vpop.permute.xlu1 %2223 }
 0x32b   : > { %v3390_v6 = vadd.f32 %v6172_v63, %v3351_v40  ;;  %v2785_v23 = vsel %vm2725_vm11, %v2720_v2, %v2224_v17 }
 0x32c   : > { %v2147_v0 = vpop.permute.xlu0 %2146 }
 0x32d   : > { %v3422_v5 = vmax.f32 %v3390_v6, 0.0  ;;  %v2718_v25 = vsel %vm481_vm0, %v2654_v59, %v2147_v0 }
 0x32e   : > { %v2298_v35 = vpop.permute.xlu1 %2297 }
 0x32f   : > { %v3447_v62 = vpack.c.bf16 %v3422_v5, %v3421_v37  ;;  %v2850_v42 = vsel %vm2790_vm13, %v2785_v23, %v2298_v35 }
 0x330   : > { %v4472_v4 = vpop.f32.mrf.mxu1  ;;  %v2222_v32 = vpop.permute.xlu0 %2221 }
 0x331   : > { %4520 = vmatprep.mubr.msk.bf16.mxu0 %vm2466_vm8, %v3447_v62  ;;  %v2783_v51 = vsel %vm2725_vm11, %v2718_v25, %v2222_v32 }
 0x332   : > { %v3206_v24 = vpop.f32.mrf.mxu1  ;;  %v2386_v15 = vpop.permute.xlu1 %2385 }
 0x333   : > { %v3352_v41 = vmul.f32 %v6155_v55, %v3206_v24  ;;  %v2915_v39 = vsel %vm2855_vm12, %v2850_v42, %v2386_v15 }
 0x334   : > { %v4473_v1 = vpop.f32.mrf.mxu1  ;;  %v2296_v8 = vpop.permute.xlu0 %2295 }
 0x335   : > { %v3391_v38 = vadd.f32 %v6172_v63, %v3352_v41  ;;  %v2848_v31 = vsel %vm2790_vm13, %v2783_v51, %v2296_v8 }
 0x336   : > { %v3209_v36 = vpop.f32.mrf.mxu1  ;;  %v1856_v52 = vpop.permute.xlu1 %1855 }
 0x337   : > { %v3353_v47 = vmul.f32 %v6155_v55, %v3209_v36  ;;  %v3423_v10 = vmax.f32 %v3391_v38, 0.0  ;;  %v2528_v17 = vsel %vm2466_vm8, %v6157_v53, %v1856_v52 }
 0x338   : > { %v2384_v57 = vpop.permute.xlu0 %2383 }
 0x339   : > { %v3392_v14 = vadd.f32 %v6172_v63, %v3353_v47  ;;  %v2913_v60 = vsel %vm2855_vm12, %v2848_v31, %v2384_v57 }
 0x33a   : > { %v1858_v48 = vpop.permute.xlu1 %1857 }
 0x33b   : > { %v3424_v61 = vmax.f32 %v3392_v14, 0.0  ;;  %v2530_v62 = vsel %vm2466_vm8, %v6240_v3, %v1858_v48 }
 0x33c   : > { %v2459_v44 = vpop.permute.xlu0 %2458 }
 0x33d   : > { %v3448_v46 = vpack.c.bf16 %v3424_v61, %v3423_v10  ;;  %v2978_v56 = vsel %vm2920_vm14, %v2913_v60, %v2459_v44  ;;  %v6589_v10 = vld [vmem:[%s6798_s9] ss:$0 sm:$0xff]  ;;  %v4656_v61 = vld [vmem:[%s4765_s20 + $0x8] sm:$0xff]  }
 0x33e   : > { %4498 = vmatprep.mubr.msk.bf16.mxu1 %vm3005_vm15, %v2978_v56  ;;  %v1991_v30 = vpop.permute.xlu1 %1990  ;;  %v3750_v43 = vunpack.c.l.bf16 %v4656_v61  ;;  %v4657_v56 = vld [vmem:[%s4765_s20] sm:$0xff]  }
 0x33f   : > { %4521 = vmatmul.mubr.msk.bf16.gmra.mxu0 %vm2466_vm8, %v3448_v46  ;;  %v2595_v32 = vsel %vm2531_vm9, %v2530_v62, %v1991_v30  ;;  %v3748_v48 = vunpack.c.l.bf16 %v4657_v56 }
 0x340   : > { %v2461_v49 = vpop.permute.xlu0 %2460 }
 0x341   : > { %v2980_v45 = vsel %vm2920_vm14, %v2915_v39, %v2461_v49 }
 0x342   : > { %v4476_v9 = vpop.f32.mrf.mxu1  ;;  %4499 = vmatmul.mubr.msk.bf16.gmra.mxu1 %vm3005_vm15, %v2980_v45  ;;  %v2065_v29 = vpop.permute.xlu1 %2064 }
 0x343   : > { %v2660_v41 = vsel %vm2596_vm10, %v2595_v32, %v2065_v29 }
 0x344   : > { %v3220_v12 = vpop.f32.mrf.mxu1  ;;  %v1989_v18 = vpop.permute.xlu0 %1988 }
 0x345   : > { %v3354_v34 = vmul.f32 %v6155_v55, %v3220_v12  ;;  %v2593_v4 = vsel %vm2531_vm9, %v2528_v17, %v1989_v18  ;;  %v3751_v12 = vunpack.c.h.bf16 %v4656_v61  ;;  %v3749_v18 = vunpack.c.h.bf16 %v4657_v56  ;;  %v6623_v17 = vld [vmem:[%s6794_s5] ss:$0 sm:$0xff]  ;;  %v4661_v61 = vld [vmem:[%s4765_s20 + $0x10] sm:$0xff]  }
 0x346   : > { %v4477_v16 = vpop.f32.mrf.mxu1  ;;  %v2153_v54 = vpop.permute.xlu1 %2152 }
 0x347   : > { %v3393_v7 = vadd.f32 %v6172_v63, %v3354_v34  ;;  %v2724_v8 = vsel %vm481_vm0, %v2660_v41, %v2153_v54 }
 0x348   : > { %v3223_v19 = vpop.f32.mrf.mxu1  ;;  %v2063_v21 = vpop.permute.xlu0 %2062 }
 0x349   : > { %v3355_v22 = vmul.f32 %v6155_v55, %v3223_v19  ;;  %v3425_v20 = vmax.f32 %v3393_v7, 0.0  ;;  %v2658_v35 = vsel %vm2596_vm10, %v2593_v4, %v2063_v21 }
 0x34a   : > { %v2228_v40 = vpop.permute.xlu1 %2227 }
 0x34b   : > { %v3394_v11 = vadd.f32 %v6172_v63, %v3355_v22  ;;  %v2789_v53 = vsel %vm2725_vm11, %v2724_v8, %v2228_v40 }
 0x34c   : > { %v2151_v28 = vpop.permute.xlu0 %2150 }
 0x34d   : > { %v3426_v50 = vmax.f32 %v3394_v11, 0.0  ;;  %v2722_v1 = vsel %vm481_vm0, %v2658_v35, %v2151_v28  ;;  %vm3972_vm0 = vcmask 125952   ;;  %v6629_v35 = vld [vmem:[%s6795_s6] ss:$0 sm:$0xff] }
 0x34e   : > { %v2302_v0 = vpop.permute.xlu1 %2301 }
 0x34f   : > { %v3449_v13 = vpack.c.bf16 %v3426_v50, %v3425_v20  ;;  %v2854_v36 = vsel %vm2790_vm13, %v2789_v53, %v2302_v0 }
 0x350   : > { %v2226_v6 = vpop.permute.xlu0 %2225 }
 0x351   : > { %4524 = vmatprep.mubr.msk.bf16.mxu0 %vm2466_vm8, %v3449_v13  ;;  %v2787_v15 = vsel %vm2725_vm11, %v2722_v1, %v2226_v6 }
 0x352   : > { %v2390_v5 = vpop.permute.xlu1 %2389 }
 0x353   : > { %v2919_v47 = vsel %vm2855_vm12, %v2854_v36, %v2390_v5 }
 0x354   : > { %v2300_v37 = vpop.permute.xlu0 %2299 }
 0x355   : > { %v2852_v58 = vsel %vm2790_vm13, %v2787_v15, %v2300_v37 }
 0x356   : > { %v2465_v3 = vpop.permute.xlu1 %2464 }
 0x357   : > { %v2984_v57 = vsel %vm2920_vm14, %v2919_v47, %v2465_v3 }
 0x358   : > { %v2388_v24 = vpop.permute.xlu0 %2387 }
 0x359   : > { %v2917_v26 = vsel %vm2855_vm12, %v2852_v58, %v2388_v24 }
 0x35c   : > { %v2463_v38 = vpop.permute.xlu0 %2462 }
 0x35d   : > { %v2982_v59 = vsel %vm2920_vm14, %v2917_v26, %v2463_v38 }
 0x35e   : > { %4502 = vmatprep.mubr.msk.bf16.mxu1 %vm3005_vm15, %v2982_v59  ;;  %v4660_v59 = vld [vmem:[%s4765_s20 + $0x18] sm:$0xff]  }
 0x35f   : > { %4503 = vmatmul.mubr.msk.bf16.gmra.mxu1 %vm3005_vm15, %v2984_v57  ;;  %v3754_v57 = vunpack.c.l.bf16 %v4660_v59 }
 0x362   : > { %v4480_v25 = vpop.f32.mrf.mxu1 }
 0x364   : > { %v3234_v14 = vpop.f32.mrf.mxu1 }
 0x365   : > { %v3356_v52 = vmul.f32 %v6155_v55, %v3234_v14 }
 0x366   : > { %v4481_v51 = vpop.f32.mrf.mxu1 }
 0x367   : > { %v4510_v33 = vpop.f32.mrf.mxu0  ;;  %v3395_v44 = vadd.f32 %v6172_v63, %v3356_v52 }
 0x368   : > { %v3679_v31 = vmul.f32 %v4510_v33, %v6584_v27  ;;  %v3237_v60 = vpop.f32.mrf.mxu1 }
 0x369   : > { %v3357_v2 = vmul.f32 %v6155_v55, %v3237_v60  ;;  %v3543_v46 = vpop.f32.mrf.mxu0  ;;  %v3427_v34 = vmax.f32 %v3395_v44, 0.0 }
 0x36a   : > { %v3718_v23 = vadd.f32 %v6589_v10, %v3679_v31  ;;  %v3677_v42 = vmul.f32 %v6584_v27, %v3543_v46 }
 0x36b   : > { %v3396_v39 = vadd.f32 %v6172_v63, %v3357_v2  ;;  %v4511_v49 = vpop.f32.mrf.mxu0 }
 0x36c   : > { %v3782_v45 = vadd.f32 %v3750_v43, %v3718_v23  ;;  %v3716_v30 = vadd.f32 %v6589_v10, %v3677_v42  ;;  %v3680_v9 = vmul.f32 %v4511_v49, %v6584_v27  ;;  %v3752_v43 = vunpack.c.l.bf16 %v4661_v61 }
 0x36d   : > { %v3428_v55 = vmax.f32 %v3396_v39, 0.0  ;;  %v3546_v29 = vpop.f32.mrf.mxu0  ;;  %v3753_v49 = vunpack.c.h.bf16 %v4661_v61 }
 0x36e   : > { %v3814_v16 = vmax.f32 %v3782_v45, 0.0  ;;  %v3780_v19 = vadd.f32 %v3748_v48, %v3716_v30  ;;  %v3719_v21 = vadd.f32 %v6589_v10, %v3680_v9  ;;  %v3678_v7 = vmul.f32 %v6584_v27, %v3546_v29 }
 0x36f   : > { %v3450_v63 = vpack.c.bf16 %v3428_v55, %v3427_v34  ;;  %v3755_v48 = vunpack.c.h.bf16 %v4660_v59 }
 0x370   : > { %v4303_v22 = vpack.c.bf16 %v3814_v16, %v3814_v16  ;;  %v3812_v54 = vmax.f32 %v3780_v19, 0.0  ;;  %v3783_v11 = vadd.f32 %v3751_v12, %v3719_v21  ;;  %v3717_v28 = vadd.f32 %v6589_v10, %v3678_v7 }
 0x371   : > { %4525 = vmatmul.mubr.msk.bf16.gmra.mxu0 %vm2466_vm8, %v3450_v63 }
 0x372   : > { %3975 = vst.msk [vmem:[%s6608_s11 + $0x8] sm:$0xf] %vm3972_vm0, %v4303_v22  ;;  %v4301_v20 = vpack.c.bf16 %v3812_v54, %v3812_v54  ;;  %v3815_v50 = vmax.f32 %v3783_v11, 0.0  ;;  %v3781_v40 = vadd.f32 %v3749_v18, %v3717_v28 }
 0x374   : > { %3973 = vst.msk [vmem:[%s6608_s11] sm:$0xf] %vm3972_vm0, %v4301_v20  ;;  %v4304_v13 = vpack.c.bf16 %v3815_v50, %v3815_v50  ;;  %v3813_v6 = vmax.f32 %v3781_v40, 0.0 }
 0x376   : > { %3976 = vst.msk [vmem:[%s6608_s11 + $0xc] sm:$0xf] %vm3972_vm0, %v4304_v13  ;;  %v4302_v0 = vpack.c.bf16 %v3813_v6, %v3813_v6 }
 0x378   : > { %3974 = vst.msk [vmem:[%s6608_s11 + $0x4] sm:$0xf] %vm3972_vm0, %v4302_v0 }
 0x382   : > { %v4484_v37 = vpop.f32.mrf.mxu1 }
 0x384   : > { %v3248_v5 = vpop.f32.mrf.mxu1 }
 0x385   : > { %v3358_v62 = vmul.f32 %v6623_v17, %v3248_v5 }
 0x386   : > { %v4485_v4 = vpop.f32.mrf.mxu1 }
 0x387   : > { %v3397_v24 = vadd.f32 %v6629_v35, %v3358_v62 }
 0x388   : > { %v3251_v32 = vpop.f32.mrf.mxu1 }
 0x389   : > { %v3359_v41 = vmul.f32 %v6623_v17, %v3251_v32  ;;  %v3429_v8 = vmax.f32 %v3397_v24, 0.0  ;;  %v4662_v24 = vld [vmem:[%s4765_s20 + $0x28] sm:$0xff]  }
 0x38a   : > { %v3759_v59 = vunpack.c.h.bf16 %v4662_v24 }
 0x38b   : > { %v3398_v1 = vadd.f32 %v6629_v35, %v3359_v41  ;;  %v3758_v41 = vunpack.c.l.bf16 %v4662_v24 }
 0x38d   : > { %v3430_v15 = vmax.f32 %v3398_v1, 0.0 }
 0x38f   : > { %v3451_v53 = vpack.c.bf16 %v3430_v15, %v3429_v8 }
 0x391   : > { %4528 = vmatprep.mubr.msk.bf16.mxu0 %vm2466_vm8, %v3451_v53  ;;  %v4663_v53 = vld [vmem:[%s4765_s20 + $0x20] sm:$0xff]  }
 0x3a2   : > { %v4488_v58 = vpop.f32.mrf.mxu1 }
 0x3a3   : > { %v3756_v58 = vunpack.c.l.bf16 %v4663_v53 }
 0x3a4   : > { %v3262_v3 = vpop.f32.mrf.mxu1 }
 0x3a5   : > { %v3360_v36 = vmul.f32 %v6623_v17, %v3262_v3 }
 0x3a6   : > { %v4489_v26 = vpop.f32.mrf.mxu1 }
 0x3a7   : > { %v4514_v38 = vpop.f32.mrf.mxu0  ;;  %v3399_v14 = vadd.f32 %v6629_v35, %v3360_v36 }
 0x3a8   : > { %v3683_v47 = vmul.f32 %v4514_v38, %v6584_v27  ;;  %v3265_v25 = vpop.f32.mrf.mxu1 }
 0x3a9   : > { %v3361_v52 = vmul.f32 %v6623_v17, %v3265_v25  ;;  %v3559_v51 = vpop.f32.mrf.mxu0  ;;  %v3431_v23 = vmax.f32 %v3399_v14, 0.0 }
 0x3aa   : > { %v3722_v33 = vadd.f32 %v6589_v10, %v3683_v47  ;;  %v3681_v31 = vmul.f32 %v6584_v27, %v3559_v51 }
 0x3ab   : > { %v3400_v60 = vadd.f32 %v6629_v35, %v3361_v52  ;;  %v4515_v44 = vpop.f32.mrf.mxu0  ;;  %v3757_v52 = vunpack.c.h.bf16 %v4663_v53 }
 0x3ac   : > { %v3786_v2 = vadd.f32 %v3754_v57, %v3722_v33  ;;  %v3720_v46 = vadd.f32 %v6589_v10, %v3681_v31  ;;  %v3684_v56 = vmul.f32 %v4515_v44, %v6584_v27 }
 0x3ad   : > { %v3432_v42 = vmax.f32 %v3400_v60, 0.0  ;;  %v3562_v39 = vpop.f32.mrf.mxu0 }
 0x3ae   : > { %v3818_v45 = vmax.f32 %v3786_v2, 0.0  ;;  %v3784_v30 = vadd.f32 %v3752_v43, %v3720_v46  ;;  %v3723_v9 = vadd.f32 %v6589_v10, %v3684_v56  ;;  %v3682_v12 = vmul.f32 %v6584_v27, %v3562_v39 }
 0x3af   : > { %v3452_v18 = vpack.c.bf16 %v3432_v42, %v3431_v23 }
 0x3b0   : > { %v4307_v34 = vpack.c.bf16 %v3818_v45, %v3818_v45  ;;  %v3816_v55 = vmax.f32 %v3784_v30, 0.0  ;;  %v3787_v29 = vadd.f32 %v3755_v48, %v3723_v9  ;;  %v3721_v16 = vadd.f32 %v6589_v10, %v3682_v12 }
 0x3b1   : > { %4529 = vmatmul.mubr.msk.bf16.gmra.mxu0 %vm2466_vm8, %v3452_v18 }
 0x3b2   : > { %3979 = vst.msk [vmem:[%s6608_s11 + $0x18] sm:$0xf] %vm3972_vm0, %v4307_v34  ;;  %v4305_v19 = vpack.c.bf16 %v3816_v55, %v3816_v55  ;;  %v3819_v21 = vmax.f32 %v3787_v29, 0.0  ;;  %v3785_v7 = vadd.f32 %v3753_v49, %v3721_v16 }
 0x3b4   : > { %3977 = vst.msk [vmem:[%s6608_s11 + $0x10] sm:$0xf] %vm3972_vm0, %v4305_v19  ;;  %v4308_v63 = vpack.c.bf16 %v3819_v21, %v3819_v21  ;;  %v3817_v22 = vmax.f32 %v3785_v7, 0.0  ;;  %v4664_v19 = vld [vmem:[%s4765_s20 + $0x38] sm:$0xff]  }
 0x3b5   : > { %v3762_v21 = vunpack.c.l.bf16 %v4664_v19 }
 0x3b6   : > { %3980 = vst.msk [vmem:[%s6608_s11 + $0x1c] sm:$0xf] %vm3972_vm0, %v4308_v63  ;;  %v4306_v54 = vpack.c.bf16 %v3817_v22, %v3817_v22 }
 0x3b8   : > { %3978 = vst.msk [vmem:[%s6608_s11 + $0x14] sm:$0xf] %vm3972_vm0, %v4306_v54  ;;  %v4665_v54 = vld [vmem:[%s4765_s20 + $0x30] sm:$0xff]  }
 0x3c2   : > { %v4492_v11 = vpop.f32.mrf.mxu1 }
 0x3c3   : > { %v3760_v11 = vunpack.c.l.bf16 %v4665_v54 }
 0x3c4   : > { %v3276_v28 = vpop.f32.mrf.mxu1 }
 0x3c5   : > { %v3362_v20 = vmul.f32 %v6623_v17, %v3276_v28 }
 0x3c6   : > { %v4493_v50 = vpop.f32.mrf.mxu1 }
 0x3c7   : > { %v3401_v13 = vadd.f32 %v6629_v35, %v3362_v20 }
 0x3c8   : > { %v3279_v40 = vpop.f32.mrf.mxu1 }
 0x3c9   : > { %v3363_v6 = vmul.f32 %v6623_v17, %v3279_v40  ;;  %v3433_v37 = vmax.f32 %v3401_v13, 0.0 }
 0x3cb   : > { %v3402_v0 = vadd.f32 %v6629_v35, %v3363_v6  ;;  %v3763_v6 = vunpack.c.h.bf16 %v4664_v19 }
 0x3cd   : > { %v3434_v5 = vmax.f32 %v3402_v0, 0.0 }
 0x3cf   : > { %v3453_v62 = vpack.c.bf16 %v3434_v5, %v3433_v37 }
 0x3d1   : > { %4532 = vmatprep.mubr.msk.bf16.mxu0 %vm2466_vm8, %v3453_v62  ;;  %v3761_v62 = vunpack.c.h.bf16 %v4665_v54 }
 0x3df   : > { %v4518_v4 = vpop.f32.mrf.mxu0 }
 0x3e0   : > { %v3687_v32 = vmul.f32 %v4518_v4, %v6584_v27 }
 0x3e1   : > { %v3575_v1 = vpop.f32.mrf.mxu0 }
 0x3e2   : > { %v3726_v8 = vadd.f32 %v6589_v10, %v3687_v32  ;;  %v3685_v15 = vmul.f32 %v6584_v27, %v3575_v1  ;;  %v4496_v3 = vpop.f32.mrf.mxu1 }
 0x3e3   : > { %v4519_v36 = vpop.f32.mrf.mxu0 }
 0x3e4   : > { %v3790_v26 = vadd.f32 %v3758_v41, %v3726_v8  ;;  %v3724_v38 = vadd.f32 %v6589_v10, %v3685_v15  ;;  %v3688_v47 = vmul.f32 %v4519_v36, %v6584_v27  ;;  %v3290_v57 = vpop.f32.mrf.mxu1 }
 0x3e5   : > { %v3364_v25 = vmul.f32 %v6623_v17, %v3290_v57  ;;  %v3578_v14 = vpop.f32.mrf.mxu0 }
 0x3e6   : > { %v3822_v51 = vmax.f32 %v3790_v26, 0.0  ;;  %v3788_v33 = vadd.f32 %v3756_v58, %v3724_v38  ;;  %v3727_v31 = vadd.f32 %v6589_v10, %v3688_v47  ;;  %v3686_v61 = vmul.f32 %v6584_v27, %v3578_v14  ;;  %v4497_v43 = vpop.f32.mrf.mxu1 }
 0x3e7   : > { %v3403_v48 = vadd.f32 %v6629_v35, %v3364_v25 }
 0x3e8   : > { %v4311_v60 = vpack.c.bf16 %v3822_v51, %v3822_v51  ;;  %v3820_v44 = vmax.f32 %v3788_v33, 0.0  ;;  %v3791_v2 = vadd.f32 %v3759_v59, %v3727_v31  ;;  %v3725_v46 = vadd.f32 %v6589_v10, %v3686_v61  ;;  %v3293_v56 = vpop.f32.mrf.mxu1 }
 0x3e9   : > { %v3365_v23 = vmul.f32 %v6623_v17, %v3293_v56  ;;  %v3435_v12 = vmax.f32 %v3403_v48, 0.0 }
 0x3ea   : > { %3983 = vst.msk [vmem:[%s6608_s11 + $0x28] sm:$0xf] %vm3972_vm0, %v4311_v60  ;;  %v4309_v42 = vpack.c.bf16 %v3820_v44, %v3820_v44  ;;  %v3823_v39 = vmax.f32 %v3791_v2, 0.0  ;;  %v3789_v49 = vadd.f32 %v3757_v52, %v3725_v46 }
 0x3eb   : > { %v3404_v45 = vadd.f32 %v6629_v35, %v3365_v23 }
 0x3ec   : > { %3981 = vst.msk [vmem:[%s6608_s11 + $0x20] sm:$0xf] %vm3972_vm0, %v4309_v42  ;;  %v4312_v30 = vpack.c.bf16 %v3823_v39, %v3823_v39  ;;  %v3821_v9 = vmax.f32 %v3789_v49, 0.0 }
 0x3ed   : > { %v3436_v18 = vmax.f32 %v3404_v45, 0.0 }
 0x3ee   : > { %3984 = vst.msk [vmem:[%s6608_s11 + $0x2c] sm:$0xf] %vm3972_vm0, %v4312_v30  ;;  %v4310_v34 = vpack.c.bf16 %v3821_v9, %v3821_v9  ;;  %v4666_v30 = vld [vmem:[%s4765_s20 + $0x48] sm:$0xff]  }
 0x3ef   : > { %v3454_v55 = vpack.c.bf16 %v3436_v18, %v3435_v12  ;;  %v3766_v9 = vunpack.c.l.bf16 %v4666_v30 }
 0x3f0   : > { %3982 = vst.msk [vmem:[%s6608_s11 + $0x24] sm:$0xf] %vm3972_vm0, %v4310_v34 }
 0x3f1   : > { %4533 = vmatmul.mubr.msk.bf16.gmra.mxu0 %vm2466_vm8, %v3454_v55  ;;  %v4667_v55 = vld [vmem:[%s4765_s20 + $0x40] sm:$0xff]  }
 0x3ff   : > { %v4522_v29 = vpop.f32.mrf.mxu0 }
 0x400   : > { %v3691_v16 = vmul.f32 %v4522_v29, %v6584_v27  ;;  %v3764_v29 = vunpack.c.l.bf16 %v4667_v55 }
 0x401   : > { %v3591_v7 = vpop.f32.mrf.mxu0 }
 0x402   : > { %v3730_v63 = vadd.f32 %v6589_v10, %v3691_v16  ;;  %v3689_v22 = vmul.f32 %v6584_v27, %v3591_v7  ;;  %v4500_v28 = vpop.f32.mrf.mxu1 }
 0x403   : > { %v4523_v20 = vpop.f32.mrf.mxu0 }
 0x404   : > { %v3794_v50 = vadd.f32 %v3762_v21, %v3730_v63  ;;  %v3728_v40 = vadd.f32 %v6589_v10, %v3689_v22  ;;  %v3692_v13 = vmul.f32 %v4523_v20, %v6584_v27  ;;  %v3304_v0 = vpop.f32.mrf.mxu1  ;;  %v3767_v21 = vunpack.c.h.bf16 %v4666_v30 }
 0x405   : > { %v3366_v37 = vmul.f32 %v6623_v17, %v3304_v0  ;;  %v3594_v5 = vpop.f32.mrf.mxu0  ;;  %v3765_v63 = vunpack.c.h.bf16 %v4667_v55 }
 0x406   : > { %v3826_v4 = vmax.f32 %v3794_v50, 0.0  ;;  %v3792_v32 = vadd.f32 %v3760_v11, %v3728_v40  ;;  %v3731_v24 = vadd.f32 %v6589_v10, %v3692_v13  ;;  %v3690_v41 = vmul.f32 %v6584_v27, %v3594_v5  ;;  %v4501_v1 = vpop.f32.mrf.mxu1 }
 0x407   : > { %v3405_v36 = vadd.f32 %v6629_v35, %v3366_v37 }
 0x408   : > { %v4315_v8 = vpack.c.bf16 %v3826_v4, %v3826_v4  ;;  %v3824_v15 = vmax.f32 %v3792_v32, 0.0  ;;  %v3795_v53 = vadd.f32 %v3763_v6, %v3731_v24  ;;  %v3729_v58 = vadd.f32 %v6589_v10, %v3690_v41  ;;  %v3307_v3 = vpop.f32.mrf.mxu1  ;;  %v4668_v41 = vld [vmem:[%s4765_s20 + $0x58] sm:$0xff]  }
 0x409   : > { %v3367_v26 = vmul.f32 %v6623_v17, %v3307_v3  ;;  %v3437_v52 = vmax.f32 %v3405_v36, 0.0  ;;  %v3770_v1 = vunpack.c.l.bf16 %v4668_v41 }
 0x40a   : > { %3987 = vst.msk [vmem:[%s6608_s11 + $0x38] sm:$0xf] %vm3972_vm0, %v4315_v8  ;;  %v4313_v38 = vpack.c.bf16 %v3824_v15, %v3824_v15  ;;  %v3827_v47 = vmax.f32 %v3795_v53, 0.0  ;;  %v3793_v59 = vadd.f32 %v3761_v62, %v3729_v58  ;;  %v4669_v58 = vld [vmem:[%s4765_s20 + $0x50] sm:$0xff]  }
 0x40b   : > { %v3406_v57 = vadd.f32 %v6629_v35, %v3367_v26  ;;  %v3768_v3 = vunpack.c.l.bf16 %v4669_v58 }
 0x40c   : > { %3985 = vst.msk [vmem:[%s6608_s11 + $0x30] sm:$0xf] %vm3972_vm0, %v4313_v38  ;;  %v4316_v25 = vpack.c.bf16 %v3827_v47, %v3827_v47  ;;  %v3825_v14 = vmax.f32 %v3793_v59, 0.0  ;;  %v3771_v59 = vunpack.c.h.bf16 %v4668_v41 }
 0x40d   : > { %v3438_v51 = vmax.f32 %v3406_v57, 0.0 }
 0x40e   : > { %3988 = vst.msk [vmem:[%s6608_s11 + $0x3c] sm:$0xf] %vm3972_vm0, %v4316_v25  ;;  %v4314_v33 = vpack.c.bf16 %v3825_v14, %v3825_v14  ;;  %v3769_v25 = vunpack.c.h.bf16 %v4669_v58 }
 0x40f   : > { %v3455_v31 = vpack.c.bf16 %v3438_v51, %v3437_v52 }
 0x410   : > { %3986 = vst.msk [vmem:[%s6608_s11 + $0x34] sm:$0xf] %vm3972_vm0, %v4314_v33 }
 0x411   : > { %4536 = vmatprep.mubr.msk.bf16.mxu0 %vm2466_vm8, %v3455_v31 }
 0x41f   : > { %v4504_v61 = vpop.f32.mrf.mxu1 }
 0x421   : > { %v3318_v43 = vpop.f32.mrf.mxu1 }
 0x422   : > { %v3368_v60 = vmul.f32 %v6623_v17, %v3318_v43 }
 0x423   : > { %v4505_v44 = vpop.f32.mrf.mxu1 }
 0x424   : > { %v3407_v46 = vadd.f32 %v6629_v35, %v3368_v60 }
 0x425   : > { %v3321_v2 = vpop.f32.mrf.mxu1 }
 0x426   : > { %v3369_v56 = vmul.f32 %v6623_v17, %v3321_v2  ;;  %v3439_v23 = vmax.f32 %v3407_v46, 0.0 }
 0x428   : > { %v3408_v48 = vadd.f32 %v6629_v35, %v3369_v56 }
 0x42a   : > { %v3440_v42 = vmax.f32 %v3408_v48, 0.0 }
 0x42c   : > { %v3456_v39 = vpack.c.bf16 %v3440_v42, %v3439_v23 }
 0x42e   : > { %4537 = vmatmul.mubr.msk.bf16.gmra.mxu0 %vm2466_vm8, %v3456_v39 }
 0x431   : > { %v4526_v49 = vpop.f32.mrf.mxu0 }
 0x432   : > { %v3695_v45 = vmul.f32 %v4526_v49, %v6584_v27  ;;  %v4670_v49 = vld [vmem:[%s4765_s20 + $0x68] sm:$0xff]  }
 0x433   : > { %v3607_v12 = vpop.f32.mrf.mxu0 }
 0x434   : > { %v3734_v18 = vadd.f32 %v6589_v10, %v3695_v45  ;;  %v3693_v34 = vmul.f32 %v6584_v27, %v3607_v12  ;;  %v3774_v45 = vunpack.c.l.bf16 %v4670_v49 }
 0x435   : > { %v4527_v17 = vpop.f32.mrf.mxu0 }
 0x436   : > { %v3798_v35 = vadd.f32 %v3766_v9, %v3734_v18  ;;  %v3732_v16 = vadd.f32 %v6589_v10, %v3693_v34  ;;  %v3696_v19 = vmul.f32 %v4527_v17, %v6584_v27  ;;  %v4671_v18 = vld [vmem:[%s4765_s20 + $0x60] sm:$0xff]  }
 0x437   : > { %v3610_v7 = vpop.f32.mrf.mxu0  ;;  %v3772_v34 = vunpack.c.l.bf16 %v4671_v18 }
 0x438   : > { %v3830_v22 = vmax.f32 %v3798_v35, 0.0  ;;  %v3796_v54 = vadd.f32 %v3764_v29, %v3732_v16  ;;  %v3735_v11 = vadd.f32 %v6589_v10, %v3696_v19  ;;  %v3694_v28 = vmul.f32 %v6584_v27, %v3610_v7 }
 0x439   : > { %v3775_v16 = vunpack.c.h.bf16 %v4670_v49 }
 0x43a   : > { %v4319_v20 = vpack.c.bf16 %v3830_v22, %v3830_v22  ;;  %v3828_v50 = vmax.f32 %v3796_v54, 0.0  ;;  %v3799_v40 = vadd.f32 %v3767_v21, %v3735_v11  ;;  %v3733_v13 = vadd.f32 %v6589_v10, %v3694_v28 }
 0x43b   : > { %v3773_v21 = vunpack.c.h.bf16 %v4671_v18 }
 0x43c   : > { %3991 = vst.msk [vmem:[%s6608_s11 + $0x48] sm:$0xf] %vm3972_vm0, %v4319_v20  ;;  %v4317_v6 = vpack.c.bf16 %v3828_v50, %v3828_v50  ;;  %v3831_v0 = vmax.f32 %v3799_v40, 0.0  ;;  %v3797_v37 = vadd.f32 %v3765_v63, %v3733_v13 }
 0x43e   : > { %3989 = vst.msk [vmem:[%s6608_s11 + $0x40] sm:$0xf] %vm3972_vm0, %v4317_v6  ;;  %v4320_v5 = vpack.c.bf16 %v3831_v0, %v3831_v0  ;;  %v3829_v62 = vmax.f32 %v3797_v37, 0.0 }
 0x440   : > { %3992 = vst.msk [vmem:[%s6608_s11 + $0x4c] sm:$0xf] %vm3972_vm0, %v4320_v5  ;;  %v4318_v4 = vpack.c.bf16 %v3829_v62, %v3829_v62 }
 0x442   : > { %3990 = vst.msk [vmem:[%s6608_s11 + $0x44] sm:$0xf] %vm3972_vm0, %v4318_v4 }
 0x471   : > { %v4530_v32 = vpop.f32.mrf.mxu0 }
 0x472   : > { %v3699_v24 = vmul.f32 %v4530_v32, %v6584_v27  ;;  %v4672_v32 = vld [vmem:[%s4765_s20 + $0x78] sm:$0xff]  }
 0x473   : > { %v3623_v8 = vpop.f32.mrf.mxu0 }
 0x474   : > { %v3738_v15 = vadd.f32 %v6589_v10, %v3699_v24  ;;  %v3697_v53 = vmul.f32 %v6584_v27, %v3623_v8  ;;  %v3778_v24 = vunpack.c.l.bf16 %v4672_v32 }
 0x475   : > { %v4531_v36 = vpop.f32.mrf.mxu0 }
 0x476   : > { %v3802_v26 = vadd.f32 %v3770_v1, %v3738_v15  ;;  %v3736_v38 = vadd.f32 %v6589_v10, %v3697_v53  ;;  %v3700_v47 = vmul.f32 %v4531_v36, %v6584_v27  ;;  %v4673_v15 = vld [vmem:[%s4765_s20 + $0x70] sm:$0xff]  }
 0x477   : > { %v3626_v57 = vpop.f32.mrf.mxu0  ;;  %v3776_v53 = vunpack.c.l.bf16 %v4673_v15 }
 0x478   : > { %v3834_v14 = vmax.f32 %v3802_v26, 0.0  ;;  %v3800_v52 = vadd.f32 %v3768_v3, %v3736_v38  ;;  %v3739_v51 = vadd.f32 %v6589_v10, %v3700_v47  ;;  %v3698_v33 = vmul.f32 %v6584_v27, %v3626_v57 }
 0x479   : > { %v3779_v38 = vunpack.c.h.bf16 %v4672_v32 }
 0x47a   : > { %v4323_v31 = vpack.c.bf16 %v3834_v14, %v3834_v14  ;;  %v3832_v61 = vmax.f32 %v3800_v52, 0.0  ;;  %v3803_v43 = vadd.f32 %v3771_v59, %v3739_v51  ;;  %v3737_v60 = vadd.f32 %v6589_v10, %v3698_v33 }
 0x47b   : > { %v3777_v59 = vunpack.c.h.bf16 %v4673_v15 }
 0x47c   : > { %3995 = vst.msk [vmem:[%s6608_s11 + $0x58] sm:$0xf] %vm3972_vm0, %v4323_v31  ;;  %v4321_v44 = vpack.c.bf16 %v3832_v61, %v3832_v61  ;;  %v3835_v2 = vmax.f32 %v3803_v43, 0.0  ;;  %v3801_v46 = vadd.f32 %v3769_v25, %v3737_v60 }
 0x47e   : > { %3993 = vst.msk [vmem:[%s6608_s11 + $0x50] sm:$0xf] %vm3972_vm0, %v4321_v44  ;;  %v4324_v56 = vpack.c.bf16 %v3835_v2, %v3835_v2  ;;  %v3833_v48 = vmax.f32 %v3801_v46, 0.0 }
 0x480   : > { %3996 = vst.msk [vmem:[%s6608_s11 + $0x5c] sm:$0xf] %vm3972_vm0, %v4324_v56  ;;  %v4322_v23 = vpack.c.bf16 %v3833_v48, %v3833_v48 }
 0x482   : > { %3994 = vst.msk [vmem:[%s6608_s11 + $0x54] sm:$0xf] %vm3972_vm0, %v4322_v23 }
 0x4b1   : > { %v4534_v42 = vpop.f32.mrf.mxu0 }
 0x4b2   : > { %v3703_v39 = vmul.f32 %v4534_v42, %v6584_v27 }
 0x4b3   : > { %v3639_v30 = vpop.f32.mrf.mxu0 }
 0x4b4   : > { %v3742_v9 = vadd.f32 %v6589_v10, %v3703_v39  ;;  %v3701_v12 = vmul.f32 %v6584_v27, %v3639_v30 }
 0x4b5   : > { %v4535_v55 = vpop.f32.mrf.mxu0 }
 0x4b6   : > { %v3806_v29 = vadd.f32 %v3774_v45, %v3742_v9  ;;  %v3740_v17 = vadd.f32 %v6589_v10, %v3701_v12  ;;  %v3704_v35 = vmul.f32 %v4535_v55, %v6584_v27 }
 0x4b7   : > { %v3642_v19 = vpop.f32.mrf.mxu0 }
 0x4b8   : > { %v3838_v7 = vmax.f32 %v3806_v29, 0.0  ;;  %v3804_v63 = vadd.f32 %v3772_v34, %v3740_v17  ;;  %v3743_v22 = vadd.f32 %v6589_v10, %v3704_v35  ;;  %v3702_v54 = vmul.f32 %v6584_v27, %v3642_v19 }
 0x4ba   : > { %v4327_v11 = vpack.c.bf16 %v3838_v7, %v3838_v7  ;;  %v3836_v28 = vmax.f32 %v3804_v63, 0.0  ;;  %v3807_v20 = vadd.f32 %v3775_v16, %v3743_v22  ;;  %v3741_v50 = vadd.f32 %v6589_v10, %v3702_v54 }
 0x4bc   : > { %3999 = vst.msk [vmem:[%s6608_s11 + $0x68] sm:$0xf] %vm3972_vm0, %v4327_v11  ;;  %v4325_v40 = vpack.c.bf16 %v3836_v28, %v3836_v28  ;;  %v3839_v13 = vmax.f32 %v3807_v20, 0.0  ;;  %v3805_v6 = vadd.f32 %v3773_v21, %v3741_v50 }
 0x4be   : > { %3997 = vst.msk [vmem:[%s6608_s11 + $0x60] sm:$0xf] %vm3972_vm0, %v4325_v40  ;;  %v4328_v0 = vpack.c.bf16 %v3839_v13, %v3839_v13  ;;  %v3837_v37 = vmax.f32 %v3805_v6, 0.0 }
 0x4c0   : > { %4000 = vst.msk [vmem:[%s6608_s11 + $0x6c] sm:$0xf] %vm3972_vm0, %v4328_v0  ;;  %v4326_v5 = vpack.c.bf16 %v3837_v37, %v3837_v37 }
 0x4c2   : > { %3998 = vst.msk [vmem:[%s6608_s11 + $0x64] sm:$0xf] %vm3972_vm0, %v4326_v5 }
 0x4ee   : > { %v4538_v62 = vpop.f32.mrf.mxu0 }
 0x4ef   : > { %v3707_v4 = vmul.f32 %v4538_v62, %v6584_v27 }
 0x4f0   : > { %v3655_v41 = vpop.f32.mrf.mxu0 }
 0x4f1   : > { %v3746_v1 = vadd.f32 %v6589_v10, %v3707_v4  ;;  %v3705_v8 = vmul.f32 %v6584_v27, %v3655_v41 }
 0x4f2   : > { %v4539_v58 = vpop.f32.mrf.mxu0 }
 0x4f3   : > { %v3810_v3 = vadd.f32 %v3778_v24, %v3746_v1  ;;  %v3744_v36 = vadd.f32 %v6589_v10, %v3705_v8  ;;  %v3708_v26 = vmul.f32 %v4539_v58, %v6584_v27 }
 0x4f4   : > { %v3658_v47 = vpop.f32.mrf.mxu0 }
 0x4f5   : > { %v3842_v57 = vmax.f32 %v3810_v3, 0.0  ;;  %v3808_v25 = vadd.f32 %v3776_v53, %v3744_v36  ;;  %v3747_v14 = vadd.f32 %v6589_v10, %v3708_v26  ;;  %v3706_v52 = vmul.f32 %v6584_v27, %v3658_v47 }
 0x4f7   : > { %v4331_v51 = vpack.c.bf16 %v3842_v57, %v3842_v57  ;;  %v3840_v33 = vmax.f32 %v3808_v25, 0.0  ;;  %v3811_v31 = vadd.f32 %v3779_v38, %v3747_v14  ;;  %v3745_v61 = vadd.f32 %v6589_v10, %v3706_v52 }
 0x4f9   : > { %4003 = vst.msk [vmem:[%s6608_s11 + $0x78] sm:$0xf] %vm3972_vm0, %v4331_v51  ;;  %v4329_v43 = vpack.c.bf16 %v3840_v33, %v3840_v33  ;;  %v3843_v60 = vmax.f32 %v3811_v31, 0.0  ;;  %v3809_v44 = vadd.f32 %v3777_v59, %v3745_v61 }
 0x4fb   : > { %4001 = vst.msk [vmem:[%s6608_s11 + $0x70] sm:$0xf] %vm3972_vm0, %v4329_v43  ;;  %v4332_v2 = vpack.c.bf16 %v3843_v60, %v3843_v60  ;;  %v3841_v46 = vmax.f32 %v3809_v44, 0.0 }
 0x4fd   : > { %4004 = vst.msk [vmem:[%s6608_s11 + $0x7c] sm:$0xf] %vm3972_vm0, %v4332_v2  ;;  %v4330_v56 = vpack.c.bf16 %v3841_v46, %v3841_v46 }
 0x4ff   : > { %4002 = vst.msk [vmem:[%s6608_s11 + $0x74] sm:$0xf] %vm3972_vm0, %v4330_v56 }
 0x500 PF: > { %s20_s13 = sadd.s32 1, %s4680_s13  }
 0x501   : > { %p17_p4 = scmp.ge.s32.totalorder %s20_s13, 4  }
 0x503   :  { %19 = sbr.rel (!%p17_p4) target bundleno = 1 (0x1), region = 90 }

</bundles_post_ra>
